<compile_context>
chip_gen: v6e
topology: v6e:2x2x1
jax: 0.10.0
libtpu: 0.0.40
codegen_flags: <defaults>
</compile_context>

<pallas_src>
import functools

import jax
import jax.numpy as jnp
from jax import lax
from jax.experimental import pallas as pl
from jax.experimental.pallas import tpu as pltpu


def _round_up(x, m):
    return (x + m - 1) // m * m


# ----------------------------- plain-JAX glue ---------------------------------
# TODO(synk): there is no Pallas/Mosaic FFT primitive; fastmri.ifft2c
# (ifftshift -> orthonormal 2D IFFT -> fftshift) + complex_abs run in plain JAX.
def _ifft2c_abs(kspace):
    """kspace: (N, H, W, 2) float32 -> complex magnitude image (N, H, W) f32."""
    c = kspace[..., 0] + 1j * kspace[..., 1]
    c = jnp.fft.ifftshift(c, axes=(-2, -1))
    c = jnp.fft.ifftn(c, axes=(-2, -1), norm="ortho")
    c = jnp.fft.fftshift(c, axes=(-2, -1))
    return jnp.abs(c).astype(jnp.float32)


# ----------------------- shared in-kernel chunk prep ---------------------------
# Pass-1 accumulator row layout (lane partials of width Wp):
#   rows 0..4  : mins  of [hdiff_pred, hdiff_gt, vdiff_pred, vdiff_gt, gt]
#   rows 8..12 : maxes of the same
#   rows 16..19: sums  of the four finite differences
#   rows 20..23: sums of squares of the four finite differences
_STAT_ROWS = 24


def _chunk_fields(pred_ref, gt_ref, r0, *, H, W, Hp, Wp, TH):
    """One TH-row chunk: magnitudes, rolled finite diffs, validity masks."""
    out_c = pred_ref[pl.ds(r0, TH), :]            # (TH, Wp)
    gt_c = gt_ref[pl.ds(r0, TH), :]

    # one-row halo from the next chunk for the vertical difference (clamped;
    # the clamped case only feeds global row Hp-1 >= H-1, masked by valid_v).
    nxt = jnp.minimum(r0 + TH, Hp - 1)
    out_n = pred_ref[pl.ds(nxt, 1), :]            # (1, Wp)
    gt_n = gt_ref[pl.ds(nxt, 1), :]

    row = lax.broadcasted_iota(jnp.int32, (TH, Wp), 0)
    col = lax.broadcasted_iota(jnp.int32, (TH, Wp), 1)
    grow = row + r0                               # global row index
    valid = (grow < H) & (col < W)                # magnitude elements
    valid_h = (grow < H) & (col < W - 1)          # horizontal differences
    valid_v = (grow < H - 1) & (col < W)          # vertical differences

    def right(a):       # a[:, j+1] -> j ; wrapped last column masked by valid_h
        return pltpu.roll(a, shift=Wp - 1, axis=1)

    def below(a, a_n):  # a[i+1, :] -> i ; last row patched with the halo row
        b = pltpu.roll(a, shift=TH - 1, axis=0)
        return jnp.where(row == TH - 1, a_n, b)

    hdo = out_c - right(out_c)
    hdg = gt_c - right(gt_c)
    vdo = out_c - below(out_c, out_n)
    vdg = gt_c - below(gt_c, gt_n)
    return out_c, gt_c, hdo, hdg, vdo, vdg, valid, valid_h, valid_v


# ------------------------- pass 1: streaming stats ----------------------------
def _stats_kernel(pred_ref, gt_ref, stat_ref, *, H, W, Hp, Wp, TH):
    i = pl.program_id(1)

    @pl.when(i == 0)
    def _init():
        # single unmasked full-block store: rows 0-7 = +inf (running mins),
        # rows 8-15 = -inf (running maxes), rows 16-23 = 0 (sums / sumsqs).
        rows = lax.broadcasted_iota(jnp.int32, (_STAT_ROWS, Wp), 0)
        stat_ref[...] = jnp.where(
            rows < 8, jnp.float32(jnp.inf),
            jnp.where(rows < 16, jnp.float32(-jnp.inf), jnp.float32(0.0)))

    def chunk_body(ci, carry):
        r0 = pl.multiple_of(ci * TH, 8)
        (_, gt_c, hdo, hdg, vdo, vdg,
         valid, valid_h, valid_v) = _chunk_fields(
            pred_ref, gt_ref, r0, H=H, W=W, Hp=Hp, Wp=Wp, TH=TH)

        def minmax(slot, x, m):
            xmn = jnp.min(jnp.where(m, x, jnp.inf), axis=0, keepdims=True)
            xmx = jnp.max(jnp.where(m, x, -jnp.inf), axis=0, keepdims=True)
            stat_ref[slot:slot + 1, :] = jnp.minimum(
                stat_ref[slot:slot + 1, :], xmn)
            stat_ref[8 + slot:9 + slot, :] = jnp.maximum(
                stat_ref[8 + slot:9 + slot, :], xmx)

        def sums(slot, x, m):
            xs = jnp.where(m, x, 0.0)
            stat_ref[16 + slot:17 + slot, :] = (
                stat_ref[16 + slot:17 + slot, :]
                + jnp.sum(xs, axis=0, keepdims=True))
            stat_ref[20 + slot:21 + slot, :] = (
                stat_ref[20 + slot:21 + slot, :]
                + jnp.sum(xs * xs, axis=0, keepdims=True))

        # one source at a time keeps the live set to ~2 chunk-sized arrays
        minmax(0, hdo, valid_h); sums(0, hdo, valid_h)
        minmax(1, hdg, valid_h); sums(1, hdg, valid_h)
        minmax(2, vdo, valid_v); sums(2, vdo, valid_v)
        minmax(3, vdg, valid_v); sums(3, vdg, valid_v)
        minmax(4, gt_c, valid)   # gt magnitude needs min/max only
        return carry

    lax.fori_loop(0, Hp // TH, chunk_body, 0)


# --------------------------- pass 2: histograms -------------------------------
# Count row (hist_id * bins + bin) holds that bin's lane-partial count.
#   hist_id: 0 hdiff_pred, 1 hdiff_gt, 2 vdiff_pred, 3 vdiff_gt,
#            4 |pred image| (gt's edges), 5 |gt image| (gt's edges)
def _hist_kernel(edge_ref, pred_ref, gt_ref, cnt_ref, *, H, W, Hp, Wp, TH, bins):
    i = pl.program_id(1)

    @pl.when(i == 0)
    def _init():
        cnt_ref[...] = jnp.zeros_like(cnt_ref)

    # Edges hoisted out of the chunk / bin loops (cheap scalar ops from SMEM),
    # same formula and fp order as the PyTorch reference (lo + b * step) with
    # strict '>' / '<' on both sides (the reference is NOT torch.histc).
    def edges_of(k):
        lo = edge_ref[2 * k]
        step = edge_ref[2 * k + 1]
        return lo, [lo + b * step for b in range(bins + 1)]

    params = [edges_of(k) for k in range(5)]   # hdp, hdg, vdp, vdg, gt-edges

    def chunk_body(ci, carry):
        r0 = pl.multiple_of(ci * TH, 8)
        (out_c, gt_c, hdo, hdg, vdo, vdg,
         valid, valid_h, valid_v) = _chunk_fields(
            pred_ref, gt_ref, r0, H=H, W=W, Hp=Hp, Wp=Wp, TH=TH)

        def hist(hid, x, m, pidx):
            lo, edges = params[pidx]
            # Mask hoist: invalid / padded elements become the histogram's own
            # lower edge, which every bin's strict '>' excludes (step >= 0),
            # so no '& m' and no extra select inside the bin loop.
            xm = jnp.where(m, x, lo)
            base = hid * bins
            for b in range(bins):
                inb = (xm > edges[b]) & (xm < edges[b + 1])
                # Sublane-only partial sum -> lane-resident (1, Wp) row; the
                # single cross-lane reduce per bin happens once in the wrapper.
                # (MXU ones-row matmul for this sum evaluated and rejected:
                #  the mask would sit on the slow MXU weight-push path.)
                part = jnp.sum(jnp.where(inb, 1.0, 0.0), axis=0, keepdims=True)
                cnt_ref[base + b:base + b + 1, :] = (
                    cnt_ref[base + b:base + b + 1, :] + part)

        hist(0, hdo, valid_h, 0)   # hdiff_pred with pred edges
        hist(1, hdg, valid_h, 1)   # hdiff_gt   with gt edges
        hist(2, vdo, valid_v, 2)   # vdiff_pred
        hist(3, vdg, valid_v, 3)   # vdiff_gt
        hist(4, out_c, valid, 4)   # |pred image| with gt's edges
        hist(5, gt_c, valid, 4)    # |gt image|   with gt's edges
        return carry

    lax.fori_loop(0, Hp // TH, chunk_body, 0)


# ------------------------------- wrapper --------------------------------------
def total_variation_loss(kspace_pred, ref_kspace, mask=None, *,
                         intensity_weight=20.0, hist_weight=10.0,
                         bins=10, tv_weight=1e5):
    """Shape-(1,) float32 loss matching TotalVariationLoss.forward."""
    del mask  # unused by the reference forward pass
    bins = int(bins)
    N, H, W, _ = kspace_pred.shape

    # Image-space magnitudes in plain JAX (FFT has no Pallas primitive); the
    # magnitude + pad fuse into one HBM materialization per plane under jit.
    mag_pred = _ifft2c_abs(kspace_pred)
    mag_gt = _ifft2c_abs(ref_kspace)

    # Row-chunked compute: TH rows per inner step keeps the per-chunk working
    # set in a handful of vregs instead of whole-(Hp, Wp) temporaries.
    TH_TARGET = 32
    Hp = _round_up(max(H, 8), 8)
    if Hp > TH_TARGET:
        Hp = _round_up(Hp, TH_TARGET)
        TH = TH_TARGET
    else:
        TH = Hp
    Wp = _round_up(max(W, 128), 128)    # lane-dense

    pad = ((0, 0), (0, Hp - H), (0, Wp - W))
    mag_pred = jnp.pad(mag_pred, pad)
    mag_gt = jnp.pad(mag_gt, pad)

    # Leading "parallel" axis feeds both v7x TensorCores with per-core partial
    # accumulator blocks (summed below); serial-but-neutral on v5e/v6e.
    # TODO(synk): odd N currently falls back to a single partial block.
    NC = 2 if (N >= 2 and N % 2 == 0) else 1
    npc = N // NC
    grid = (NC, npc)

    in_spec = pl.BlockSpec((None, Hp, Wp), lambda c, i: (c * npc + i, 0, 0))
    # TODO(synk): if pass-1 profiling on v5e shows exposed input DMA, add
    #             pipeline_mode=pl.Buffered(3) to in_spec (one extra buffer).
    cparams = pltpu.CompilerParams(
        dimension_semantics=("parallel", "arbitrary"),
        vmem_limit_bytes=32 * 1024 * 1024)

    common = dict(H=H, W=W, Hp=Hp, Wp=Wp, TH=TH)

    # ---- pass 1: fused streaming min / max / sum / sumsq lane-partials -------
    stats = pl.pallas_call(
        functools.partial(_stats_kernel, **common),
        out_shape=jax.ShapeDtypeStruct((NC, _STAT_ROWS, Wp), jnp.float32),
        grid=grid,
        in_specs=[in_spec, in_spec],
        out_specs=pl.BlockSpec((None, _STAT_ROWS, Wp), lambda c, i: (c, 0, 0)),
        compiler_params=cparams,
    )(mag_pred, mag_gt)

    mins = jnp.min(stats[:, 0:5, :], axis=(0, 2))    # hdp, hdg, vdp, vdg, gt
    maxs = jnp.max(stats[:, 8:13, :], axis=(0, 2))
    sums = jnp.sum(stats[:, 16:20, :], axis=(0, 2))  # hdp, hdg, vdp, vdg
    sqs = jnp.sum(stats[:, 20:24, :], axis=(0, 2))

    steps = (maxs - mins) / float(bins)

    nh = float(N * H * (W - 1))
    nv = float(N * (H - 1) * W)
    n = float(N * H * W)

    def unbiased_std(s, sq, cnt):
        # torch.var default (unbiased, n-1) from a single sum/sumsq pass; the
        # finite differences are near zero-mean so cancellation stays benign,
        # and per-lane / per-core partials give blocked accumulation.
        var = jnp.maximum(sq - s * s / cnt, 0.0) / (cnt - 1.0)
        return jnp.sqrt(var)

    hdiff_var_loss = (unbiased_std(sums[0], sqs[0], nh)
                      - 1.25 * unbiased_std(sums[1], sqs[1], nh))
    vdiff_var_loss = (unbiased_std(sums[2], sqs[2], nv)
                      - 1.25 * unbiased_std(sums[3], sqs[3], nv))
    tv_loss = jnp.abs(hdiff_var_loss) + jnp.abs(vdiff_var_loss)

    # ---- pass 2: 6 x `bins` strict-inequality histograms ---------------------
    edge_vec = jnp.stack([mins[0], steps[0], mins[1], steps[1],
                          mins[2], steps[2], mins[3], steps[3],
                          mins[4], steps[4]]).astype(jnp.float32)

    cnt_rows = _round_up(6 * bins, 8)
    cnt = pl.pallas_call(
        functools.partial(_hist_kernel, bins=bins, **common),
        out_shape=jax.ShapeDtypeStruct((NC, cnt_rows, Wp), jnp.float32),
        grid=grid,
        in_specs=[pl.BlockSpec(memory_space=pltpu.MemorySpace.SMEM),
                  in_spec, in_spec],
        out_specs=pl.BlockSpec((None, cnt_rows, Wp), lambda c, i: (c, 0, 0)),
        compiler_params=cparams,
    )(edge_vec, mag_pred, mag_gt)

    counts = jnp.sum(cnt[:, :6 * bins, :], axis=(0, 2)).reshape(6, bins)

    hdiff_hist_loss = jnp.sqrt(jnp.sum(((counts[0] - counts[1]) / nh) ** 2))
    vdiff_hist_loss = jnp.sqrt(jnp.sum(((counts[2] - counts[3]) / nv) ** 2))
    gt_hist_loss = jnp.sqrt(jnp.sum(((counts[4] - counts[5]) / n) ** 2))

    hist_loss = hdiff_hist_loss + vdiff_hist_loss
    total = (float(intensity_weight) * gt_hist_loss
             + float(hist_weight) * hist_loss
             + float(tv_weight) * tv_loss)
    return jnp.reshape(total, (1,)).astype(jnp.float32)


# ---------------------- pure-JAX reference (for checking) ---------------------
def _reference_loss(kspace_pred, ref_kspace, *, intensity_weight=20.0,
                    hist_weight=10.0, bins=10, tv_weight=1e5):
    output = _ifft2c_abs(kspace_pred)
    gt = _ifft2c_abs(ref_kspace)
    hd_p = (output[:, :, :-1] - output[:, :, 1:]).reshape(-1)
    hd_g = (gt[:, :, :-1] - gt[:, :, 1:]).reshape(-1)
    vd_p = (output[:, :-1, :] - output[:, 1:, :]).reshape(-1)
    vd_g = (gt[:, :-1, :] - gt[:, 1:, :]).reshape(-1)
    ov, gv = output.reshape(-1), gt.reshape(-1)

    def lo_step(x):
        lo, hi = x.min(), x.max()
        return lo, (hi - lo) / bins

    hlp, hsp = lo_step(hd_p); hlg, hsg = lo_step(hd_g)
    vlp, vsp = lo_step(vd_p); vlg, vsg = lo_step(vd_g)
    glo, gst = lo_step(gv)
    nh, nv, n = hd_p.size, vd_p.size, gv.size

    def count(x, lo, st, b):
        return jnp.sum(jnp.where((x > lo + b * st) & (x < lo + (b + 1) * st),
                                 1.0, 0.0))

    hh = vv = gg = 0.0
    for b in range(bins):
        hh = hh + ((count(hd_p, hlp, hsp, b) - count(hd_g, hlg, hsg, b)) / nh) ** 2
        vv = vv + ((count(vd_p, vlp, vsp, b) - count(vd_g, vlg, vsg, b)) / nv) ** 2
        gg = gg + ((count(ov, glo, gst, b) - count(gv, glo, gst, b)) / n) ** 2
    hh, vv, gg = jnp.sqrt(hh), jnp.sqrt(vv), jnp.sqrt(gg)
    hvar = jnp.sqrt(jnp.var(hd_p, ddof=1)) - 1.25 * jnp.sqrt(jnp.var(hd_g, ddof=1))
    vvar = jnp.sqrt(jnp.var(vd_p, ddof=1)) - 1.25 * jnp.sqrt(jnp.var(vd_g, ddof=1))
    tv = jnp.abs(hvar) + jnp.abs(vvar)
    return intensity_weight * gg + hist_weight * (hh + vv) + tv_weight * tv


# --------------------------------- main ----------------------------------------
if __name__ == "__main__":
    key = jax.random.PRNGKey(0)
    k1, k2 = jax.random.split(key)

    N, H, W = 2, 16, 16
    kspace_pred = jax.random.normal(k1, (N, H, W, 2), dtype=jnp.float32)
    ref_kspace = jax.random.normal(k2, (N, H, W, 2), dtype=jnp.float32)
    # subsampling mask (unused by the forward, kept for signature parity)
    mask = (jnp.arange(W) % 2 == 0).astype(jnp.float32).reshape(1, 1, W, 1)

    loss_fn = jax.jit(total_variation_loss)
    loss = loss_fn(kspace_pred, ref_kspace, mask)
    jax.block_until_ready(loss)
    assert loss.shape == (1,) and loss.dtype == jnp.float32

    ref = _reference_loss(kspace_pred, ref_kspace)
    assert jnp.allclose(loss[0], ref, rtol=1e-3, atol=1e-3), (loss, ref)

    print("KERNEL_OK")
</pallas_src>

<mosaic_0001>
module attributes {stable_mosaic.version = 11 : i64} {
  func.func @_stats_kernel(%arg0: i32, %arg1: i32, %arg2: memref<1x16x128xf32, #tpu.memory_space<vmem>>, %arg3: memref<1x16x128xf32, #tpu.memory_space<vmem>>, %arg4: memref<1x24x128xf32, #tpu.memory_space<vmem>>) attributes {dimension_semantics = [#tpu.dimension_semantics<parallel>, #tpu.dimension_semantics<arbitrary>], iteration_bounds = array<i64: 2, 1>, scalar_prefetch = 0 : i64, scratch_operands = 0 : i64, tpu.core_type = #tpu.core_type<tc>, window_params = [{transform_indices = @transform_0, window_bounds = array<i64: 1, 16, 128>}, {transform_indices = @transform_1, window_bounds = array<i64: 1, 16, 128>}, {transform_indices = @transform_2, window_bounds = array<i64: 1, 24, 128>}]} {
    %c0_i32 = arith.constant 0 : i32
    %0 = arith.cmpi eq, %arg1, %c0_i32 : i32
    %1 = arith.extui %0 : i1 to i32
    %c0_i32_0 = arith.constant 0 : i32
    %2 = arith.cmpi ne, %1, %c0_i32_0 : i32
    scf.if %2 {
      %232 = tpu.iota {dimensions = array<i32: 0>} : vector<24x128xi32>
      %c8_i32 = arith.constant 8 : i32
      %233 = vector.broadcast %c8_i32 : i32 to vector<24x128xi32>
      %234 = arith.cmpi slt, %232, %233 : vector<24x128xi32>
      %c16_i32_143 = arith.constant 16 : i32
      %235 = vector.broadcast %c16_i32_143 : i32 to vector<24x128xi32>
      %236 = arith.cmpi slt, %232, %235 : vector<24x128xi32>
      %cst_144 = arith.constant 0xFF800000 : f32
      %cst_145 = arith.constant 0.000000e+00 : f32
      %237 = vector.broadcast %cst_144 : f32 to vector<24x128xf32>
      %238 = vector.broadcast %cst_145 : f32 to vector<24x128xf32>
      %239 = arith.select %236, %237, %238 : vector<24x128xi1>, vector<24x128xf32>
      %cst_146 = arith.constant 0x7F800000 : f32
      %240 = vector.broadcast %cst_146 : f32 to vector<24x128xf32>
      %241 = arith.select %234, %240, %239 : vector<24x128xi1>, vector<24x128xf32>
      %c0_147 = arith.constant 0 : index
      %c0_148 = arith.constant 0 : index
      %c0_149 = arith.constant 0 : index
      %242 = vector.load %arg4[%c0_147, %c0_148, %c0_149] : memref<1x24x128xf32, #tpu.memory_space<vmem>>, vector<1x24x128xf32>
      %243 = vector.shape_cast %242 : vector<1x24x128xf32> to vector<24x128xf32>
      %244 = vector.shape_cast %241 : vector<24x128xf32> to vector<1x24x128xf32>
      tpu.vector_store %arg4[%c0_147, %c0_148, %c0_149], %244 {strides = array<i32>} : memref<1x24x128xf32, #tpu.memory_space<vmem>>, vector<1x24x128xf32>,
    } else {
    }
    %c0_i32_1 = arith.constant 0 : i32
    %c16_i32 = arith.constant 16 : i32
    %3 = arith.muli %c0_i32_1, %c16_i32 : i32
    %4 = tpu.assume_multiple %3, 8 : i32
    %c0 = arith.constant 0 : index
    %5 = arith.index_cast %4 : i32 to index
    %c0_2 = arith.constant 0 : index
    %6 = vector.load %arg2[%c0, %5, %c0_2] : memref<1x16x128xf32, #tpu.memory_space<vmem>>, vector<1x16x128xf32>
    %7 = vector.shape_cast %6 : vector<1x16x128xf32> to vector<16x128xf32>
    %c0_3 = arith.constant 0 : index
    %8 = arith.index_cast %4 : i32 to index
    %c0_4 = arith.constant 0 : index
    %9 = vector.load %arg3[%c0_3, %8, %c0_4] : memref<1x16x128xf32, #tpu.memory_space<vmem>>, vector<1x16x128xf32>
    %10 = vector.shape_cast %9 : vector<1x16x128xf32> to vector<16x128xf32>
    %c16_i32_5 = arith.constant 16 : i32
    %11 = arith.addi %4, %c16_i32_5 : i32
    %c15_i32 = arith.constant 15 : i32
    %12 = arith.minsi %11, %c15_i32 : i32
    %c0_6 = arith.constant 0 : index
    %13 = arith.index_cast %12 : i32 to index
    %c0_7 = arith.constant 0 : index
    %14 = vector.load %arg2[%c0_6, %13, %c0_7] : memref<1x16x128xf32, #tpu.memory_space<vmem>>, vector<1x1x128xf32>
    %15 = vector.shape_cast %14 : vector<1x1x128xf32> to vector<1x128xf32>
    %c0_8 = arith.constant 0 : index
    %16 = arith.index_cast %12 : i32 to index
    %c0_9 = arith.constant 0 : index
    %17 = vector.load %arg3[%c0_8, %16, %c0_9] : memref<1x16x128xf32, #tpu.memory_space<vmem>>, vector<1x1x128xf32>
    %18 = vector.shape_cast %17 : vector<1x1x128xf32> to vector<1x128xf32>
    %19 = tpu.iota {dimensions = array<i32: 0>} : vector<16x128xi32>
    %20 = tpu.iota {dimensions = array<i32: 1>} : vector<16x128xi32>
    %21 = vector.broadcast %4 : i32 to vector<16x128xi32>
    %22 = arith.addi %19, %21 : vector<16x128xi32>
    %c16_i32_10 = arith.constant 16 : i32
    %23 = vector.broadcast %c16_i32_10 : i32 to vector<16x128xi32>
    %24 = arith.cmpi slt, %22, %23 : vector<16x128xi32>
    %c16_i32_11 = arith.constant 16 : i32
    %25 = vector.broadcast %c16_i32_11 : i32 to vector<16x128xi32>
    %26 = arith.cmpi slt, %20, %25 : vector<16x128xi32>
    %27 = arith.andi %24, %26 : vector<16x128xi1>
    %c16_i32_12 = arith.constant 16 : i32
    %28 = vector.broadcast %c16_i32_12 : i32 to vector<16x128xi32>
    %29 = arith.cmpi slt, %22, %28 : vector<16x128xi32>
    %c15_i32_13 = arith.constant 15 : i32
    %30 = vector.broadcast %c15_i32_13 : i32 to vector<16x128xi32>
    %31 = arith.cmpi slt, %20, %30 : vector<16x128xi32>
    %32 = arith.andi %29, %31 : vector<16x128xi1>
    %c15_i32_14 = arith.constant 15 : i32
    %33 = vector.broadcast %c15_i32_14 : i32 to vector<16x128xi32>
    %34 = arith.cmpi slt, %22, %33 : vector<16x128xi32>
    %c16_i32_15 = arith.constant 16 : i32
    %35 = vector.broadcast %c16_i32_15 : i32 to vector<16x128xi32>
    %36 = arith.cmpi slt, %20, %35 : vector<16x128xi32>
    %37 = arith.andi %34, %36 : vector<16x128xi1>
    %c127_i32 = arith.constant 127 : i32
    %38 = tpu.dynamic_rotate %7 by %c127_i32 dim 1 : vector<16x128xf32>, i32 -> vector<16x128xf32>
    %39 = arith.subf %7, %38 : vector<16x128xf32>
    %c127_i32_16 = arith.constant 127 : i32
    %40 = tpu.dynamic_rotate %10 by %c127_i32_16 dim 1 : vector<16x128xf32>, i32 -> vector<16x128xf32>
    %41 = arith.subf %10, %40 : vector<16x128xf32>
    %c15_i32_17 = arith.constant 15 : i32
    %42 = tpu.dynamic_rotate %7 by %c15_i32_17 dim 0 : vector<16x128xf32>, i32 -> vector<16x128xf32>
    %c15_i32_18 = arith.constant 15 : i32
    %43 = vector.broadcast %c15_i32_18 : i32 to vector<16x128xi32>
    %44 = arith.cmpi eq, %19, %43 : vector<16x128xi32>
    %45 = vector.shape_cast %15 : vector<1x128xf32> to vector<1x128xf32>
    %46 = vector.broadcast %45 : vector<1x128xf32> to vector<16x128xf32>
    %47 = arith.select %44, %46, %42 : vector<16x128xi1>, vector<16x128xf32>
    %48 = arith.subf %7, %47 : vector<16x128xf32>
    %c15_i32_19 = arith.constant 15 : i32
    %49 = tpu.dynamic_rotate %10 by %c15_i32_19 dim 0 : vector<16x128xf32>, i32 -> vector<16x128xf32>
    %c15_i32_20 = arith.constant 15 : i32
    %50 = vector.broadcast %c15_i32_20 : i32 to vector<16x128xi32>
    %51 = arith.cmpi eq, %19, %50 : vector<16x128xi32>
    %52 = vector.shape_cast %18 : vector<1x128xf32> to vector<1x128xf32>
    %53 = vector.broadcast %52 : vector<1x128xf32> to vector<16x128xf32>
    %54 = arith.select %51, %53, %49 : vector<16x128xi1>, vector<16x128xf32>
    %55 = arith.subf %10, %54 : vector<16x128xf32>
    %cst = arith.constant 0x7F800000 : f32
    %56 = vector.broadcast %cst : f32 to vector<16x128xf32>
    %57 = arith.select %32, %39, %56 : vector<16x128xi1>, vector<16x128xf32>
    %cst_21 = arith.constant dense<0x7F800000> : vector<128xf32>
    %58 = vector.multi_reduction <minimumf>, %57, %cst_21 [0] : vector<16x128xf32> to vector<128xf32>
    %59 = vector.shape_cast %58 : vector<128xf32> to vector<1x128xf32>
    %cst_22 = arith.constant 0xFF800000 : f32
    %60 = vector.broadcast %cst_22 : f32 to vector<16x128xf32>
    %61 = arith.select %32, %39, %60 : vector<16x128xi1>, vector<16x128xf32>
    %cst_23 = arith.constant dense<0xFF800000> : vector<128xf32>
    %62 = vector.multi_reduction <maximumf>, %61, %cst_23 [0] : vector<16x128xf32> to vector<128xf32>
    %63 = vector.shape_cast %62 : vector<128xf32> to vector<1x128xf32>
    %c0_24 = arith.constant 0 : index
    %c0_25 = arith.constant 0 : index
    %c0_26 = arith.constant 0 : index
    %64 = vector.load %arg4[%c0_24, %c0_25, %c0_26] : memref<1x24x128xf32, #tpu.memory_space<vmem>>, vector<1x1x128xf32>
    %65 = vector.shape_cast %64 : vector<1x1x128xf32> to vector<1x128xf32>
    %66 = arith.minimumf %65, %59 : vector<1x128xf32>
    %c0_27 = arith.constant 0 : index
    %c0_28 = arith.constant 0 : index
    %c0_29 = arith.constant 0 : index
    %67 = vector.load %arg4[%c0_27, %c0_28, %c0_29] : memref<1x24x128xf32, #tpu.memory_space<vmem>>, vector<1x1x128xf32>
    %68 = vector.shape_cast %67 : vector<1x1x128xf32> to vector<1x128xf32>
    %69 = vector.shape_cast %66 : vector<1x128xf32> to vector<1x1x128xf32>
    tpu.vector_store %arg4[%c0_27, %c0_28, %c0_29], %69 {strides = array<i32>} : memref<1x24x128xf32, #tpu.memory_space<vmem>>, vector<1x1x128xf32>,
    %c0_30 = arith.constant 0 : index
    %c8 = arith.constant 8 : index
    %c0_31 = arith.constant 0 : index
    %70 = vector.load %arg4[%c0_30, %c8, %c0_31] : memref<1x24x128xf32, #tpu.memory_space<vmem>>, vector<1x1x128xf32>
    %71 = vector.shape_cast %70 : vector<1x1x128xf32> to vector<1x128xf32>
    %72 = arith.maximumf %71, %63 : vector<1x128xf32>
    %c0_32 = arith.constant 0 : index
    %c8_33 = arith.constant 8 : index
    %c0_34 = arith.constant 0 : index
    %73 = vector.load %arg4[%c0_32, %c8_33, %c0_34] : memref<1x24x128xf32, #tpu.memory_space<vmem>>, vector<1x1x128xf32>
    %74 = vector.shape_cast %73 : vector<1x1x128xf32> to vector<1x128xf32>
    %75 = vector.shape_cast %72 : vector<1x128xf32> to vector<1x1x128xf32>
    tpu.vector_store %arg4[%c0_32, %c8_33, %c0_34], %75 {strides = array<i32>} : memref<1x24x128xf32, #tpu.memory_space<vmem>>, vector<1x1x128xf32>,
    %cst_35 = arith.constant 0.000000e+00 : f32
    %76 = vector.broadcast %cst_35 : f32 to vector<16x128xf32>
    %77 = arith.select %32, %39, %76 : vector<16x128xi1>, vector<16x128xf32>
    %c0_36 = arith.constant 0 : index
    %c16 = arith.constant 16 : index
    %c0_37 = arith.constant 0 : index
    %78 = vector.load %arg4[%c0_36, %c16, %c0_37] : memref<1x24x128xf32, #tpu.memory_space<vmem>>, vector<1x1x128xf32>
    %79 = vector.shape_cast %78 : vector<1x1x128xf32> to vector<1x128xf32>
    %cst_38 = arith.constant dense<0.000000e+00> : vector<128xf32>
    %80 = vector.multi_reduction <add>, %77, %cst_38 [0] : vector<16x128xf32> to vector<128xf32>
    %81 = vector.shape_cast %80 : vector<128xf32> to vector<1x128xf32>
    %82 = arith.addf %79, %81 : vector<1x128xf32>
    %c0_39 = arith.constant 0 : index
    %c16_40 = arith.constant 16 : index
    %c0_41 = arith.constant 0 : index
    %83 = vector.load %arg4[%c0_39, %c16_40, %c0_41] : memref<1x24x128xf32, #tpu.memory_space<vmem>>, vector<1x1x128xf32>
    %84 = vector.shape_cast %83 : vector<1x1x128xf32> to vector<1x128xf32>
    %85 = vector.shape_cast %82 : vector<1x128xf32> to vector<1x1x128xf32>
    tpu.vector_store %arg4[%c0_39, %c16_40, %c0_41], %85 {strides = array<i32>} : memref<1x24x128xf32, #tpu.memory_space<vmem>>, vector<1x1x128xf32>,
    %c0_42 = arith.constant 0 : index
    %c20 = arith.constant 20 : index
    %c0_43 = arith.constant 0 : index
    %86 = vector.load %arg4[%c0_42, %c20, %c0_43] : memref<1x24x128xf32, #tpu.memory_space<vmem>>, vector<1x1x128xf32>
    %87 = vector.shape_cast %86 : vector<1x1x128xf32> to vector<1x128xf32>
    %88 = arith.mulf %77, %77 : vector<16x128xf32>
    %cst_44 = arith.constant dense<0.000000e+00> : vector<128xf32>
    %89 = vector.multi_reduction <add>, %88, %cst_44 [0] : vector<16x128xf32> to vector<128xf32>
    %90 = vector.shape_cast %89 : vector<128xf32> to vector<1x128xf32>
    %91 = arith.addf %87, %90 : vector<1x128xf32>
    %c0_45 = arith.constant 0 : index
    %c20_46 = arith.constant 20 : index
    %c0_47 = arith.constant 0 : index
    %92 = vector.load %arg4[%c0_45, %c20_46, %c0_47] : memref<1x24x128xf32, #tpu.memory_space<vmem>>, vector<1x1x128xf32>
    %93 = vector.shape_cast %92 : vector<1x1x128xf32> to vector<1x128xf32>
    %94 = vector.shape_cast %91 : vector<1x128xf32> to vector<1x1x128xf32>
    tpu.vector_store %arg4[%c0_45, %c20_46, %c0_47], %94 {strides = array<i32>} : memref<1x24x128xf32, #tpu.memory_space<vmem>>, vector<1x1x128xf32>,
    %cst_48 = arith.constant 0x7F800000 : f32
    %95 = vector.broadcast %cst_48 : f32 to vector<16x128xf32>
    %96 = arith.select %32, %41, %95 : vector<16x128xi1>, vector<16x128xf32>
    %cst_49 = arith.constant dense<0x7F800000> : vector<128xf32>
    %97 = vector.multi_reduction <minimumf>, %96, %cst_49 [0] : vector<16x128xf32> to vector<128xf32>
    %98 = vector.shape_cast %97 : vector<128xf32> to vector<1x128xf32>
    %cst_50 = arith.constant 0xFF800000 : f32
    %99 = vector.broadcast %cst_50 : f32 to vector<16x128xf32>
    %100 = arith.select %32, %41, %99 : vector<16x128xi1>, vector<16x128xf32>
    %cst_51 = arith.constant dense<0xFF800000> : vector<128xf32>
    %101 = vector.multi_reduction <maximumf>, %100, %cst_51 [0] : vector<16x128xf32> to vector<128xf32>
    %102 = vector.shape_cast %101 : vector<128xf32> to vector<1x128xf32>
    %c0_52 = arith.constant 0 : index
    %c1 = arith.constant 1 : index
    %c0_53 = arith.constant 0 : index
    %103 = vector.load %arg4[%c0_52, %c1, %c0_53] : memref<1x24x128xf32, #tpu.memory_space<vmem>>, vector<1x1x128xf32>
    %104 = vector.shape_cast %103 : vector<1x1x128xf32> to vector<1x128xf32>
    %105 = arith.minimumf %104, %98 : vector<1x128xf32>
    %c0_54 = arith.constant 0 : index
    %c1_55 = arith.constant 1 : index
    %c0_56 = arith.constant 0 : index
    %106 = vector.load %arg4[%c0_54, %c1_55, %c0_56] : memref<1x24x128xf32, #tpu.memory_space<vmem>>, vector<1x1x128xf32>
    %107 = vector.shape_cast %106 : vector<1x1x128xf32> to vector<1x128xf32>
    %108 = vector.shape_cast %105 : vector<1x128xf32> to vector<1x1x128xf32>
    tpu.vector_store %arg4[%c0_54, %c1_55, %c0_56], %108 {strides = array<i32>} : memref<1x24x128xf32, #tpu.memory_space<vmem>>, vector<1x1x128xf32>,
    %c0_57 = arith.constant 0 : index
    %c9 = arith.constant 9 : index
    %c0_58 = arith.constant 0 : index
    %109 = vector.load %arg4[%c0_57, %c9, %c0_58] : memref<1x24x128xf32, #tpu.memory_space<vmem>>, vector<1x1x128xf32>
    %110 = vector.shape_cast %109 : vector<1x1x128xf32> to vector<1x128xf32>
    %111 = arith.maximumf %110, %102 : vector<1x128xf32>
    %c0_59 = arith.constant 0 : index
    %c9_60 = arith.constant 9 : index
    %c0_61 = arith.constant 0 : index
    %112 = vector.load %arg4[%c0_59, %c9_60, %c0_61] : memref<1x24x128xf32, #tpu.memory_space<vmem>>, vector<1x1x128xf32>
    %113 = vector.shape_cast %112 : vector<1x1x128xf32> to vector<1x128xf32>
    %114 = vector.shape_cast %111 : vector<1x128xf32> to vector<1x1x128xf32>
    tpu.vector_store %arg4[%c0_59, %c9_60, %c0_61], %114 {strides = array<i32>} : memref<1x24x128xf32, #tpu.memory_space<vmem>>, vector<1x1x128xf32>,
    %cst_62 = arith.constant 0.000000e+00 : f32
    %115 = vector.broadcast %cst_62 : f32 to vector<16x128xf32>
    %116 = arith.select %32, %41, %115 : vector<16x128xi1>, vector<16x128xf32>
    %c0_63 = arith.constant 0 : index
    %c17 = arith.constant 17 : index
    %c0_64 = arith.constant 0 : index
    %117 = vector.load %arg4[%c0_63, %c17, %c0_64] : memref<1x24x128xf32, #tpu.memory_space<vmem>>, vector<1x1x128xf32>
    %118 = vector.shape_cast %117 : vector<1x1x128xf32> to vector<1x128xf32>
    %cst_65 = arith.constant dense<0.000000e+00> : vector<128xf32>
    %119 = vector.multi_reduction <add>, %116, %cst_65 [0] : vector<16x128xf32> to vector<128xf32>
    %120 = vector.shape_cast %119 : vector<128xf32> to vector<1x128xf32>
    %121 = arith.addf %118, %120 : vector<1x128xf32>
    %c0_66 = arith.constant 0 : index
    %c17_67 = arith.constant 17 : index
    %c0_68 = arith.constant 0 : index
    %122 = vector.load %arg4[%c0_66, %c17_67, %c0_68] : memref<1x24x128xf32, #tpu.memory_space<vmem>>, vector<1x1x128xf32>
    %123 = vector.shape_cast %122 : vector<1x1x128xf32> to vector<1x128xf32>
    %124 = vector.shape_cast %121 : vector<1x128xf32> to vector<1x1x128xf32>
    tpu.vector_store %arg4[%c0_66, %c17_67, %c0_68], %124 {strides = array<i32>} : memref<1x24x128xf32, #tpu.memory_space<vmem>>, vector<1x1x128xf32>,
    %c0_69 = arith.constant 0 : index
    %c21 = arith.constant 21 : index
    %c0_70 = arith.constant 0 : index
    %125 = vector.load %arg4[%c0_69, %c21, %c0_70] : memref<1x24x128xf32, #tpu.memory_space<vmem>>, vector<1x1x128xf32>
    %126 = vector.shape_cast %125 : vector<1x1x128xf32> to vector<1x128xf32>
    %127 = arith.mulf %116, %116 : vector<16x128xf32>
    %cst_71 = arith.constant dense<0.000000e+00> : vector<128xf32>
    %128 = vector.multi_reduction <add>, %127, %cst_71 [0] : vector<16x128xf32> to vector<128xf32>
    %129 = vector.shape_cast %128 : vector<128xf32> to vector<1x128xf32>
    %130 = arith.addf %126, %129 : vector<1x128xf32>
    %c0_72 = arith.constant 0 : index
    %c21_73 = arith.constant 21 : index
    %c0_74 = arith.constant 0 : index
    %131 = vector.load %arg4[%c0_72, %c21_73, %c0_74] : memref<1x24x128xf32, #tpu.memory_space<vmem>>, vector<1x1x128xf32>
    %132 = vector.shape_cast %131 : vector<1x1x128xf32> to vector<1x128xf32>
    %133 = vector.shape_cast %130 : vector<1x128xf32> to vector<1x1x128xf32>
    tpu.vector_store %arg4[%c0_72, %c21_73, %c0_74], %133 {strides = array<i32>} : memref<1x24x128xf32, #tpu.memory_space<vmem>>, vector<1x1x128xf32>,
    %cst_75 = arith.constant 0x7F800000 : f32
    %134 = vector.broadcast %cst_75 : f32 to vector<16x128xf32>
    %135 = arith.select %37, %48, %134 : vector<16x128xi1>, vector<16x128xf32>
    %cst_76 = arith.constant dense<0x7F800000> : vector<128xf32>
    %136 = vector.multi_reduction <minimumf>, %135, %cst_76 [0] : vector<16x128xf32> to vector<128xf32>
    %137 = vector.shape_cast %136 : vector<128xf32> to vector<1x128xf32>
    %cst_77 = arith.constant 0xFF800000 : f32
    %138 = vector.broadcast %cst_77 : f32 to vector<16x128xf32>
    %139 = arith.select %37, %48, %138 : vector<16x128xi1>, vector<16x128xf32>
    %cst_78 = arith.constant dense<0xFF800000> : vector<128xf32>
    %140 = vector.multi_reduction <maximumf>, %139, %cst_78 [0] : vector<16x128xf32> to vector<128xf32>
    %141 = vector.shape_cast %140 : vector<128xf32> to vector<1x128xf32>
    %c0_79 = arith.constant 0 : index
    %c2 = arith.constant 2 : index
    %c0_80 = arith.constant 0 : index
    %142 = vector.load %arg4[%c0_79, %c2, %c0_80] : memref<1x24x128xf32, #tpu.memory_space<vmem>>, vector<1x1x128xf32>
    %143 = vector.shape_cast %142 : vector<1x1x128xf32> to vector<1x128xf32>
    %144 = arith.minimumf %143, %137 : vector<1x128xf32>
    %c0_81 = arith.constant 0 : index
    %c2_82 = arith.constant 2 : index
    %c0_83 = arith.constant 0 : index
    %145 = vector.load %arg4[%c0_81, %c2_82, %c0_83] : memref<1x24x128xf32, #tpu.memory_space<vmem>>, vector<1x1x128xf32>
    %146 = vector.shape_cast %145 : vector<1x1x128xf32> to vector<1x128xf32>
    %147 = vector.shape_cast %144 : vector<1x128xf32> to vector<1x1x128xf32>
    tpu.vector_store %arg4[%c0_81, %c2_82, %c0_83], %147 {strides = array<i32>} : memref<1x24x128xf32, #tpu.memory_space<vmem>>, vector<1x1x128xf32>,
    %c0_84 = arith.constant 0 : index
    %c10 = arith.constant 10 : index
    %c0_85 = arith.constant 0 : index
    %148 = vector.load %arg4[%c0_84, %c10, %c0_85] : memref<1x24x128xf32, #tpu.memory_space<vmem>>, vector<1x1x128xf32>
    %149 = vector.shape_cast %148 : vector<1x1x128xf32> to vector<1x128xf32>
    %150 = arith.maximumf %149, %141 : vector<1x128xf32>
    %c0_86 = arith.constant 0 : index
    %c10_87 = arith.constant 10 : index
    %c0_88 = arith.constant 0 : index
    %151 = vector.load %arg4[%c0_86, %c10_87, %c0_88] : memref<1x24x128xf32, #tpu.memory_space<vmem>>, vector<1x1x128xf32>
    %152 = vector.shape_cast %151 : vector<1x1x128xf32> to vector<1x128xf32>
    %153 = vector.shape_cast %150 : vector<1x128xf32> to vector<1x1x128xf32>
    tpu.vector_store %arg4[%c0_86, %c10_87, %c0_88], %153 {strides = array<i32>} : memref<1x24x128xf32, #tpu.memory_space<vmem>>, vector<1x1x128xf32>,
    %cst_89 = arith.constant 0.000000e+00 : f32
    %154 = vector.broadcast %cst_89 : f32 to vector<16x128xf32>
    %155 = arith.select %37, %48, %154 : vector<16x128xi1>, vector<16x128xf32>
    %c0_90 = arith.constant 0 : index
    %c18 = arith.constant 18 : index
    %c0_91 = arith.constant 0 : index
    %156 = vector.load %arg4[%c0_90, %c18, %c0_91] : memref<1x24x128xf32, #tpu.memory_space<vmem>>, vector<1x1x128xf32>
    %157 = vector.shape_cast %156 : vector<1x1x128xf32> to vector<1x128xf32>
    %cst_92 = arith.constant dense<0.000000e+00> : vector<128xf32>
    %158 = vector.multi_reduction <add>, %155, %cst_92 [0] : vector<16x128xf32> to vector<128xf32>
    %159 = vector.shape_cast %158 : vector<128xf32> to vector<1x128xf32>
    %160 = arith.addf %157, %159 : vector<1x128xf32>
    %c0_93 = arith.constant 0 : index
    %c18_94 = arith.constant 18 : index
    %c0_95 = arith.constant 0 : index
    %161 = vector.load %arg4[%c0_93, %c18_94, %c0_95] : memref<1x24x128xf32, #tpu.memory_space<vmem>>, vector<1x1x128xf32>
    %162 = vector.shape_cast %161 : vector<1x1x128xf32> to vector<1x128xf32>
    %163 = vector.shape_cast %160 : vector<1x128xf32> to vector<1x1x128xf32>
    tpu.vector_store %arg4[%c0_93, %c18_94, %c0_95], %163 {strides = array<i32>} : memref<1x24x128xf32, #tpu.memory_space<vmem>>, vector<1x1x128xf32>,
    %c0_96 = arith.constant 0 : index
    %c22 = arith.constant 22 : index
    %c0_97 = arith.constant 0 : index
    %164 = vector.load %arg4[%c0_96, %c22, %c0_97] : memref<1x24x128xf32, #tpu.memory_space<vmem>>, vector<1x1x128xf32>
    %165 = vector.shape_cast %164 : vector<1x1x128xf32> to vector<1x128xf32>
    %166 = arith.mulf %155, %155 : vector<16x128xf32>
    %cst_98 = arith.constant dense<0.000000e+00> : vector<128xf32>
    %167 = vector.multi_reduction <add>, %166, %cst_98 [0] : vector<16x128xf32> to vector<128xf32>
    %168 = vector.shape_cast %167 : vector<128xf32> to vector<1x128xf32>
    %169 = arith.addf %165, %168 : vector<1x128xf32>
    %c0_99 = arith.constant 0 : index
    %c22_100 = arith.constant 22 : index
    %c0_101 = arith.constant 0 : index
    %170 = vector.load %arg4[%c0_99, %c22_100, %c0_101] : memref<1x24x128xf32, #tpu.memory_space<vmem>>, vector<1x1x128xf32>
    %171 = vector.shape_cast %170 : vector<1x1x128xf32> to vector<1x128xf32>
    %172 = vector.shape_cast %169 : vector<1x128xf32> to vector<1x1x128xf32>
    tpu.vector_store %arg4[%c0_99, %c22_100, %c0_101], %172 {strides = array<i32>} : memref<1x24x128xf32, #tpu.memory_space<vmem>>, vector<1x1x128xf32>,
    %cst_102 = arith.constant 0x7F800000 : f32
    %173 = vector.broadcast %cst_102 : f32 to vector<16x128xf32>
    %174 = arith.select %37, %55, %173 : vector<16x128xi1>, vector<16x128xf32>
    %cst_103 = arith.constant dense<0x7F800000> : vector<128xf32>
    %175 = vector.multi_reduction <minimumf>, %174, %cst_103 [0] : vector<16x128xf32> to vector<128xf32>
    %176 = vector.shape_cast %175 : vector<128xf32> to vector<1x128xf32>
    %cst_104 = arith.constant 0xFF800000 : f32
    %177 = vector.broadcast %cst_104 : f32 to vector<16x128xf32>
    %178 = arith.select %37, %55, %177 : vector<16x128xi1>, vector<16x128xf32>
    %cst_105 = arith.constant dense<0xFF800000> : vector<128xf32>
    %179 = vector.multi_reduction <maximumf>, %178, %cst_105 [0] : vector<16x128xf32> to vector<128xf32>
    %180 = vector.shape_cast %179 : vector<128xf32> to vector<1x128xf32>
    %c0_106 = arith.constant 0 : index
    %c3 = arith.constant 3 : index
    %c0_107 = arith.constant 0 : index
    %181 = vector.load %arg4[%c0_106, %c3, %c0_107] : memref<1x24x128xf32, #tpu.memory_space<vmem>>, vector<1x1x128xf32>
    %182 = vector.shape_cast %181 : vector<1x1x128xf32> to vector<1x128xf32>
    %183 = arith.minimumf %182, %176 : vector<1x128xf32>
    %c0_108 = arith.constant 0 : index
    %c3_109 = arith.constant 3 : index
    %c0_110 = arith.constant 0 : index
    %184 = vector.load %arg4[%c0_108, %c3_109, %c0_110] : memref<1x24x128xf32, #tpu.memory_space<vmem>>, vector<1x1x128xf32>
    %185 = vector.shape_cast %184 : vector<1x1x128xf32> to vector<1x128xf32>
    %186 = vector.shape_cast %183 : vector<1x128xf32> to vector<1x1x128xf32>
    tpu.vector_store %arg4[%c0_108, %c3_109, %c0_110], %186 {strides = array<i32>} : memref<1x24x128xf32, #tpu.memory_space<vmem>>, vector<1x1x128xf32>,
    %c0_111 = arith.constant 0 : index
    %c11 = arith.constant 11 : index
    %c0_112 = arith.constant 0 : index
    %187 = vector.load %arg4[%c0_111, %c11, %c0_112] : memref<1x24x128xf32, #tpu.memory_space<vmem>>, vector<1x1x128xf32>
    %188 = vector.shape_cast %187 : vector<1x1x128xf32> to vector<1x128xf32>
    %189 = arith.maximumf %188, %180 : vector<1x128xf32>
    %c0_113 = arith.constant 0 : index
    %c11_114 = arith.constant 11 : index
    %c0_115 = arith.constant 0 : index
    %190 = vector.load %arg4[%c0_113, %c11_114, %c0_115] : memref<1x24x128xf32, #tpu.memory_space<vmem>>, vector<1x1x128xf32>
    %191 = vector.shape_cast %190 : vector<1x1x128xf32> to vector<1x128xf32>
    %192 = vector.shape_cast %189 : vector<1x128xf32> to vector<1x1x128xf32>
    tpu.vector_store %arg4[%c0_113, %c11_114, %c0_115], %192 {strides = array<i32>} : memref<1x24x128xf32, #tpu.memory_space<vmem>>, vector<1x1x128xf32>,
    %cst_116 = arith.constant 0.000000e+00 : f32
    %193 = vector.broadcast %cst_116 : f32 to vector<16x128xf32>
    %194 = arith.select %37, %55, %193 : vector<16x128xi1>, vector<16x128xf32>
    %c0_117 = arith.constant 0 : index
    %c19 = arith.constant 19 : index
    %c0_118 = arith.constant 0 : index
    %195 = vector.load %arg4[%c0_117, %c19, %c0_118] : memref<1x24x128xf32, #tpu.memory_space<vmem>>, vector<1x1x128xf32>
    %196 = vector.shape_cast %195 : vector<1x1x128xf32> to vector<1x128xf32>
    %cst_119 = arith.constant dense<0.000000e+00> : vector<128xf32>
    %197 = vector.multi_reduction <add>, %194, %cst_119 [0] : vector<16x128xf32> to vector<128xf32>
    %198 = vector.shape_cast %197 : vector<128xf32> to vector<1x128xf32>
    %199 = arith.addf %196, %198 : vector<1x128xf32>
    %c0_120 = arith.constant 0 : index
    %c19_121 = arith.constant 19 : index
    %c0_122 = arith.constant 0 : index
    %200 = vector.load %arg4[%c0_120, %c19_121, %c0_122] : memref<1x24x128xf32, #tpu.memory_space<vmem>>, vector<1x1x128xf32>
    %201 = vector.shape_cast %200 : vector<1x1x128xf32> to vector<1x128xf32>
    %202 = vector.shape_cast %199 : vector<1x128xf32> to vector<1x1x128xf32>
    tpu.vector_store %arg4[%c0_120, %c19_121, %c0_122], %202 {strides = array<i32>} : memref<1x24x128xf32, #tpu.memory_space<vmem>>, vector<1x1x128xf32>,
    %c0_123 = arith.constant 0 : index
    %c23 = arith.constant 23 : index
    %c0_124 = arith.constant 0 : index
    %203 = vector.load %arg4[%c0_123, %c23, %c0_124] : memref<1x24x128xf32, #tpu.memory_space<vmem>>, vector<1x1x128xf32>
    %204 = vector.shape_cast %203 : vector<1x1x128xf32> to vector<1x128xf32>
    %205 = arith.mulf %194, %194 : vector<16x128xf32>
    %cst_125 = arith.constant dense<0.000000e+00> : vector<128xf32>
    %206 = vector.multi_reduction <add>, %205, %cst_125 [0] : vector<16x128xf32> to vector<128xf32>
    %207 = vector.shape_cast %206 : vector<128xf32> to vector<1x128xf32>
    %208 = arith.addf %204, %207 : vector<1x128xf32>
    %c0_126 = arith.constant 0 : index
    %c23_127 = arith.constant 23 : index
    %c0_128 = arith.constant 0 : index
    %209 = vector.load %arg4[%c0_126, %c23_127, %c0_128] : memref<1x24x128xf32, #tpu.memory_space<vmem>>, vector<1x1x128xf32>
    %210 = vector.shape_cast %209 : vector<1x1x128xf32> to vector<1x128xf32>
    %211 = vector.shape_cast %208 : vector<1x128xf32> to vector<1x1x128xf32>
    tpu.vector_store %arg4[%c0_126, %c23_127, %c0_128], %211 {strides = array<i32>} : memref<1x24x128xf32, #tpu.memory_space<vmem>>, vector<1x1x128xf32>,
    %cst_129 = arith.constant 0x7F800000 : f32
    %212 = vector.broadcast %cst_129 : f32 to vector<16x128xf32>
    %213 = arith.select %27, %10, %212 : vector<16x128xi1>, vector<16x128xf32>
    %cst_130 = arith.constant dense<0x7F800000> : vector<128xf32>
    %214 = vector.multi_reduction <minimumf>, %213, %cst_130 [0] : vector<16x128xf32> to vector<128xf32>
    %215 = vector.shape_cast %214 : vector<128xf32> to vector<1x128xf32>
    %cst_131 = arith.constant 0xFF800000 : f32
    %216 = vector.broadcast %cst_131 : f32 to vector<16x128xf32>
    %217 = arith.select %27, %10, %216 : vector<16x128xi1>, vector<16x128xf32>
    %cst_132 = arith.constant dense<0xFF800000> : vector<128xf32>
    %218 = vector.multi_reduction <maximumf>, %217, %cst_132 [0] : vector<16x128xf32> to vector<128xf32>
    %219 = vector.shape_cast %218 : vector<128xf32> to vector<1x128xf32>
    %c0_133 = arith.constant 0 : index
    %c4 = arith.constant 4 : index
    %c0_134 = arith.constant 0 : index
    %220 = vector.load %arg4[%c0_133, %c4, %c0_134] : memref<1x24x128xf32, #tpu.memory_space<vmem>>, vector<1x1x128xf32>
    %221 = vector.shape_cast %220 : vector<1x1x128xf32> to vector<1x128xf32>
    %222 = arith.minimumf %221, %215 : vector<1x128xf32>
    %c0_135 = arith.constant 0 : index
    %c4_136 = arith.constant 4 : index
    %c0_137 = arith.constant 0 : index
    %223 = vector.load %arg4[%c0_135, %c4_136, %c0_137] : memref<1x24x128xf32, #tpu.memory_space<vmem>>, vector<1x1x128xf32>
    %224 = vector.shape_cast %223 : vector<1x1x128xf32> to vector<1x128xf32>
    %225 = vector.shape_cast %222 : vector<1x128xf32> to vector<1x1x128xf32>
    tpu.vector_store %arg4[%c0_135, %c4_136, %c0_137], %225 {strides = array<i32>} : memref<1x24x128xf32, #tpu.memory_space<vmem>>, vector<1x1x128xf32>,
    %c0_138 = arith.constant 0 : index
    %c12 = arith.constant 12 : index
    %c0_139 = arith.constant 0 : index
    %226 = vector.load %arg4[%c0_138, %c12, %c0_139] : memref<1x24x128xf32, #tpu.memory_space<vmem>>, vector<1x1x128xf32>
    %227 = vector.shape_cast %226 : vector<1x1x128xf32> to vector<1x128xf32>
    %228 = arith.maximumf %227, %219 : vector<1x128xf32>
    %c0_140 = arith.constant 0 : index
    %c12_141 = arith.constant 12 : index
    %c0_142 = arith.constant 0 : index
    %229 = vector.load %arg4[%c0_140, %c12_141, %c0_142] : memref<1x24x128xf32, #tpu.memory_space<vmem>>, vector<1x1x128xf32>
    %230 = vector.shape_cast %229 : vector<1x1x128xf32> to vector<1x128xf32>
    %231 = vector.shape_cast %228 : vector<1x128xf32> to vector<1x1x128xf32>
    tpu.vector_store %arg4[%c0_140, %c12_141, %c0_142], %231 {strides = array<i32>} : memref<1x24x128xf32, #tpu.memory_space<vmem>>, vector<1x1x128xf32>,
    %c1_i32 = arith.constant 1 : i32
    return
  }
  func.func @transform_0(%arg0: i32, %arg1: i32) -> (i32, i32, i32) {
    %c1_i32 = arith.constant 1 : i32
    %0 = arith.muli %arg0, %c1_i32 : i32
    %1 = arith.addi %0, %arg1 : i32
    %c0_i32 = arith.constant 0 : i32
    %c0_i32_0 = arith.constant 0 : i32
    %c0_i32_1 = arith.constant 0 : i32
    return %1, %c0_i32, %c0_i32_0 : i32, i32, i32
  }
  func.func @transform_1(%arg0: i32, %arg1: i32) -> (i32, i32, i32) {
    %c1_i32 = arith.constant 1 : i32
    %0 = arith.muli %arg0, %c1_i32 : i32
    %1 = arith.addi %0, %arg1 : i32
    %c0_i32 = arith.constant 0 : i32
    %c0_i32_0 = arith.constant 0 : i32
    %c0_i32_1 = arith.constant 0 : i32
    return %1, %c0_i32, %c0_i32_0 : i32, i32, i32
  }
  func.func @transform_2(%arg0: i32, %arg1: i32) -> (i32, i32, i32) {
    %c0_i32 = arith.constant 0 : i32
    %c0_i32_0 = arith.constant 0 : i32
    %c0_i32_1 = arith.constant 0 : i32
    return %arg0, %c0_i32, %c0_i32_0 : i32, i32, i32
  }
}

module attributes {stable_mosaic.version = 11 : i64} {
  func.func @_hist_kernel(%arg0: i32, %arg1: i32, %arg2: memref<10xf32, #tpu.memory_space<smem>>, %arg3: memref<1x16x128xf32, #tpu.memory_space<vmem>>, %arg4: memref<1x16x128xf32, #tpu.memory_space<vmem>>, %arg5: memref<1x64x128xf32, #tpu.memory_space<vmem>>) attributes {dimension_semantics = [#tpu.dimension_semantics<parallel>, #tpu.dimension_semantics<arbitrary>], iteration_bounds = array<i64: 2, 1>, scalar_prefetch = 0 : i64, scratch_operands = 0 : i64, tpu.core_type = #tpu.core_type<tc>, window_params = [{transform_indices = @transform_0, window_bounds = array<i64: 10>}, {transform_indices = @transform_1, window_bounds = array<i64: 1, 16, 128>}, {transform_indices = @transform_2, window_bounds = array<i64: 1, 16, 128>}, {transform_indices = @transform_3, window_bounds = array<i64: 1, 64, 128>}]} {
    %c0_i32 = arith.constant 0 : i32
    %0 = arith.cmpi eq, %arg1, %c0_i32 : i32
    %1 = arith.extui %0 : i1 to i32
    %c0_i32_0 = arith.constant 0 : i32
    %2 = arith.cmpi ne, %1, %c0_i32_0 : i32
    scf.if %2 {
      %cst_566 = arith.constant 0.000000e+00 : f32
      %1148 = vector.broadcast %cst_566 : f32 to vector<64x128xf32>
      %c0_567 = arith.constant 0 : index
      %c0_568 = arith.constant 0 : index
      %c0_569 = arith.constant 0 : index
      %1149 = vector.load %arg5[%c0_567, %c0_568, %c0_569] : memref<1x64x128xf32, #tpu.memory_space<vmem>>, vector<1x64x128xf32>
      %1150 = vector.shape_cast %1149 : vector<1x64x128xf32> to vector<64x128xf32>
      %1151 = vector.shape_cast %1148 : vector<64x128xf32> to vector<1x64x128xf32>
      tpu.vector_store %arg5[%c0_567, %c0_568, %c0_569], %1151 {strides = array<i32>} : memref<1x64x128xf32, #tpu.memory_space<vmem>>, vector<1x64x128xf32>,
    } else {
    }
    %c0 = arith.constant 0 : index
    %3 = memref.load %arg2[%c0] : memref<10xf32, #tpu.memory_space<smem>>
    %c1 = arith.constant 1 : index
    %4 = memref.load %arg2[%c1] : memref<10xf32, #tpu.memory_space<smem>>
    %cst = arith.constant 0.000000e+00 : f32
    %5 = arith.mulf %cst, %4 : f32
    %6 = arith.addf %3, %5 : f32
    %cst_1 = arith.constant 1.000000e+00 : f32
    %7 = arith.mulf %cst_1, %4 : f32
    %8 = arith.addf %3, %7 : f32
    %cst_2 = arith.constant 2.000000e+00 : f32
    %9 = arith.mulf %cst_2, %4 : f32
    %10 = arith.addf %3, %9 : f32
    %cst_3 = arith.constant 3.000000e+00 : f32
    %11 = arith.mulf %cst_3, %4 : f32
    %12 = arith.addf %3, %11 : f32
    %cst_4 = arith.constant 4.000000e+00 : f32
    %13 = arith.mulf %cst_4, %4 : f32
    %14 = arith.addf %3, %13 : f32
    %cst_5 = arith.constant 5.000000e+00 : f32
    %15 = arith.mulf %cst_5, %4 : f32
    %16 = arith.addf %3, %15 : f32
    %cst_6 = arith.constant 6.000000e+00 : f32
    %17 = arith.mulf %cst_6, %4 : f32
    %18 = arith.addf %3, %17 : f32
    %cst_7 = arith.constant 7.000000e+00 : f32
    %19 = arith.mulf %cst_7, %4 : f32
    %20 = arith.addf %3, %19 : f32
    %cst_8 = arith.constant 8.000000e+00 : f32
    %21 = arith.mulf %cst_8, %4 : f32
    %22 = arith.addf %3, %21 : f32
    %cst_9 = arith.constant 9.000000e+00 : f32
    %23 = arith.mulf %cst_9, %4 : f32
    %24 = arith.addf %3, %23 : f32
    %cst_10 = arith.constant 1.000000e+01 : f32
    %25 = arith.mulf %cst_10, %4 : f32
    %26 = arith.addf %3, %25 : f32
    %c2 = arith.constant 2 : index
    %27 = memref.load %arg2[%c2] : memref<10xf32, #tpu.memory_space<smem>>
    %c3 = arith.constant 3 : index
    %28 = memref.load %arg2[%c3] : memref<10xf32, #tpu.memory_space<smem>>
    %cst_11 = arith.constant 0.000000e+00 : f32
    %29 = arith.mulf %cst_11, %28 : f32
    %30 = arith.addf %27, %29 : f32
    %cst_12 = arith.constant 1.000000e+00 : f32
    %31 = arith.mulf %cst_12, %28 : f32
    %32 = arith.addf %27, %31 : f32
    %cst_13 = arith.constant 2.000000e+00 : f32
    %33 = arith.mulf %cst_13, %28 : f32
    %34 = arith.addf %27, %33 : f32
    %cst_14 = arith.constant 3.000000e+00 : f32
    %35 = arith.mulf %cst_14, %28 : f32
    %36 = arith.addf %27, %35 : f32
    %cst_15 = arith.constant 4.000000e+00 : f32
    %37 = arith.mulf %cst_15, %28 : f32
    %38 = arith.addf %27, %37 : f32
    %cst_16 = arith.constant 5.000000e+00 : f32
    %39 = arith.mulf %cst_16, %28 : f32
    %40 = arith.addf %27, %39 : f32
    %cst_17 = arith.constant 6.000000e+00 : f32
    %41 = arith.mulf %cst_17, %28 : f32
    %42 = arith.addf %27, %41 : f32
    %cst_18 = arith.constant 7.000000e+00 : f32
    %43 = arith.mulf %cst_18, %28 : f32
    %44 = arith.addf %27, %43 : f32
    %cst_19 = arith.constant 8.000000e+00 : f32
    %45 = arith.mulf %cst_19, %28 : f32
    %46 = arith.addf %27, %45 : f32
    %cst_20 = arith.constant 9.000000e+00 : f32
    %47 = arith.mulf %cst_20, %28 : f32
    %48 = arith.addf %27, %47 : f32
    %cst_21 = arith.constant 1.000000e+01 : f32
    %49 = arith.mulf %cst_21, %28 : f32
    %50 = arith.addf %27, %49 : f32
    %c4 = arith.constant 4 : index
    %51 = memref.load %arg2[%c4] : memref<10xf32, #tpu.memory_space<smem>>
    %c5 = arith.constant 5 : index
    %52 = memref.load %arg2[%c5] : memref<10xf32, #tpu.memory_space<smem>>
    %cst_22 = arith.constant 0.000000e+00 : f32
    %53 = arith.mulf %cst_22, %52 : f32
    %54 = arith.addf %51, %53 : f32
    %cst_23 = arith.constant 1.000000e+00 : f32
    %55 = arith.mulf %cst_23, %52 : f32
    %56 = arith.addf %51, %55 : f32
    %cst_24 = arith.constant 2.000000e+00 : f32
    %57 = arith.mulf %cst_24, %52 : f32
    %58 = arith.addf %51, %57 : f32
    %cst_25 = arith.constant 3.000000e+00 : f32
    %59 = arith.mulf %cst_25, %52 : f32
    %60 = arith.addf %51, %59 : f32
    %cst_26 = arith.constant 4.000000e+00 : f32
    %61 = arith.mulf %cst_26, %52 : f32
    %62 = arith.addf %51, %61 : f32
    %cst_27 = arith.constant 5.000000e+00 : f32
    %63 = arith.mulf %cst_27, %52 : f32
    %64 = arith.addf %51, %63 : f32
    %cst_28 = arith.constant 6.000000e+00 : f32
    %65 = arith.mulf %cst_28, %52 : f32
    %66 = arith.addf %51, %65 : f32
    %cst_29 = arith.constant 7.000000e+00 : f32
    %67 = arith.mulf %cst_29, %52 : f32
    %68 = arith.addf %51, %67 : f32
    %cst_30 = arith.constant 8.000000e+00 : f32
    %69 = arith.mulf %cst_30, %52 : f32
    %70 = arith.addf %51, %69 : f32
    %cst_31 = arith.constant 9.000000e+00 : f32
    %71 = arith.mulf %cst_31, %52 : f32
    %72 = arith.addf %51, %71 : f32
    %cst_32 = arith.constant 1.000000e+01 : f32
    %73 = arith.mulf %cst_32, %52 : f32
    %74 = arith.addf %51, %73 : f32
    %c6 = arith.constant 6 : index
    %75 = memref.load %arg2[%c6] : memref<10xf32, #tpu.memory_space<smem>>
    %c7 = arith.constant 7 : index
    %76 = memref.load %arg2[%c7] : memref<10xf32, #tpu.memory_space<smem>>
    %cst_33 = arith.constant 0.000000e+00 : f32
    %77 = arith.mulf %cst_33, %76 : f32
    %78 = arith.addf %75, %77 : f32
    %cst_34 = arith.constant 1.000000e+00 : f32
    %79 = arith.mulf %cst_34, %76 : f32
    %80 = arith.addf %75, %79 : f32
    %cst_35 = arith.constant 2.000000e+00 : f32
    %81 = arith.mulf %cst_35, %76 : f32
    %82 = arith.addf %75, %81 : f32
    %cst_36 = arith.constant 3.000000e+00 : f32
    %83 = arith.mulf %cst_36, %76 : f32
    %84 = arith.addf %75, %83 : f32
    %cst_37 = arith.constant 4.000000e+00 : f32
    %85 = arith.mulf %cst_37, %76 : f32
    %86 = arith.addf %75, %85 : f32
    %cst_38 = arith.constant 5.000000e+00 : f32
    %87 = arith.mulf %cst_38, %76 : f32
    %88 = arith.addf %75, %87 : f32
    %cst_39 = arith.constant 6.000000e+00 : f32
    %89 = arith.mulf %cst_39, %76 : f32
    %90 = arith.addf %75, %89 : f32
    %cst_40 = arith.constant 7.000000e+00 : f32
    %91 = arith.mulf %cst_40, %76 : f32
    %92 = arith.addf %75, %91 : f32
    %cst_41 = arith.constant 8.000000e+00 : f32
    %93 = arith.mulf %cst_41, %76 : f32
    %94 = arith.addf %75, %93 : f32
    %cst_42 = arith.constant 9.000000e+00 : f32
    %95 = arith.mulf %cst_42, %76 : f32
    %96 = arith.addf %75, %95 : f32
    %cst_43 = arith.constant 1.000000e+01 : f32
    %97 = arith.mulf %cst_43, %76 : f32
    %98 = arith.addf %75, %97 : f32
    %c8 = arith.constant 8 : index
    %99 = memref.load %arg2[%c8] : memref<10xf32, #tpu.memory_space<smem>>
    %c9 = arith.constant 9 : index
    %100 = memref.load %arg2[%c9] : memref<10xf32, #tpu.memory_space<smem>>
    %cst_44 = arith.constant 0.000000e+00 : f32
    %101 = arith.mulf %cst_44, %100 : f32
    %102 = arith.addf %99, %101 : f32
    %cst_45 = arith.constant 1.000000e+00 : f32
    %103 = arith.mulf %cst_45, %100 : f32
    %104 = arith.addf %99, %103 : f32
    %cst_46 = arith.constant 2.000000e+00 : f32
    %105 = arith.mulf %cst_46, %100 : f32
    %106 = arith.addf %99, %105 : f32
    %cst_47 = arith.constant 3.000000e+00 : f32
    %107 = arith.mulf %cst_47, %100 : f32
    %108 = arith.addf %99, %107 : f32
    %cst_48 = arith.constant 4.000000e+00 : f32
    %109 = arith.mulf %cst_48, %100 : f32
    %110 = arith.addf %99, %109 : f32
    %cst_49 = arith.constant 5.000000e+00 : f32
    %111 = arith.mulf %cst_49, %100 : f32
    %112 = arith.addf %99, %111 : f32
    %cst_50 = arith.constant 6.000000e+00 : f32
    %113 = arith.mulf %cst_50, %100 : f32
    %114 = arith.addf %99, %113 : f32
    %cst_51 = arith.constant 7.000000e+00 : f32
    %115 = arith.mulf %cst_51, %100 : f32
    %116 = arith.addf %99, %115 : f32
    %cst_52 = arith.constant 8.000000e+00 : f32
    %117 = arith.mulf %cst_52, %100 : f32
    %118 = arith.addf %99, %117 : f32
    %cst_53 = arith.constant 9.000000e+00 : f32
    %119 = arith.mulf %cst_53, %100 : f32
    %120 = arith.addf %99, %119 : f32
    %cst_54 = arith.constant 1.000000e+01 : f32
    %121 = arith.mulf %cst_54, %100 : f32
    %122 = arith.addf %99, %121 : f32
    %c0_i32_55 = arith.constant 0 : i32
    %c16_i32 = arith.constant 16 : i32
    %123 = arith.muli %c0_i32_55, %c16_i32 : i32
    %124 = tpu.assume_multiple %123, 8 : i32
    %c0_56 = arith.constant 0 : index
    %125 = arith.index_cast %124 : i32 to index
    %c0_57 = arith.constant 0 : index
    %126 = vector.load %arg3[%c0_56, %125, %c0_57] : memref<1x16x128xf32, #tpu.memory_space<vmem>>, vector<1x16x128xf32>
    %127 = vector.shape_cast %126 : vector<1x16x128xf32> to vector<16x128xf32>
    %c0_58 = arith.constant 0 : index
    %128 = arith.index_cast %124 : i32 to index
    %c0_59 = arith.constant 0 : index
    %129 = vector.load %arg4[%c0_58, %128, %c0_59] : memref<1x16x128xf32, #tpu.memory_space<vmem>>, vector<1x16x128xf32>
    %130 = vector.shape_cast %129 : vector<1x16x128xf32> to vector<16x128xf32>
    %c16_i32_60 = arith.constant 16 : i32
    %131 = arith.addi %124, %c16_i32_60 : i32
    %c15_i32 = arith.constant 15 : i32
    %132 = arith.minsi %131, %c15_i32 : i32
    %c0_61 = arith.constant 0 : index
    %133 = arith.index_cast %132 : i32 to index
    %c0_62 = arith.constant 0 : index
    %134 = vector.load %arg3[%c0_61, %133, %c0_62] : memref<1x16x128xf32, #tpu.memory_space<vmem>>, vector<1x1x128xf32>
    %135 = vector.shape_cast %134 : vector<1x1x128xf32> to vector<1x128xf32>
    %c0_63 = arith.constant 0 : index
    %136 = arith.index_cast %132 : i32 to index
    %c0_64 = arith.constant 0 : index
    %137 = vector.load %arg4[%c0_63, %136, %c0_64] : memref<1x16x128xf32, #tpu.memory_space<vmem>>, vector<1x1x128xf32>
    %138 = vector.shape_cast %137 : vector<1x1x128xf32> to vector<1x128xf32>
    %139 = tpu.iota {dimensions = array<i32: 0>} : vector<16x128xi32>
    %140 = tpu.iota {dimensions = array<i32: 1>} : vector<16x128xi32>
    %141 = vector.broadcast %124 : i32 to vector<16x128xi32>
    %142 = arith.addi %139, %141 : vector<16x128xi32>
    %c16_i32_65 = arith.constant 16 : i32
    %143 = vector.broadcast %c16_i32_65 : i32 to vector<16x128xi32>
    %144 = arith.cmpi slt, %142, %143 : vector<16x128xi32>
    %c16_i32_66 = arith.constant 16 : i32
    %145 = vector.broadcast %c16_i32_66 : i32 to vector<16x128xi32>
    %146 = arith.cmpi slt, %140, %145 : vector<16x128xi32>
    %147 = arith.andi %144, %146 : vector<16x128xi1>
    %c16_i32_67 = arith.constant 16 : i32
    %148 = vector.broadcast %c16_i32_67 : i32 to vector<16x128xi32>
    %149 = arith.cmpi slt, %142, %148 : vector<16x128xi32>
    %c15_i32_68 = arith.constant 15 : i32
    %150 = vector.broadcast %c15_i32_68 : i32 to vector<16x128xi32>
    %151 = arith.cmpi slt, %140, %150 : vector<16x128xi32>
    %152 = arith.andi %149, %151 : vector<16x128xi1>
    %c15_i32_69 = arith.constant 15 : i32
    %153 = vector.broadcast %c15_i32_69 : i32 to vector<16x128xi32>
    %154 = arith.cmpi slt, %142, %153 : vector<16x128xi32>
    %c16_i32_70 = arith.constant 16 : i32
    %155 = vector.broadcast %c16_i32_70 : i32 to vector<16x128xi32>
    %156 = arith.cmpi slt, %140, %155 : vector<16x128xi32>
    %157 = arith.andi %154, %156 : vector<16x128xi1>
    %c127_i32 = arith.constant 127 : i32
    %158 = tpu.dynamic_rotate %127 by %c127_i32 dim 1 : vector<16x128xf32>, i32 -> vector<16x128xf32>
    %159 = arith.subf %127, %158 : vector<16x128xf32>
    %c127_i32_71 = arith.constant 127 : i32
    %160 = tpu.dynamic_rotate %130 by %c127_i32_71 dim 1 : vector<16x128xf32>, i32 -> vector<16x128xf32>
    %161 = arith.subf %130, %160 : vector<16x128xf32>
    %c15_i32_72 = arith.constant 15 : i32
    %162 = tpu.dynamic_rotate %127 by %c15_i32_72 dim 0 : vector<16x128xf32>, i32 -> vector<16x128xf32>
    %c15_i32_73 = arith.constant 15 : i32
    %163 = vector.broadcast %c15_i32_73 : i32 to vector<16x128xi32>
    %164 = arith.cmpi eq, %139, %163 : vector<16x128xi32>
    %165 = vector.shape_cast %135 : vector<1x128xf32> to vector<1x128xf32>
    %166 = vector.broadcast %165 : vector<1x128xf32> to vector<16x128xf32>
    %167 = arith.select %164, %166, %162 : vector<16x128xi1>, vector<16x128xf32>
    %168 = arith.subf %127, %167 : vector<16x128xf32>
    %c15_i32_74 = arith.constant 15 : i32
    %169 = tpu.dynamic_rotate %130 by %c15_i32_74 dim 0 : vector<16x128xf32>, i32 -> vector<16x128xf32>
    %c15_i32_75 = arith.constant 15 : i32
    %170 = vector.broadcast %c15_i32_75 : i32 to vector<16x128xi32>
    %171 = arith.cmpi eq, %139, %170 : vector<16x128xi32>
    %172 = vector.shape_cast %138 : vector<1x128xf32> to vector<1x128xf32>
    %173 = vector.broadcast %172 : vector<1x128xf32> to vector<16x128xf32>
    %174 = arith.select %171, %173, %169 : vector<16x128xi1>, vector<16x128xf32>
    %175 = arith.subf %130, %174 : vector<16x128xf32>
    %176 = vector.broadcast %3 : f32 to vector<16x128xf32>
    %177 = arith.select %152, %159, %176 : vector<16x128xi1>, vector<16x128xf32>
    %178 = vector.broadcast %6 : f32 to vector<16x128xf32>
    %179 = arith.cmpf ogt, %177, %178 : vector<16x128xf32>
    %180 = vector.broadcast %8 : f32 to vector<16x128xf32>
    %181 = arith.cmpf olt, %177, %180 : vector<16x128xf32>
    %182 = arith.andi %179, %181 : vector<16x128xi1>
    %cst_76 = arith.constant 1.000000e+00 : f32
    %cst_77 = arith.constant 0.000000e+00 : f32
    %183 = vector.broadcast %cst_76 : f32 to vector<16x128xf32>
    %184 = vector.broadcast %cst_77 : f32 to vector<16x128xf32>
    %185 = arith.select %182, %183, %184 : vector<16x128xi1>, vector<16x128xf32>
    %cst_78 = arith.constant dense<0.000000e+00> : vector<128xf32>
    %186 = vector.multi_reduction <add>, %185, %cst_78 [0] : vector<16x128xf32> to vector<128xf32>
    %187 = vector.shape_cast %186 : vector<128xf32> to vector<1x128xf32>
    %c0_79 = arith.constant 0 : index
    %c0_80 = arith.constant 0 : index
    %c0_81 = arith.constant 0 : index
    %188 = vector.load %arg5[%c0_79, %c0_80, %c0_81] : memref<1x64x128xf32, #tpu.memory_space<vmem>>, vector<1x1x128xf32>
    %189 = vector.shape_cast %188 : vector<1x1x128xf32> to vector<1x128xf32>
    %190 = arith.addf %189, %187 : vector<1x128xf32>
    %c0_82 = arith.constant 0 : index
    %c0_83 = arith.constant 0 : index
    %c0_84 = arith.constant 0 : index
    %191 = vector.load %arg5[%c0_82, %c0_83, %c0_84] : memref<1x64x128xf32, #tpu.memory_space<vmem>>, vector<1x1x128xf32>
    %192 = vector.shape_cast %191 : vector<1x1x128xf32> to vector<1x128xf32>
    %193 = vector.shape_cast %190 : vector<1x128xf32> to vector<1x1x128xf32>
    tpu.vector_store %arg5[%c0_82, %c0_83, %c0_84], %193 {strides = array<i32>} : memref<1x64x128xf32, #tpu.memory_space<vmem>>, vector<1x1x128xf32>,
    %194 = vector.broadcast %8 : f32 to vector<16x128xf32>
    %195 = arith.cmpf ogt, %177, %194 : vector<16x128xf32>
    %196 = vector.broadcast %10 : f32 to vector<16x128xf32>
    %197 = arith.cmpf olt, %177, %196 : vector<16x128xf32>
    %198 = arith.andi %195, %197 : vector<16x128xi1>
    %cst_85 = arith.constant 1.000000e+00 : f32
    %cst_86 = arith.constant 0.000000e+00 : f32
    %199 = vector.broadcast %cst_85 : f32 to vector<16x128xf32>
    %200 = vector.broadcast %cst_86 : f32 to vector<16x128xf32>
    %201 = arith.select %198, %199, %200 : vector<16x128xi1>, vector<16x128xf32>
    %cst_87 = arith.constant dense<0.000000e+00> : vector<128xf32>
    %202 = vector.multi_reduction <add>, %201, %cst_87 [0] : vector<16x128xf32> to vector<128xf32>
    %203 = vector.shape_cast %202 : vector<128xf32> to vector<1x128xf32>
    %c0_88 = arith.constant 0 : index
    %c1_89 = arith.constant 1 : index
    %c0_90 = arith.constant 0 : index
    %204 = vector.load %arg5[%c0_88, %c1_89, %c0_90] : memref<1x64x128xf32, #tpu.memory_space<vmem>>, vector<1x1x128xf32>
    %205 = vector.shape_cast %204 : vector<1x1x128xf32> to vector<1x128xf32>
    %206 = arith.addf %205, %203 : vector<1x128xf32>
    %c0_91 = arith.constant 0 : index
    %c1_92 = arith.constant 1 : index
    %c0_93 = arith.constant 0 : index
    %207 = vector.load %arg5[%c0_91, %c1_92, %c0_93] : memref<1x64x128xf32, #tpu.memory_space<vmem>>, vector<1x1x128xf32>
    %208 = vector.shape_cast %207 : vector<1x1x128xf32> to vector<1x128xf32>
    %209 = vector.shape_cast %206 : vector<1x128xf32> to vector<1x1x128xf32>
    tpu.vector_store %arg5[%c0_91, %c1_92, %c0_93], %209 {strides = array<i32>} : memref<1x64x128xf32, #tpu.memory_space<vmem>>, vector<1x1x128xf32>,
    %210 = vector.broadcast %10 : f32 to vector<16x128xf32>
    %211 = arith.cmpf ogt, %177, %210 : vector<16x128xf32>
    %212 = vector.broadcast %12 : f32 to vector<16x128xf32>
    %213 = arith.cmpf olt, %177, %212 : vector<16x128xf32>
    %214 = arith.andi %211, %213 : vector<16x128xi1>
    %cst_94 = arith.constant 1.000000e+00 : f32
    %cst_95 = arith.constant 0.000000e+00 : f32
    %215 = vector.broadcast %cst_94 : f32 to vector<16x128xf32>
    %216 = vector.broadcast %cst_95 : f32 to vector<16x128xf32>
    %217 = arith.select %214, %215, %216 : vector<16x128xi1>, vector<16x128xf32>
    %cst_96 = arith.constant dense<0.000000e+00> : vector<128xf32>
    %218 = vector.multi_reduction <add>, %217, %cst_96 [0] : vector<16x128xf32> to vector<128xf32>
    %219 = vector.shape_cast %218 : vector<128xf32> to vector<1x128xf32>
    %c0_97 = arith.constant 0 : index
    %c2_98 = arith.constant 2 : index
    %c0_99 = arith.constant 0 : index
    %220 = vector.load %arg5[%c0_97, %c2_98, %c0_99] : memref<1x64x128xf32, #tpu.memory_space<vmem>>, vector<1x1x128xf32>
    %221 = vector.shape_cast %220 : vector<1x1x128xf32> to vector<1x128xf32>
    %222 = arith.addf %221, %219 : vector<1x128xf32>
    %c0_100 = arith.constant 0 : index
    %c2_101 = arith.constant 2 : index
    %c0_102 = arith.constant 0 : index
    %223 = vector.load %arg5[%c0_100, %c2_101, %c0_102] : memref<1x64x128xf32, #tpu.memory_space<vmem>>, vector<1x1x128xf32>
    %224 = vector.shape_cast %223 : vector<1x1x128xf32> to vector<1x128xf32>
    %225 = vector.shape_cast %222 : vector<1x128xf32> to vector<1x1x128xf32>
    tpu.vector_store %arg5[%c0_100, %c2_101, %c0_102], %225 {strides = array<i32>} : memref<1x64x128xf32, #tpu.memory_space<vmem>>, vector<1x1x128xf32>,
    %226 = vector.broadcast %12 : f32 to vector<16x128xf32>
    %227 = arith.cmpf ogt, %177, %226 : vector<16x128xf32>
    %228 = vector.broadcast %14 : f32 to vector<16x128xf32>
    %229 = arith.cmpf olt, %177, %228 : vector<16x128xf32>
    %230 = arith.andi %227, %229 : vector<16x128xi1>
    %cst_103 = arith.constant 1.000000e+00 : f32
    %cst_104 = arith.constant 0.000000e+00 : f32
    %231 = vector.broadcast %cst_103 : f32 to vector<16x128xf32>
    %232 = vector.broadcast %cst_104 : f32 to vector<16x128xf32>
    %233 = arith.select %230, %231, %232 : vector<16x128xi1>, vector<16x128xf32>
    %cst_105 = arith.constant dense<0.000000e+00> : vector<128xf32>
    %234 = vector.multi_reduction <add>, %233, %cst_105 [0] : vector<16x128xf32> to vector<128xf32>
    %235 = vector.shape_cast %234 : vector<128xf32> to vector<1x128xf32>
    %c0_106 = arith.constant 0 : index
    %c3_107 = arith.constant 3 : index
    %c0_108 = arith.constant 0 : index
    %236 = vector.load %arg5[%c0_106, %c3_107, %c0_108] : memref<1x64x128xf32, #tpu.memory_space<vmem>>, vector<1x1x128xf32>
    %237 = vector.shape_cast %236 : vector<1x1x128xf32> to vector<1x128xf32>
    %238 = arith.addf %237, %235 : vector<1x128xf32>
    %c0_109 = arith.constant 0 : index
    %c3_110 = arith.constant 3 : index
    %c0_111 = arith.constant 0 : index
    %239 = vector.load %arg5[%c0_109, %c3_110, %c0_111] : memref<1x64x128xf32, #tpu.memory_space<vmem>>, vector<1x1x128xf32>
    %240 = vector.shape_cast %239 : vector<1x1x128xf32> to vector<1x128xf32>
    %241 = vector.shape_cast %238 : vector<1x128xf32> to vector<1x1x128xf32>
    tpu.vector_store %arg5[%c0_109, %c3_110, %c0_111], %241 {strides = array<i32>} : memref<1x64x128xf32, #tpu.memory_space<vmem>>, vector<1x1x128xf32>,
    %242 = vector.broadcast %14 : f32 to vector<16x128xf32>
    %243 = arith.cmpf ogt, %177, %242 : vector<16x128xf32>
    %244 = vector.broadcast %16 : f32 to vector<16x128xf32>
    %245 = arith.cmpf olt, %177, %244 : vector<16x128xf32>
    %246 = arith.andi %243, %245 : vector<16x128xi1>
    %cst_112 = arith.constant 1.000000e+00 : f32
    %cst_113 = arith.constant 0.000000e+00 : f32
    %247 = vector.broadcast %cst_112 : f32 to vector<16x128xf32>
    %248 = vector.broadcast %cst_113 : f32 to vector<16x128xf32>
    %249 = arith.select %246, %247, %248 : vector<16x128xi1>, vector<16x128xf32>
    %cst_114 = arith.constant dense<0.000000e+00> : vector<128xf32>
    %250 = vector.multi_reduction <add>, %249, %cst_114 [0] : vector<16x128xf32> to vector<128xf32>
    %251 = vector.shape_cast %250 : vector<128xf32> to vector<1x128xf32>
    %c0_115 = arith.constant 0 : index
    %c4_116 = arith.constant 4 : index
    %c0_117 = arith.constant 0 : index
    %252 = vector.load %arg5[%c0_115, %c4_116, %c0_117] : memref<1x64x128xf32, #tpu.memory_space<vmem>>, vector<1x1x128xf32>
    %253 = vector.shape_cast %252 : vector<1x1x128xf32> to vector<1x128xf32>
    %254 = arith.addf %253, %251 : vector<1x128xf32>
    %c0_118 = arith.constant 0 : index
    %c4_119 = arith.constant 4 : index
    %c0_120 = arith.constant 0 : index
    %255 = vector.load %arg5[%c0_118, %c4_119, %c0_120] : memref<1x64x128xf32, #tpu.memory_space<vmem>>, vector<1x1x128xf32>
    %256 = vector.shape_cast %255 : vector<1x1x128xf32> to vector<1x128xf32>
    %257 = vector.shape_cast %254 : vector<1x128xf32> to vector<1x1x128xf32>
    tpu.vector_store %arg5[%c0_118, %c4_119, %c0_120], %257 {strides = array<i32>} : memref<1x64x128xf32, #tpu.memory_space<vmem>>, vector<1x1x128xf32>,
    %258 = vector.broadcast %16 : f32 to vector<16x128xf32>
    %259 = arith.cmpf ogt, %177, %258 : vector<16x128xf32>
    %260 = vector.broadcast %18 : f32 to vector<16x128xf32>
    %261 = arith.cmpf olt, %177, %260 : vector<16x128xf32>
    %262 = arith.andi %259, %261 : vector<16x128xi1>
    %cst_121 = arith.constant 1.000000e+00 : f32
    %cst_122 = arith.constant 0.000000e+00 : f32
    %263 = vector.broadcast %cst_121 : f32 to vector<16x128xf32>
    %264 = vector.broadcast %cst_122 : f32 to vector<16x128xf32>
    %265 = arith.select %262, %263, %264 : vector<16x128xi1>, vector<16x128xf32>
    %cst_123 = arith.constant dense<0.000000e+00> : vector<128xf32>
    %266 = vector.multi_reduction <add>, %265, %cst_123 [0] : vector<16x128xf32> to vector<128xf32>
    %267 = vector.shape_cast %266 : vector<128xf32> to vector<1x128xf32>
    %c0_124 = arith.constant 0 : index
    %c5_125 = arith.constant 5 : index
    %c0_126 = arith.constant 0 : index
    %268 = vector.load %arg5[%c0_124, %c5_125, %c0_126] : memref<1x64x128xf32, #tpu.memory_space<vmem>>, vector<1x1x128xf32>
    %269 = vector.shape_cast %268 : vector<1x1x128xf32> to vector<1x128xf32>
    %270 = arith.addf %269, %267 : vector<1x128xf32>
    %c0_127 = arith.constant 0 : index
    %c5_128 = arith.constant 5 : index
    %c0_129 = arith.constant 0 : index
    %271 = vector.load %arg5[%c0_127, %c5_128, %c0_129] : memref<1x64x128xf32, #tpu.memory_space<vmem>>, vector<1x1x128xf32>
    %272 = vector.shape_cast %271 : vector<1x1x128xf32> to vector<1x128xf32>
    %273 = vector.shape_cast %270 : vector<1x128xf32> to vector<1x1x128xf32>
    tpu.vector_store %arg5[%c0_127, %c5_128, %c0_129], %273 {strides = array<i32>} : memref<1x64x128xf32, #tpu.memory_space<vmem>>, vector<1x1x128xf32>,
    %274 = vector.broadcast %18 : f32 to vector<16x128xf32>
    %275 = arith.cmpf ogt, %177, %274 : vector<16x128xf32>
    %276 = vector.broadcast %20 : f32 to vector<16x128xf32>
    %277 = arith.cmpf olt, %177, %276 : vector<16x128xf32>
    %278 = arith.andi %275, %277 : vector<16x128xi1>
    %cst_130 = arith.constant 1.000000e+00 : f32
    %cst_131 = arith.constant 0.000000e+00 : f32
    %279 = vector.broadcast %cst_130 : f32 to vector<16x128xf32>
    %280 = vector.broadcast %cst_131 : f32 to vector<16x128xf32>
    %281 = arith.select %278, %279, %280 : vector<16x128xi1>, vector<16x128xf32>
    %cst_132 = arith.constant dense<0.000000e+00> : vector<128xf32>
    %282 = vector.multi_reduction <add>, %281, %cst_132 [0] : vector<16x128xf32> to vector<128xf32>
    %283 = vector.shape_cast %282 : vector<128xf32> to vector<1x128xf32>
    %c0_133 = arith.constant 0 : index
    %c6_134 = arith.constant 6 : index
    %c0_135 = arith.constant 0 : index
    %284 = vector.load %arg5[%c0_133, %c6_134, %c0_135] : memref<1x64x128xf32, #tpu.memory_space<vmem>>, vector<1x1x128xf32>
    %285 = vector.shape_cast %284 : vector<1x1x128xf32> to vector<1x128xf32>
    %286 = arith.addf %285, %283 : vector<1x128xf32>
    %c0_136 = arith.constant 0 : index
    %c6_137 = arith.constant 6 : index
    %c0_138 = arith.constant 0 : index
    %287 = vector.load %arg5[%c0_136, %c6_137, %c0_138] : memref<1x64x128xf32, #tpu.memory_space<vmem>>, vector<1x1x128xf32>
    %288 = vector.shape_cast %287 : vector<1x1x128xf32> to vector<1x128xf32>
    %289 = vector.shape_cast %286 : vector<1x128xf32> to vector<1x1x128xf32>
    tpu.vector_store %arg5[%c0_136, %c6_137, %c0_138], %289 {strides = array<i32>} : memref<1x64x128xf32, #tpu.memory_space<vmem>>, vector<1x1x128xf32>,
    %290 = vector.broadcast %20 : f32 to vector<16x128xf32>
    %291 = arith.cmpf ogt, %177, %290 : vector<16x128xf32>
    %292 = vector.broadcast %22 : f32 to vector<16x128xf32>
    %293 = arith.cmpf olt, %177, %292 : vector<16x128xf32>
    %294 = arith.andi %291, %293 : vector<16x128xi1>
    %cst_139 = arith.constant 1.000000e+00 : f32
    %cst_140 = arith.constant 0.000000e+00 : f32
    %295 = vector.broadcast %cst_139 : f32 to vector<16x128xf32>
    %296 = vector.broadcast %cst_140 : f32 to vector<16x128xf32>
    %297 = arith.select %294, %295, %296 : vector<16x128xi1>, vector<16x128xf32>
    %cst_141 = arith.constant dense<0.000000e+00> : vector<128xf32>
    %298 = vector.multi_reduction <add>, %297, %cst_141 [0] : vector<16x128xf32> to vector<128xf32>
    %299 = vector.shape_cast %298 : vector<128xf32> to vector<1x128xf32>
    %c0_142 = arith.constant 0 : index
    %c7_143 = arith.constant 7 : index
    %c0_144 = arith.constant 0 : index
    %300 = vector.load %arg5[%c0_142, %c7_143, %c0_144] : memref<1x64x128xf32, #tpu.memory_space<vmem>>, vector<1x1x128xf32>
    %301 = vector.shape_cast %300 : vector<1x1x128xf32> to vector<1x128xf32>
    %302 = arith.addf %301, %299 : vector<1x128xf32>
    %c0_145 = arith.constant 0 : index
    %c7_146 = arith.constant 7 : index
    %c0_147 = arith.constant 0 : index
    %303 = vector.load %arg5[%c0_145, %c7_146, %c0_147] : memref<1x64x128xf32, #tpu.memory_space<vmem>>, vector<1x1x128xf32>
    %304 = vector.shape_cast %303 : vector<1x1x128xf32> to vector<1x128xf32>
    %305 = vector.shape_cast %302 : vector<1x128xf32> to vector<1x1x128xf32>
    tpu.vector_store %arg5[%c0_145, %c7_146, %c0_147], %305 {strides = array<i32>} : memref<1x64x128xf32, #tpu.memory_space<vmem>>, vector<1x1x128xf32>,
    %306 = vector.broadcast %22 : f32 to vector<16x128xf32>
    %307 = arith.cmpf ogt, %177, %306 : vector<16x128xf32>
    %308 = vector.broadcast %24 : f32 to vector<16x128xf32>
    %309 = arith.cmpf olt, %177, %308 : vector<16x128xf32>
    %310 = arith.andi %307, %309 : vector<16x128xi1>
    %cst_148 = arith.constant 1.000000e+00 : f32
    %cst_149 = arith.constant 0.000000e+00 : f32
    %311 = vector.broadcast %cst_148 : f32 to vector<16x128xf32>
    %312 = vector.broadcast %cst_149 : f32 to vector<16x128xf32>
    %313 = arith.select %310, %311, %312 : vector<16x128xi1>, vector<16x128xf32>
    %cst_150 = arith.constant dense<0.000000e+00> : vector<128xf32>
    %314 = vector.multi_reduction <add>, %313, %cst_150 [0] : vector<16x128xf32> to vector<128xf32>
    %315 = vector.shape_cast %314 : vector<128xf32> to vector<1x128xf32>
    %c0_151 = arith.constant 0 : index
    %c8_152 = arith.constant 8 : index
    %c0_153 = arith.constant 0 : index
    %316 = vector.load %arg5[%c0_151, %c8_152, %c0_153] : memref<1x64x128xf32, #tpu.memory_space<vmem>>, vector<1x1x128xf32>
    %317 = vector.shape_cast %316 : vector<1x1x128xf32> to vector<1x128xf32>
    %318 = arith.addf %317, %315 : vector<1x128xf32>
    %c0_154 = arith.constant 0 : index
    %c8_155 = arith.constant 8 : index
    %c0_156 = arith.constant 0 : index
    %319 = vector.load %arg5[%c0_154, %c8_155, %c0_156] : memref<1x64x128xf32, #tpu.memory_space<vmem>>, vector<1x1x128xf32>
    %320 = vector.shape_cast %319 : vector<1x1x128xf32> to vector<1x128xf32>
    %321 = vector.shape_cast %318 : vector<1x128xf32> to vector<1x1x128xf32>
    tpu.vector_store %arg5[%c0_154, %c8_155, %c0_156], %321 {strides = array<i32>} : memref<1x64x128xf32, #tpu.memory_space<vmem>>, vector<1x1x128xf32>,
    %322 = vector.broadcast %24 : f32 to vector<16x128xf32>
    %323 = arith.cmpf ogt, %177, %322 : vector<16x128xf32>
    %324 = vector.broadcast %26 : f32 to vector<16x128xf32>
    %325 = arith.cmpf olt, %177, %324 : vector<16x128xf32>
    %326 = arith.andi %323, %325 : vector<16x128xi1>
    %cst_157 = arith.constant 1.000000e+00 : f32
    %cst_158 = arith.constant 0.000000e+00 : f32
    %327 = vector.broadcast %cst_157 : f32 to vector<16x128xf32>
    %328 = vector.broadcast %cst_158 : f32 to vector<16x128xf32>
    %329 = arith.select %326, %327, %328 : vector<16x128xi1>, vector<16x128xf32>
    %cst_159 = arith.constant dense<0.000000e+00> : vector<128xf32>
    %330 = vector.multi_reduction <add>, %329, %cst_159 [0] : vector<16x128xf32> to vector<128xf32>
    %331 = vector.shape_cast %330 : vector<128xf32> to vector<1x128xf32>
    %c0_160 = arith.constant 0 : index
    %c9_161 = arith.constant 9 : index
    %c0_162 = arith.constant 0 : index
    %332 = vector.load %arg5[%c0_160, %c9_161, %c0_162] : memref<1x64x128xf32, #tpu.memory_space<vmem>>, vector<1x1x128xf32>
    %333 = vector.shape_cast %332 : vector<1x1x128xf32> to vector<1x128xf32>
    %334 = arith.addf %333, %331 : vector<1x128xf32>
    %c0_163 = arith.constant 0 : index
    %c9_164 = arith.constant 9 : index
    %c0_165 = arith.constant 0 : index
    %335 = vector.load %arg5[%c0_163, %c9_164, %c0_165] : memref<1x64x128xf32, #tpu.memory_space<vmem>>, vector<1x1x128xf32>
    %336 = vector.shape_cast %335 : vector<1x1x128xf32> to vector<1x128xf32>
    %337 = vector.shape_cast %334 : vector<1x128xf32> to vector<1x1x128xf32>
    tpu.vector_store %arg5[%c0_163, %c9_164, %c0_165], %337 {strides = array<i32>} : memref<1x64x128xf32, #tpu.memory_space<vmem>>, vector<1x1x128xf32>,
    %338 = vector.broadcast %27 : f32 to vector<16x128xf32>
    %339 = arith.select %152, %161, %338 : vector<16x128xi1>, vector<16x128xf32>
    %340 = vector.broadcast %30 : f32 to vector<16x128xf32>
    %341 = arith.cmpf ogt, %339, %340 : vector<16x128xf32>
    %342 = vector.broadcast %32 : f32 to vector<16x128xf32>
    %343 = arith.cmpf olt, %339, %342 : vector<16x128xf32>
    %344 = arith.andi %341, %343 : vector<16x128xi1>
    %cst_166 = arith.constant 1.000000e+00 : f32
    %cst_167 = arith.constant 0.000000e+00 : f32
    %345 = vector.broadcast %cst_166 : f32 to vector<16x128xf32>
    %346 = vector.broadcast %cst_167 : f32 to vector<16x128xf32>
    %347 = arith.select %344, %345, %346 : vector<16x128xi1>, vector<16x128xf32>
    %cst_168 = arith.constant dense<0.000000e+00> : vector<128xf32>
    %348 = vector.multi_reduction <add>, %347, %cst_168 [0] : vector<16x128xf32> to vector<128xf32>
    %349 = vector.shape_cast %348 : vector<128xf32> to vector<1x128xf32>
    %c0_169 = arith.constant 0 : index
    %c10 = arith.constant 10 : index
    %c0_170 = arith.constant 0 : index
    %350 = vector.load %arg5[%c0_169, %c10, %c0_170] : memref<1x64x128xf32, #tpu.memory_space<vmem>>, vector<1x1x128xf32>
    %351 = vector.shape_cast %350 : vector<1x1x128xf32> to vector<1x128xf32>
    %352 = arith.addf %351, %349 : vector<1x128xf32>
    %c0_171 = arith.constant 0 : index
    %c10_172 = arith.constant 10 : index
    %c0_173 = arith.constant 0 : index
    %353 = vector.load %arg5[%c0_171, %c10_172, %c0_173] : memref<1x64x128xf32, #tpu.memory_space<vmem>>, vector<1x1x128xf32>
    %354 = vector.shape_cast %353 : vector<1x1x128xf32> to vector<1x128xf32>
    %355 = vector.shape_cast %352 : vector<1x128xf32> to vector<1x1x128xf32>
    tpu.vector_store %arg5[%c0_171, %c10_172, %c0_173], %355 {strides = array<i32>} : memref<1x64x128xf32, #tpu.memory_space<vmem>>, vector<1x1x128xf32>,
    %356 = vector.broadcast %32 : f32 to vector<16x128xf32>
    %357 = arith.cmpf ogt, %339, %356 : vector<16x128xf32>
    %358 = vector.broadcast %34 : f32 to vector<16x128xf32>
    %359 = arith.cmpf olt, %339, %358 : vector<16x128xf32>
    %360 = arith.andi %357, %359 : vector<16x128xi1>
    %cst_174 = arith.constant 1.000000e+00 : f32
    %cst_175 = arith.constant 0.000000e+00 : f32
    %361 = vector.broadcast %cst_174 : f32 to vector<16x128xf32>
    %362 = vector.broadcast %cst_175 : f32 to vector<16x128xf32>
    %363 = arith.select %360, %361, %362 : vector<16x128xi1>, vector<16x128xf32>
    %cst_176 = arith.constant dense<0.000000e+00> : vector<128xf32>
    %364 = vector.multi_reduction <add>, %363, %cst_176 [0] : vector<16x128xf32> to vector<128xf32>
    %365 = vector.shape_cast %364 : vector<128xf32> to vector<1x128xf32>
    %c0_177 = arith.constant 0 : index
    %c11 = arith.constant 11 : index
    %c0_178 = arith.constant 0 : index
    %366 = vector.load %arg5[%c0_177, %c11, %c0_178] : memref<1x64x128xf32, #tpu.memory_space<vmem>>, vector<1x1x128xf32>
    %367 = vector.shape_cast %366 : vector<1x1x128xf32> to vector<1x128xf32>
    %368 = arith.addf %367, %365 : vector<1x128xf32>
    %c0_179 = arith.constant 0 : index
    %c11_180 = arith.constant 11 : index
    %c0_181 = arith.constant 0 : index
    %369 = vector.load %arg5[%c0_179, %c11_180, %c0_181] : memref<1x64x128xf32, #tpu.memory_space<vmem>>, vector<1x1x128xf32>
    %370 = vector.shape_cast %369 : vector<1x1x128xf32> to vector<1x128xf32>
    %371 = vector.shape_cast %368 : vector<1x128xf32> to vector<1x1x128xf32>
    tpu.vector_store %arg5[%c0_179, %c11_180, %c0_181], %371 {strides = array<i32>} : memref<1x64x128xf32, #tpu.memory_space<vmem>>, vector<1x1x128xf32>,
    %372 = vector.broadcast %34 : f32 to vector<16x128xf32>
    %373 = arith.cmpf ogt, %339, %372 : vector<16x128xf32>
    %374 = vector.broadcast %36 : f32 to vector<16x128xf32>
    %375 = arith.cmpf olt, %339, %374 : vector<16x128xf32>
    %376 = arith.andi %373, %375 : vector<16x128xi1>
    %cst_182 = arith.constant 1.000000e+00 : f32
    %cst_183 = arith.constant 0.000000e+00 : f32
    %377 = vector.broadcast %cst_182 : f32 to vector<16x128xf32>
    %378 = vector.broadcast %cst_183 : f32 to vector<16x128xf32>
    %379 = arith.select %376, %377, %378 : vector<16x128xi1>, vector<16x128xf32>
    %cst_184 = arith.constant dense<0.000000e+00> : vector<128xf32>
    %380 = vector.multi_reduction <add>, %379, %cst_184 [0] : vector<16x128xf32> to vector<128xf32>
    %381 = vector.shape_cast %380 : vector<128xf32> to vector<1x128xf32>
    %c0_185 = arith.constant 0 : index
    %c12 = arith.constant 12 : index
    %c0_186 = arith.constant 0 : index
    %382 = vector.load %arg5[%c0_185, %c12, %c0_186] : memref<1x64x128xf32, #tpu.memory_space<vmem>>, vector<1x1x128xf32>
    %383 = vector.shape_cast %382 : vector<1x1x128xf32> to vector<1x128xf32>
    %384 = arith.addf %383, %381 : vector<1x128xf32>
    %c0_187 = arith.constant 0 : index
    %c12_188 = arith.constant 12 : index
    %c0_189 = arith.constant 0 : index
    %385 = vector.load %arg5[%c0_187, %c12_188, %c0_189] : memref<1x64x128xf32, #tpu.memory_space<vmem>>, vector<1x1x128xf32>
    %386 = vector.shape_cast %385 : vector<1x1x128xf32> to vector<1x128xf32>
    %387 = vector.shape_cast %384 : vector<1x128xf32> to vector<1x1x128xf32>
    tpu.vector_store %arg5[%c0_187, %c12_188, %c0_189], %387 {strides = array<i32>} : memref<1x64x128xf32, #tpu.memory_space<vmem>>, vector<1x1x128xf32>,
    %388 = vector.broadcast %36 : f32 to vector<16x128xf32>
    %389 = arith.cmpf ogt, %339, %388 : vector<16x128xf32>
    %390 = vector.broadcast %38 : f32 to vector<16x128xf32>
    %391 = arith.cmpf olt, %339, %390 : vector<16x128xf32>
    %392 = arith.andi %389, %391 : vector<16x128xi1>
    %cst_190 = arith.constant 1.000000e+00 : f32
    %cst_191 = arith.constant 0.000000e+00 : f32
    %393 = vector.broadcast %cst_190 : f32 to vector<16x128xf32>
    %394 = vector.broadcast %cst_191 : f32 to vector<16x128xf32>
    %395 = arith.select %392, %393, %394 : vector<16x128xi1>, vector<16x128xf32>
    %cst_192 = arith.constant dense<0.000000e+00> : vector<128xf32>
    %396 = vector.multi_reduction <add>, %395, %cst_192 [0] : vector<16x128xf32> to vector<128xf32>
    %397 = vector.shape_cast %396 : vector<128xf32> to vector<1x128xf32>
    %c0_193 = arith.constant 0 : index
    %c13 = arith.constant 13 : index
    %c0_194 = arith.constant 0 : index
    %398 = vector.load %arg5[%c0_193, %c13, %c0_194] : memref<1x64x128xf32, #tpu.memory_space<vmem>>, vector<1x1x128xf32>
    %399 = vector.shape_cast %398 : vector<1x1x128xf32> to vector<1x128xf32>
    %400 = arith.addf %399, %397 : vector<1x128xf32>
    %c0_195 = arith.constant 0 : index
    %c13_196 = arith.constant 13 : index
    %c0_197 = arith.constant 0 : index
    %401 = vector.load %arg5[%c0_195, %c13_196, %c0_197] : memref<1x64x128xf32, #tpu.memory_space<vmem>>, vector<1x1x128xf32>
    %402 = vector.shape_cast %401 : vector<1x1x128xf32> to vector<1x128xf32>
    %403 = vector.shape_cast %400 : vector<1x128xf32> to vector<1x1x128xf32>
    tpu.vector_store %arg5[%c0_195, %c13_196, %c0_197], %403 {strides = array<i32>} : memref<1x64x128xf32, #tpu.memory_space<vmem>>, vector<1x1x128xf32>,
    %404 = vector.broadcast %38 : f32 to vector<16x128xf32>
    %405 = arith.cmpf ogt, %339, %404 : vector<16x128xf32>
    %406 = vector.broadcast %40 : f32 to vector<16x128xf32>
    %407 = arith.cmpf olt, %339, %406 : vector<16x128xf32>
    %408 = arith.andi %405, %407 : vector<16x128xi1>
    %cst_198 = arith.constant 1.000000e+00 : f32
    %cst_199 = arith.constant 0.000000e+00 : f32
    %409 = vector.broadcast %cst_198 : f32 to vector<16x128xf32>
    %410 = vector.broadcast %cst_199 : f32 to vector<16x128xf32>
    %411 = arith.select %408, %409, %410 : vector<16x128xi1>, vector<16x128xf32>
    %cst_200 = arith.constant dense<0.000000e+00> : vector<128xf32>
    %412 = vector.multi_reduction <add>, %411, %cst_200 [0] : vector<16x128xf32> to vector<128xf32>
    %413 = vector.shape_cast %412 : vector<128xf32> to vector<1x128xf32>
    %c0_201 = arith.constant 0 : index
    %c14 = arith.constant 14 : index
    %c0_202 = arith.constant 0 : index
    %414 = vector.load %arg5[%c0_201, %c14, %c0_202] : memref<1x64x128xf32, #tpu.memory_space<vmem>>, vector<1x1x128xf32>
    %415 = vector.shape_cast %414 : vector<1x1x128xf32> to vector<1x128xf32>
    %416 = arith.addf %415, %413 : vector<1x128xf32>
    %c0_203 = arith.constant 0 : index
    %c14_204 = arith.constant 14 : index
    %c0_205 = arith.constant 0 : index
    %417 = vector.load %arg5[%c0_203, %c14_204, %c0_205] : memref<1x64x128xf32, #tpu.memory_space<vmem>>, vector<1x1x128xf32>
    %418 = vector.shape_cast %417 : vector<1x1x128xf32> to vector<1x128xf32>
    %419 = vector.shape_cast %416 : vector<1x128xf32> to vector<1x1x128xf32>
    tpu.vector_store %arg5[%c0_203, %c14_204, %c0_205], %419 {strides = array<i32>} : memref<1x64x128xf32, #tpu.memory_space<vmem>>, vector<1x1x128xf32>,
    %420 = vector.broadcast %40 : f32 to vector<16x128xf32>
    %421 = arith.cmpf ogt, %339, %420 : vector<16x128xf32>
    %422 = vector.broadcast %42 : f32 to vector<16x128xf32>
    %423 = arith.cmpf olt, %339, %422 : vector<16x128xf32>
    %424 = arith.andi %421, %423 : vector<16x128xi1>
    %cst_206 = arith.constant 1.000000e+00 : f32
    %cst_207 = arith.constant 0.000000e+00 : f32
    %425 = vector.broadcast %cst_206 : f32 to vector<16x128xf32>
    %426 = vector.broadcast %cst_207 : f32 to vector<16x128xf32>
    %427 = arith.select %424, %425, %426 : vector<16x128xi1>, vector<16x128xf32>
    %cst_208 = arith.constant dense<0.000000e+00> : vector<128xf32>
    %428 = vector.multi_reduction <add>, %427, %cst_208 [0] : vector<16x128xf32> to vector<128xf32>
    %429 = vector.shape_cast %428 : vector<128xf32> to vector<1x128xf32>
    %c0_209 = arith.constant 0 : index
    %c15 = arith.constant 15 : index
    %c0_210 = arith.constant 0 : index
    %430 = vector.load %arg5[%c0_209, %c15, %c0_210] : memref<1x64x128xf32, #tpu.memory_space<vmem>>, vector<1x1x128xf32>
    %431 = vector.shape_cast %430 : vector<1x1x128xf32> to vector<1x128xf32>
    %432 = arith.addf %431, %429 : vector<1x128xf32>
    %c0_211 = arith.constant 0 : index
    %c15_212 = arith.constant 15 : index
    %c0_213 = arith.constant 0 : index
    %433 = vector.load %arg5[%c0_211, %c15_212, %c0_213] : memref<1x64x128xf32, #tpu.memory_space<vmem>>, vector<1x1x128xf32>
    %434 = vector.shape_cast %433 : vector<1x1x128xf32> to vector<1x128xf32>
    %435 = vector.shape_cast %432 : vector<1x128xf32> to vector<1x1x128xf32>
    tpu.vector_store %arg5[%c0_211, %c15_212, %c0_213], %435 {strides = array<i32>} : memref<1x64x128xf32, #tpu.memory_space<vmem>>, vector<1x1x128xf32>,
    %436 = vector.broadcast %42 : f32 to vector<16x128xf32>
    %437 = arith.cmpf ogt, %339, %436 : vector<16x128xf32>
    %438 = vector.broadcast %44 : f32 to vector<16x128xf32>
    %439 = arith.cmpf olt, %339, %438 : vector<16x128xf32>
    %440 = arith.andi %437, %439 : vector<16x128xi1>
    %cst_214 = arith.constant 1.000000e+00 : f32
    %cst_215 = arith.constant 0.000000e+00 : f32
    %441 = vector.broadcast %cst_214 : f32 to vector<16x128xf32>
    %442 = vector.broadcast %cst_215 : f32 to vector<16x128xf32>
    %443 = arith.select %440, %441, %442 : vector<16x128xi1>, vector<16x128xf32>
    %cst_216 = arith.constant dense<0.000000e+00> : vector<128xf32>
    %444 = vector.multi_reduction <add>, %443, %cst_216 [0] : vector<16x128xf32> to vector<128xf32>
    %445 = vector.shape_cast %444 : vector<128xf32> to vector<1x128xf32>
    %c0_217 = arith.constant 0 : index
    %c16 = arith.constant 16 : index
    %c0_218 = arith.constant 0 : index
    %446 = vector.load %arg5[%c0_217, %c16, %c0_218] : memref<1x64x128xf32, #tpu.memory_space<vmem>>, vector<1x1x128xf32>
    %447 = vector.shape_cast %446 : vector<1x1x128xf32> to vector<1x128xf32>
    %448 = arith.addf %447, %445 : vector<1x128xf32>
    %c0_219 = arith.constant 0 : index
    %c16_220 = arith.constant 16 : index
    %c0_221 = arith.constant 0 : index
    %449 = vector.load %arg5[%c0_219, %c16_220, %c0_221] : memref<1x64x128xf32, #tpu.memory_space<vmem>>, vector<1x1x128xf32>
    %450 = vector.shape_cast %449 : vector<1x1x128xf32> to vector<1x128xf32>
    %451 = vector.shape_cast %448 : vector<1x128xf32> to vector<1x1x128xf32>
    tpu.vector_store %arg5[%c0_219, %c16_220, %c0_221], %451 {strides = array<i32>} : memref<1x64x128xf32, #tpu.memory_space<vmem>>, vector<1x1x128xf32>,
    %452 = vector.broadcast %44 : f32 to vector<16x128xf32>
    %453 = arith.cmpf ogt, %339, %452 : vector<16x128xf32>
    %454 = vector.broadcast %46 : f32 to vector<16x128xf32>
    %455 = arith.cmpf olt, %339, %454 : vector<16x128xf32>
    %456 = arith.andi %453, %455 : vector<16x128xi1>
    %cst_222 = arith.constant 1.000000e+00 : f32
    %cst_223 = arith.constant 0.000000e+00 : f32
    %457 = vector.broadcast %cst_222 : f32 to vector<16x128xf32>
    %458 = vector.broadcast %cst_223 : f32 to vector<16x128xf32>
    %459 = arith.select %456, %457, %458 : vector<16x128xi1>, vector<16x128xf32>
    %cst_224 = arith.constant dense<0.000000e+00> : vector<128xf32>
    %460 = vector.multi_reduction <add>, %459, %cst_224 [0] : vector<16x128xf32> to vector<128xf32>
    %461 = vector.shape_cast %460 : vector<128xf32> to vector<1x128xf32>
    %c0_225 = arith.constant 0 : index
    %c17 = arith.constant 17 : index
    %c0_226 = arith.constant 0 : index
    %462 = vector.load %arg5[%c0_225, %c17, %c0_226] : memref<1x64x128xf32, #tpu.memory_space<vmem>>, vector<1x1x128xf32>
    %463 = vector.shape_cast %462 : vector<1x1x128xf32> to vector<1x128xf32>
    %464 = arith.addf %463, %461 : vector<1x128xf32>
    %c0_227 = arith.constant 0 : index
    %c17_228 = arith.constant 17 : index
    %c0_229 = arith.constant 0 : index
    %465 = vector.load %arg5[%c0_227, %c17_228, %c0_229] : memref<1x64x128xf32, #tpu.memory_space<vmem>>, vector<1x1x128xf32>
    %466 = vector.shape_cast %465 : vector<1x1x128xf32> to vector<1x128xf32>
    %467 = vector.shape_cast %464 : vector<1x128xf32> to vector<1x1x128xf32>
    tpu.vector_store %arg5[%c0_227, %c17_228, %c0_229], %467 {strides = array<i32>} : memref<1x64x128xf32, #tpu.memory_space<vmem>>, vector<1x1x128xf32>,
    %468 = vector.broadcast %46 : f32 to vector<16x128xf32>
    %469 = arith.cmpf ogt, %339, %468 : vector<16x128xf32>
    %470 = vector.broadcast %48 : f32 to vector<16x128xf32>
    %471 = arith.cmpf olt, %339, %470 : vector<16x128xf32>
    %472 = arith.andi %469, %471 : vector<16x128xi1>
    %cst_230 = arith.constant 1.000000e+00 : f32
    %cst_231 = arith.constant 0.000000e+00 : f32
    %473 = vector.broadcast %cst_230 : f32 to vector<16x128xf32>
    %474 = vector.broadcast %cst_231 : f32 to vector<16x128xf32>
    %475 = arith.select %472, %473, %474 : vector<16x128xi1>, vector<16x128xf32>
    %cst_232 = arith.constant dense<0.000000e+00> : vector<128xf32>
    %476 = vector.multi_reduction <add>, %475, %cst_232 [0] : vector<16x128xf32> to vector<128xf32>
    %477 = vector.shape_cast %476 : vector<128xf32> to vector<1x128xf32>
    %c0_233 = arith.constant 0 : index
    %c18 = arith.constant 18 : index
    %c0_234 = arith.constant 0 : index
    %478 = vector.load %arg5[%c0_233, %c18, %c0_234] : memref<1x64x128xf32, #tpu.memory_space<vmem>>, vector<1x1x128xf32>
    %479 = vector.shape_cast %478 : vector<1x1x128xf32> to vector<1x128xf32>
    %480 = arith.addf %479, %477 : vector<1x128xf32>
    %c0_235 = arith.constant 0 : index
    %c18_236 = arith.constant 18 : index
    %c0_237 = arith.constant 0 : index
    %481 = vector.load %arg5[%c0_235, %c18_236, %c0_237] : memref<1x64x128xf32, #tpu.memory_space<vmem>>, vector<1x1x128xf32>
    %482 = vector.shape_cast %481 : vector<1x1x128xf32> to vector<1x128xf32>
    %483 = vector.shape_cast %480 : vector<1x128xf32> to vector<1x1x128xf32>
    tpu.vector_store %arg5[%c0_235, %c18_236, %c0_237], %483 {strides = array<i32>} : memref<1x64x128xf32, #tpu.memory_space<vmem>>, vector<1x1x128xf32>,
    %484 = vector.broadcast %48 : f32 to vector<16x128xf32>
    %485 = arith.cmpf ogt, %339, %484 : vector<16x128xf32>
    %486 = vector.broadcast %50 : f32 to vector<16x128xf32>
    %487 = arith.cmpf olt, %339, %486 : vector<16x128xf32>
    %488 = arith.andi %485, %487 : vector<16x128xi1>
    %cst_238 = arith.constant 1.000000e+00 : f32
    %cst_239 = arith.constant 0.000000e+00 : f32
    %489 = vector.broadcast %cst_238 : f32 to vector<16x128xf32>
    %490 = vector.broadcast %cst_239 : f32 to vector<16x128xf32>
    %491 = arith.select %488, %489, %490 : vector<16x128xi1>, vector<16x128xf32>
    %cst_240 = arith.constant dense<0.000000e+00> : vector<128xf32>
    %492 = vector.multi_reduction <add>, %491, %cst_240 [0] : vector<16x128xf32> to vector<128xf32>
    %493 = vector.shape_cast %492 : vector<128xf32> to vector<1x128xf32>
    %c0_241 = arith.constant 0 : index
    %c19 = arith.constant 19 : index
    %c0_242 = arith.constant 0 : index
    %494 = vector.load %arg5[%c0_241, %c19, %c0_242] : memref<1x64x128xf32, #tpu.memory_space<vmem>>, vector<1x1x128xf32>
    %495 = vector.shape_cast %494 : vector<1x1x128xf32> to vector<1x128xf32>
    %496 = arith.addf %495, %493 : vector<1x128xf32>
    %c0_243 = arith.constant 0 : index
    %c19_244 = arith.constant 19 : index
    %c0_245 = arith.constant 0 : index
    %497 = vector.load %arg5[%c0_243, %c19_244, %c0_245] : memref<1x64x128xf32, #tpu.memory_space<vmem>>, vector<1x1x128xf32>
    %498 = vector.shape_cast %497 : vector<1x1x128xf32> to vector<1x128xf32>
    %499 = vector.shape_cast %496 : vector<1x128xf32> to vector<1x1x128xf32>
    tpu.vector_store %arg5[%c0_243, %c19_244, %c0_245], %499 {strides = array<i32>} : memref<1x64x128xf32, #tpu.memory_space<vmem>>, vector<1x1x128xf32>,
    %500 = vector.broadcast %51 : f32 to vector<16x128xf32>
    %501 = arith.select %157, %168, %500 : vector<16x128xi1>, vector<16x128xf32>
    %502 = vector.broadcast %54 : f32 to vector<16x128xf32>
    %503 = arith.cmpf ogt, %501, %502 : vector<16x128xf32>
    %504 = vector.broadcast %56 : f32 to vector<16x128xf32>
    %505 = arith.cmpf olt, %501, %504 : vector<16x128xf32>
    %506 = arith.andi %503, %505 : vector<16x128xi1>
    %cst_246 = arith.constant 1.000000e+00 : f32
    %cst_247 = arith.constant 0.000000e+00 : f32
    %507 = vector.broadcast %cst_246 : f32 to vector<16x128xf32>
    %508 = vector.broadcast %cst_247 : f32 to vector<16x128xf32>
    %509 = arith.select %506, %507, %508 : vector<16x128xi1>, vector<16x128xf32>
    %cst_248 = arith.constant dense<0.000000e+00> : vector<128xf32>
    %510 = vector.multi_reduction <add>, %509, %cst_248 [0] : vector<16x128xf32> to vector<128xf32>
    %511 = vector.shape_cast %510 : vector<128xf32> to vector<1x128xf32>
    %c0_249 = arith.constant 0 : index
    %c20 = arith.constant 20 : index
    %c0_250 = arith.constant 0 : index
    %512 = vector.load %arg5[%c0_249, %c20, %c0_250] : memref<1x64x128xf32, #tpu.memory_space<vmem>>, vector<1x1x128xf32>
    %513 = vector.shape_cast %512 : vector<1x1x128xf32> to vector<1x128xf32>
    %514 = arith.addf %513, %511 : vector<1x128xf32>
    %c0_251 = arith.constant 0 : index
    %c20_252 = arith.constant 20 : index
    %c0_253 = arith.constant 0 : index
    %515 = vector.load %arg5[%c0_251, %c20_252, %c0_253] : memref<1x64x128xf32, #tpu.memory_space<vmem>>, vector<1x1x128xf32>
    %516 = vector.shape_cast %515 : vector<1x1x128xf32> to vector<1x128xf32>
    %517 = vector.shape_cast %514 : vector<1x128xf32> to vector<1x1x128xf32>
    tpu.vector_store %arg5[%c0_251, %c20_252, %c0_253], %517 {strides = array<i32>} : memref<1x64x128xf32, #tpu.memory_space<vmem>>, vector<1x1x128xf32>,
    %518 = vector.broadcast %56 : f32 to vector<16x128xf32>
    %519 = arith.cmpf ogt, %501, %518 : vector<16x128xf32>
    %520 = vector.broadcast %58 : f32 to vector<16x128xf32>
    %521 = arith.cmpf olt, %501, %520 : vector<16x128xf32>
    %522 = arith.andi %519, %521 : vector<16x128xi1>
    %cst_254 = arith.constant 1.000000e+00 : f32
    %cst_255 = arith.constant 0.000000e+00 : f32
    %523 = vector.broadcast %cst_254 : f32 to vector<16x128xf32>
    %524 = vector.broadcast %cst_255 : f32 to vector<16x128xf32>
    %525 = arith.select %522, %523, %524 : vector<16x128xi1>, vector<16x128xf32>
    %cst_256 = arith.constant dense<0.000000e+00> : vector<128xf32>
    %526 = vector.multi_reduction <add>, %525, %cst_256 [0] : vector<16x128xf32> to vector<128xf32>
    %527 = vector.shape_cast %526 : vector<128xf32> to vector<1x128xf32>
    %c0_257 = arith.constant 0 : index
    %c21 = arith.constant 21 : index
    %c0_258 = arith.constant 0 : index
    %528 = vector.load %arg5[%c0_257, %c21, %c0_258] : memref<1x64x128xf32, #tpu.memory_space<vmem>>, vector<1x1x128xf32>
    %529 = vector.shape_cast %528 : vector<1x1x128xf32> to vector<1x128xf32>
    %530 = arith.addf %529, %527 : vector<1x128xf32>
    %c0_259 = arith.constant 0 : index
    %c21_260 = arith.constant 21 : index
    %c0_261 = arith.constant 0 : index
    %531 = vector.load %arg5[%c0_259, %c21_260, %c0_261] : memref<1x64x128xf32, #tpu.memory_space<vmem>>, vector<1x1x128xf32>
    %532 = vector.shape_cast %531 : vector<1x1x128xf32> to vector<1x128xf32>
    %533 = vector.shape_cast %530 : vector<1x128xf32> to vector<1x1x128xf32>
    tpu.vector_store %arg5[%c0_259, %c21_260, %c0_261], %533 {strides = array<i32>} : memref<1x64x128xf32, #tpu.memory_space<vmem>>, vector<1x1x128xf32>,
    %534 = vector.broadcast %58 : f32 to vector<16x128xf32>
    %535 = arith.cmpf ogt, %501, %534 : vector<16x128xf32>
    %536 = vector.broadcast %60 : f32 to vector<16x128xf32>
    %537 = arith.cmpf olt, %501, %536 : vector<16x128xf32>
    %538 = arith.andi %535, %537 : vector<16x128xi1>
    %cst_262 = arith.constant 1.000000e+00 : f32
    %cst_263 = arith.constant 0.000000e+00 : f32
    %539 = vector.broadcast %cst_262 : f32 to vector<16x128xf32>
    %540 = vector.broadcast %cst_263 : f32 to vector<16x128xf32>
    %541 = arith.select %538, %539, %540 : vector<16x128xi1>, vector<16x128xf32>
    %cst_264 = arith.constant dense<0.000000e+00> : vector<128xf32>
    %542 = vector.multi_reduction <add>, %541, %cst_264 [0] : vector<16x128xf32> to vector<128xf32>
    %543 = vector.shape_cast %542 : vector<128xf32> to vector<1x128xf32>
    %c0_265 = arith.constant 0 : index
    %c22 = arith.constant 22 : index
    %c0_266 = arith.constant 0 : index
    %544 = vector.load %arg5[%c0_265, %c22, %c0_266] : memref<1x64x128xf32, #tpu.memory_space<vmem>>, vector<1x1x128xf32>
    %545 = vector.shape_cast %544 : vector<1x1x128xf32> to vector<1x128xf32>
    %546 = arith.addf %545, %543 : vector<1x128xf32>
    %c0_267 = arith.constant 0 : index
    %c22_268 = arith.constant 22 : index
    %c0_269 = arith.constant 0 : index
    %547 = vector.load %arg5[%c0_267, %c22_268, %c0_269] : memref<1x64x128xf32, #tpu.memory_space<vmem>>, vector<1x1x128xf32>
    %548 = vector.shape_cast %547 : vector<1x1x128xf32> to vector<1x128xf32>
    %549 = vector.shape_cast %546 : vector<1x128xf32> to vector<1x1x128xf32>
    tpu.vector_store %arg5[%c0_267, %c22_268, %c0_269], %549 {strides = array<i32>} : memref<1x64x128xf32, #tpu.memory_space<vmem>>, vector<1x1x128xf32>,
    %550 = vector.broadcast %60 : f32 to vector<16x128xf32>
    %551 = arith.cmpf ogt, %501, %550 : vector<16x128xf32>
    %552 = vector.broadcast %62 : f32 to vector<16x128xf32>
    %553 = arith.cmpf olt, %501, %552 : vector<16x128xf32>
    %554 = arith.andi %551, %553 : vector<16x128xi1>
    %cst_270 = arith.constant 1.000000e+00 : f32
    %cst_271 = arith.constant 0.000000e+00 : f32
    %555 = vector.broadcast %cst_270 : f32 to vector<16x128xf32>
    %556 = vector.broadcast %cst_271 : f32 to vector<16x128xf32>
    %557 = arith.select %554, %555, %556 : vector<16x128xi1>, vector<16x128xf32>
    %cst_272 = arith.constant dense<0.000000e+00> : vector<128xf32>
    %558 = vector.multi_reduction <add>, %557, %cst_272 [0] : vector<16x128xf32> to vector<128xf32>
    %559 = vector.shape_cast %558 : vector<128xf32> to vector<1x128xf32>
    %c0_273 = arith.constant 0 : index
    %c23 = arith.constant 23 : index
    %c0_274 = arith.constant 0 : index
    %560 = vector.load %arg5[%c0_273, %c23, %c0_274] : memref<1x64x128xf32, #tpu.memory_space<vmem>>, vector<1x1x128xf32>
    %561 = vector.shape_cast %560 : vector<1x1x128xf32> to vector<1x128xf32>
    %562 = arith.addf %561, %559 : vector<1x128xf32>
    %c0_275 = arith.constant 0 : index
    %c23_276 = arith.constant 23 : index
    %c0_277 = arith.constant 0 : index
    %563 = vector.load %arg5[%c0_275, %c23_276, %c0_277] : memref<1x64x128xf32, #tpu.memory_space<vmem>>, vector<1x1x128xf32>
    %564 = vector.shape_cast %563 : vector<1x1x128xf32> to vector<1x128xf32>
    %565 = vector.shape_cast %562 : vector<1x128xf32> to vector<1x1x128xf32>
    tpu.vector_store %arg5[%c0_275, %c23_276, %c0_277], %565 {strides = array<i32>} : memref<1x64x128xf32, #tpu.memory_space<vmem>>, vector<1x1x128xf32>,
    %566 = vector.broadcast %62 : f32 to vector<16x128xf32>
    %567 = arith.cmpf ogt, %501, %566 : vector<16x128xf32>
    %568 = vector.broadcast %64 : f32 to vector<16x128xf32>
    %569 = arith.cmpf olt, %501, %568 : vector<16x128xf32>
    %570 = arith.andi %567, %569 : vector<16x128xi1>
    %cst_278 = arith.constant 1.000000e+00 : f32
    %cst_279 = arith.constant 0.000000e+00 : f32
    %571 = vector.broadcast %cst_278 : f32 to vector<16x128xf32>
    %572 = vector.broadcast %cst_279 : f32 to vector<16x128xf32>
    %573 = arith.select %570, %571, %572 : vector<16x128xi1>, vector<16x128xf32>
    %cst_280 = arith.constant dense<0.000000e+00> : vector<128xf32>
    %574 = vector.multi_reduction <add>, %573, %cst_280 [0] : vector<16x128xf32> to vector<128xf32>
    %575 = vector.shape_cast %574 : vector<128xf32> to vector<1x128xf32>
    %c0_281 = arith.constant 0 : index
    %c24 = arith.constant 24 : index
    %c0_282 = arith.constant 0 : index
    %576 = vector.load %arg5[%c0_281, %c24, %c0_282] : memref<1x64x128xf32, #tpu.memory_space<vmem>>, vector<1x1x128xf32>
    %577 = vector.shape_cast %576 : vector<1x1x128xf32> to vector<1x128xf32>
    %578 = arith.addf %577, %575 : vector<1x128xf32>
    %c0_283 = arith.constant 0 : index
    %c24_284 = arith.constant 24 : index
    %c0_285 = arith.constant 0 : index
    %579 = vector.load %arg5[%c0_283, %c24_284, %c0_285] : memref<1x64x128xf32, #tpu.memory_space<vmem>>, vector<1x1x128xf32>
    %580 = vector.shape_cast %579 : vector<1x1x128xf32> to vector<1x128xf32>
    %581 = vector.shape_cast %578 : vector<1x128xf32> to vector<1x1x128xf32>
    tpu.vector_store %arg5[%c0_283, %c24_284, %c0_285], %581 {strides = array<i32>} : memref<1x64x128xf32, #tpu.memory_space<vmem>>, vector<1x1x128xf32>,
    %582 = vector.broadcast %64 : f32 to vector<16x128xf32>
    %583 = arith.cmpf ogt, %501, %582 : vector<16x128xf32>
    %584 = vector.broadcast %66 : f32 to vector<16x128xf32>
    %585 = arith.cmpf olt, %501, %584 : vector<16x128xf32>
    %586 = arith.andi %583, %585 : vector<16x128xi1>
    %cst_286 = arith.constant 1.000000e+00 : f32
    %cst_287 = arith.constant 0.000000e+00 : f32
    %587 = vector.broadcast %cst_286 : f32 to vector<16x128xf32>
    %588 = vector.broadcast %cst_287 : f32 to vector<16x128xf32>
    %589 = arith.select %586, %587, %588 : vector<16x128xi1>, vector<16x128xf32>
    %cst_288 = arith.constant dense<0.000000e+00> : vector<128xf32>
    %590 = vector.multi_reduction <add>, %589, %cst_288 [0] : vector<16x128xf32> to vector<128xf32>
    %591 = vector.shape_cast %590 : vector<128xf32> to vector<1x128xf32>
    %c0_289 = arith.constant 0 : index
    %c25 = arith.constant 25 : index
    %c0_290 = arith.constant 0 : index
    %592 = vector.load %arg5[%c0_289, %c25, %c0_290] : memref<1x64x128xf32, #tpu.memory_space<vmem>>, vector<1x1x128xf32>
    %593 = vector.shape_cast %592 : vector<1x1x128xf32> to vector<1x128xf32>
    %594 = arith.addf %593, %591 : vector<1x128xf32>
    %c0_291 = arith.constant 0 : index
    %c25_292 = arith.constant 25 : index
    %c0_293 = arith.constant 0 : index
    %595 = vector.load %arg5[%c0_291, %c25_292, %c0_293] : memref<1x64x128xf32, #tpu.memory_space<vmem>>, vector<1x1x128xf32>
    %596 = vector.shape_cast %595 : vector<1x1x128xf32> to vector<1x128xf32>
    %597 = vector.shape_cast %594 : vector<1x128xf32> to vector<1x1x128xf32>
    tpu.vector_store %arg5[%c0_291, %c25_292, %c0_293], %597 {strides = array<i32>} : memref<1x64x128xf32, #tpu.memory_space<vmem>>, vector<1x1x128xf32>,
    %598 = vector.broadcast %66 : f32 to vector<16x128xf32>
    %599 = arith.cmpf ogt, %501, %598 : vector<16x128xf32>
    %600 = vector.broadcast %68 : f32 to vector<16x128xf32>
    %601 = arith.cmpf olt, %501, %600 : vector<16x128xf32>
    %602 = arith.andi %599, %601 : vector<16x128xi1>
    %cst_294 = arith.constant 1.000000e+00 : f32
    %cst_295 = arith.constant 0.000000e+00 : f32
    %603 = vector.broadcast %cst_294 : f32 to vector<16x128xf32>
    %604 = vector.broadcast %cst_295 : f32 to vector<16x128xf32>
    %605 = arith.select %602, %603, %604 : vector<16x128xi1>, vector<16x128xf32>
    %cst_296 = arith.constant dense<0.000000e+00> : vector<128xf32>
    %606 = vector.multi_reduction <add>, %605, %cst_296 [0] : vector<16x128xf32> to vector<128xf32>
    %607 = vector.shape_cast %606 : vector<128xf32> to vector<1x128xf32>
    %c0_297 = arith.constant 0 : index
    %c26 = arith.constant 26 : index
    %c0_298 = arith.constant 0 : index
    %608 = vector.load %arg5[%c0_297, %c26, %c0_298] : memref<1x64x128xf32, #tpu.memory_space<vmem>>, vector<1x1x128xf32>
    %609 = vector.shape_cast %608 : vector<1x1x128xf32> to vector<1x128xf32>
    %610 = arith.addf %609, %607 : vector<1x128xf32>
    %c0_299 = arith.constant 0 : index
    %c26_300 = arith.constant 26 : index
    %c0_301 = arith.constant 0 : index
    %611 = vector.load %arg5[%c0_299, %c26_300, %c0_301] : memref<1x64x128xf32, #tpu.memory_space<vmem>>, vector<1x1x128xf32>
    %612 = vector.shape_cast %611 : vector<1x1x128xf32> to vector<1x128xf32>
    %613 = vector.shape_cast %610 : vector<1x128xf32> to vector<1x1x128xf32>
    tpu.vector_store %arg5[%c0_299, %c26_300, %c0_301], %613 {strides = array<i32>} : memref<1x64x128xf32, #tpu.memory_space<vmem>>, vector<1x1x128xf32>,
    %614 = vector.broadcast %68 : f32 to vector<16x128xf32>
    %615 = arith.cmpf ogt, %501, %614 : vector<16x128xf32>
    %616 = vector.broadcast %70 : f32 to vector<16x128xf32>
    %617 = arith.cmpf olt, %501, %616 : vector<16x128xf32>
    %618 = arith.andi %615, %617 : vector<16x128xi1>
    %cst_302 = arith.constant 1.000000e+00 : f32
    %cst_303 = arith.constant 0.000000e+00 : f32
    %619 = vector.broadcast %cst_302 : f32 to vector<16x128xf32>
    %620 = vector.broadcast %cst_303 : f32 to vector<16x128xf32>
    %621 = arith.select %618, %619, %620 : vector<16x128xi1>, vector<16x128xf32>
    %cst_304 = arith.constant dense<0.000000e+00> : vector<128xf32>
    %622 = vector.multi_reduction <add>, %621, %cst_304 [0] : vector<16x128xf32> to vector<128xf32>
    %623 = vector.shape_cast %622 : vector<128xf32> to vector<1x128xf32>
    %c0_305 = arith.constant 0 : index
    %c27 = arith.constant 27 : index
    %c0_306 = arith.constant 0 : index
    %624 = vector.load %arg5[%c0_305, %c27, %c0_306] : memref<1x64x128xf32, #tpu.memory_space<vmem>>, vector<1x1x128xf32>
    %625 = vector.shape_cast %624 : vector<1x1x128xf32> to vector<1x128xf32>
    %626 = arith.addf %625, %623 : vector<1x128xf32>
    %c0_307 = arith.constant 0 : index
    %c27_308 = arith.constant 27 : index
    %c0_309 = arith.constant 0 : index
    %627 = vector.load %arg5[%c0_307, %c27_308, %c0_309] : memref<1x64x128xf32, #tpu.memory_space<vmem>>, vector<1x1x128xf32>
    %628 = vector.shape_cast %627 : vector<1x1x128xf32> to vector<1x128xf32>
    %629 = vector.shape_cast %626 : vector<1x128xf32> to vector<1x1x128xf32>
    tpu.vector_store %arg5[%c0_307, %c27_308, %c0_309], %629 {strides = array<i32>} : memref<1x64x128xf32, #tpu.memory_space<vmem>>, vector<1x1x128xf32>,
    %630 = vector.broadcast %70 : f32 to vector<16x128xf32>
    %631 = arith.cmpf ogt, %501, %630 : vector<16x128xf32>
    %632 = vector.broadcast %72 : f32 to vector<16x128xf32>
    %633 = arith.cmpf olt, %501, %632 : vector<16x128xf32>
    %634 = arith.andi %631, %633 : vector<16x128xi1>
    %cst_310 = arith.constant 1.000000e+00 : f32
    %cst_311 = arith.constant 0.000000e+00 : f32
    %635 = vector.broadcast %cst_310 : f32 to vector<16x128xf32>
    %636 = vector.broadcast %cst_311 : f32 to vector<16x128xf32>
    %637 = arith.select %634, %635, %636 : vector<16x128xi1>, vector<16x128xf32>
    %cst_312 = arith.constant dense<0.000000e+00> : vector<128xf32>
    %638 = vector.multi_reduction <add>, %637, %cst_312 [0] : vector<16x128xf32> to vector<128xf32>
    %639 = vector.shape_cast %638 : vector<128xf32> to vector<1x128xf32>
    %c0_313 = arith.constant 0 : index
    %c28 = arith.constant 28 : index
    %c0_314 = arith.constant 0 : index
    %640 = vector.load %arg5[%c0_313, %c28, %c0_314] : memref<1x64x128xf32, #tpu.memory_space<vmem>>, vector<1x1x128xf32>
    %641 = vector.shape_cast %640 : vector<1x1x128xf32> to vector<1x128xf32>
    %642 = arith.addf %641, %639 : vector<1x128xf32>
    %c0_315 = arith.constant 0 : index
    %c28_316 = arith.constant 28 : index
    %c0_317 = arith.constant 0 : index
    %643 = vector.load %arg5[%c0_315, %c28_316, %c0_317] : memref<1x64x128xf32, #tpu.memory_space<vmem>>, vector<1x1x128xf32>
    %644 = vector.shape_cast %643 : vector<1x1x128xf32> to vector<1x128xf32>
    %645 = vector.shape_cast %642 : vector<1x128xf32> to vector<1x1x128xf32>
    tpu.vector_store %arg5[%c0_315, %c28_316, %c0_317], %645 {strides = array<i32>} : memref<1x64x128xf32, #tpu.memory_space<vmem>>, vector<1x1x128xf32>,
    %646 = vector.broadcast %72 : f32 to vector<16x128xf32>
    %647 = arith.cmpf ogt, %501, %646 : vector<16x128xf32>
    %648 = vector.broadcast %74 : f32 to vector<16x128xf32>
    %649 = arith.cmpf olt, %501, %648 : vector<16x128xf32>
    %650 = arith.andi %647, %649 : vector<16x128xi1>
    %cst_318 = arith.constant 1.000000e+00 : f32
    %cst_319 = arith.constant 0.000000e+00 : f32
    %651 = vector.broadcast %cst_318 : f32 to vector<16x128xf32>
    %652 = vector.broadcast %cst_319 : f32 to vector<16x128xf32>
    %653 = arith.select %650, %651, %652 : vector<16x128xi1>, vector<16x128xf32>
    %cst_320 = arith.constant dense<0.000000e+00> : vector<128xf32>
    %654 = vector.multi_reduction <add>, %653, %cst_320 [0] : vector<16x128xf32> to vector<128xf32>
    %655 = vector.shape_cast %654 : vector<128xf32> to vector<1x128xf32>
    %c0_321 = arith.constant 0 : index
    %c29 = arith.constant 29 : index
    %c0_322 = arith.constant 0 : index
    %656 = vector.load %arg5[%c0_321, %c29, %c0_322] : memref<1x64x128xf32, #tpu.memory_space<vmem>>, vector<1x1x128xf32>
    %657 = vector.shape_cast %656 : vector<1x1x128xf32> to vector<1x128xf32>
    %658 = arith.addf %657, %655 : vector<1x128xf32>
    %c0_323 = arith.constant 0 : index
    %c29_324 = arith.constant 29 : index
    %c0_325 = arith.constant 0 : index
    %659 = vector.load %arg5[%c0_323, %c29_324, %c0_325] : memref<1x64x128xf32, #tpu.memory_space<vmem>>, vector<1x1x128xf32>
    %660 = vector.shape_cast %659 : vector<1x1x128xf32> to vector<1x128xf32>
    %661 = vector.shape_cast %658 : vector<1x128xf32> to vector<1x1x128xf32>
    tpu.vector_store %arg5[%c0_323, %c29_324, %c0_325], %661 {strides = array<i32>} : memref<1x64x128xf32, #tpu.memory_space<vmem>>, vector<1x1x128xf32>,
    %662 = vector.broadcast %75 : f32 to vector<16x128xf32>
    %663 = arith.select %157, %175, %662 : vector<16x128xi1>, vector<16x128xf32>
    %664 = vector.broadcast %78 : f32 to vector<16x128xf32>
    %665 = arith.cmpf ogt, %663, %664 : vector<16x128xf32>
    %666 = vector.broadcast %80 : f32 to vector<16x128xf32>
    %667 = arith.cmpf olt, %663, %666 : vector<16x128xf32>
    %668 = arith.andi %665, %667 : vector<16x128xi1>
    %cst_326 = arith.constant 1.000000e+00 : f32
    %cst_327 = arith.constant 0.000000e+00 : f32
    %669 = vector.broadcast %cst_326 : f32 to vector<16x128xf32>
    %670 = vector.broadcast %cst_327 : f32 to vector<16x128xf32>
    %671 = arith.select %668, %669, %670 : vector<16x128xi1>, vector<16x128xf32>
    %cst_328 = arith.constant dense<0.000000e+00> : vector<128xf32>
    %672 = vector.multi_reduction <add>, %671, %cst_328 [0] : vector<16x128xf32> to vector<128xf32>
    %673 = vector.shape_cast %672 : vector<128xf32> to vector<1x128xf32>
    %c0_329 = arith.constant 0 : index
    %c30 = arith.constant 30 : index
    %c0_330 = arith.constant 0 : index
    %674 = vector.load %arg5[%c0_329, %c30, %c0_330] : memref<1x64x128xf32, #tpu.memory_space<vmem>>, vector<1x1x128xf32>
    %675 = vector.shape_cast %674 : vector<1x1x128xf32> to vector<1x128xf32>
    %676 = arith.addf %675, %673 : vector<1x128xf32>
    %c0_331 = arith.constant 0 : index
    %c30_332 = arith.constant 30 : index
    %c0_333 = arith.constant 0 : index
    %677 = vector.load %arg5[%c0_331, %c30_332, %c0_333] : memref<1x64x128xf32, #tpu.memory_space<vmem>>, vector<1x1x128xf32>
    %678 = vector.shape_cast %677 : vector<1x1x128xf32> to vector<1x128xf32>
    %679 = vector.shape_cast %676 : vector<1x128xf32> to vector<1x1x128xf32>
    tpu.vector_store %arg5[%c0_331, %c30_332, %c0_333], %679 {strides = array<i32>} : memref<1x64x128xf32, #tpu.memory_space<vmem>>, vector<1x1x128xf32>,
    %680 = vector.broadcast %80 : f32 to vector<16x128xf32>
    %681 = arith.cmpf ogt, %663, %680 : vector<16x128xf32>
    %682 = vector.broadcast %82 : f32 to vector<16x128xf32>
    %683 = arith.cmpf olt, %663, %682 : vector<16x128xf32>
    %684 = arith.andi %681, %683 : vector<16x128xi1>
    %cst_334 = arith.constant 1.000000e+00 : f32
    %cst_335 = arith.constant 0.000000e+00 : f32
    %685 = vector.broadcast %cst_334 : f32 to vector<16x128xf32>
    %686 = vector.broadcast %cst_335 : f32 to vector<16x128xf32>
    %687 = arith.select %684, %685, %686 : vector<16x128xi1>, vector<16x128xf32>
    %cst_336 = arith.constant dense<0.000000e+00> : vector<128xf32>
    %688 = vector.multi_reduction <add>, %687, %cst_336 [0] : vector<16x128xf32> to vector<128xf32>
    %689 = vector.shape_cast %688 : vector<128xf32> to vector<1x128xf32>
    %c0_337 = arith.constant 0 : index
    %c31 = arith.constant 31 : index
    %c0_338 = arith.constant 0 : index
    %690 = vector.load %arg5[%c0_337, %c31, %c0_338] : memref<1x64x128xf32, #tpu.memory_space<vmem>>, vector<1x1x128xf32>
    %691 = vector.shape_cast %690 : vector<1x1x128xf32> to vector<1x128xf32>
    %692 = arith.addf %691, %689 : vector<1x128xf32>
    %c0_339 = arith.constant 0 : index
    %c31_340 = arith.constant 31 : index
    %c0_341 = arith.constant 0 : index
    %693 = vector.load %arg5[%c0_339, %c31_340, %c0_341] : memref<1x64x128xf32, #tpu.memory_space<vmem>>, vector<1x1x128xf32>
    %694 = vector.shape_cast %693 : vector<1x1x128xf32> to vector<1x128xf32>
    %695 = vector.shape_cast %692 : vector<1x128xf32> to vector<1x1x128xf32>
    tpu.vector_store %arg5[%c0_339, %c31_340, %c0_341], %695 {strides = array<i32>} : memref<1x64x128xf32, #tpu.memory_space<vmem>>, vector<1x1x128xf32>,
    %696 = vector.broadcast %82 : f32 to vector<16x128xf32>
    %697 = arith.cmpf ogt, %663, %696 : vector<16x128xf32>
    %698 = vector.broadcast %84 : f32 to vector<16x128xf32>
    %699 = arith.cmpf olt, %663, %698 : vector<16x128xf32>
    %700 = arith.andi %697, %699 : vector<16x128xi1>
    %cst_342 = arith.constant 1.000000e+00 : f32
    %cst_343 = arith.constant 0.000000e+00 : f32
    %701 = vector.broadcast %cst_342 : f32 to vector<16x128xf32>
    %702 = vector.broadcast %cst_343 : f32 to vector<16x128xf32>
    %703 = arith.select %700, %701, %702 : vector<16x128xi1>, vector<16x128xf32>
    %cst_344 = arith.constant dense<0.000000e+00> : vector<128xf32>
    %704 = vector.multi_reduction <add>, %703, %cst_344 [0] : vector<16x128xf32> to vector<128xf32>
    %705 = vector.shape_cast %704 : vector<128xf32> to vector<1x128xf32>
    %c0_345 = arith.constant 0 : index
    %c32 = arith.constant 32 : index
    %c0_346 = arith.constant 0 : index
    %706 = vector.load %arg5[%c0_345, %c32, %c0_346] : memref<1x64x128xf32, #tpu.memory_space<vmem>>, vector<1x1x128xf32>
    %707 = vector.shape_cast %706 : vector<1x1x128xf32> to vector<1x128xf32>
    %708 = arith.addf %707, %705 : vector<1x128xf32>
    %c0_347 = arith.constant 0 : index
    %c32_348 = arith.constant 32 : index
    %c0_349 = arith.constant 0 : index
    %709 = vector.load %arg5[%c0_347, %c32_348, %c0_349] : memref<1x64x128xf32, #tpu.memory_space<vmem>>, vector<1x1x128xf32>
    %710 = vector.shape_cast %709 : vector<1x1x128xf32> to vector<1x128xf32>
    %711 = vector.shape_cast %708 : vector<1x128xf32> to vector<1x1x128xf32>
    tpu.vector_store %arg5[%c0_347, %c32_348, %c0_349], %711 {strides = array<i32>} : memref<1x64x128xf32, #tpu.memory_space<vmem>>, vector<1x1x128xf32>,
    %712 = vector.broadcast %84 : f32 to vector<16x128xf32>
    %713 = arith.cmpf ogt, %663, %712 : vector<16x128xf32>
    %714 = vector.broadcast %86 : f32 to vector<16x128xf32>
    %715 = arith.cmpf olt, %663, %714 : vector<16x128xf32>
    %716 = arith.andi %713, %715 : vector<16x128xi1>
    %cst_350 = arith.constant 1.000000e+00 : f32
    %cst_351 = arith.constant 0.000000e+00 : f32
    %717 = vector.broadcast %cst_350 : f32 to vector<16x128xf32>
    %718 = vector.broadcast %cst_351 : f32 to vector<16x128xf32>
    %719 = arith.select %716, %717, %718 : vector<16x128xi1>, vector<16x128xf32>
    %cst_352 = arith.constant dense<0.000000e+00> : vector<128xf32>
    %720 = vector.multi_reduction <add>, %719, %cst_352 [0] : vector<16x128xf32> to vector<128xf32>
    %721 = vector.shape_cast %720 : vector<128xf32> to vector<1x128xf32>
    %c0_353 = arith.constant 0 : index
    %c33 = arith.constant 33 : index
    %c0_354 = arith.constant 0 : index
    %722 = vector.load %arg5[%c0_353, %c33, %c0_354] : memref<1x64x128xf32, #tpu.memory_space<vmem>>, vector<1x1x128xf32>
    %723 = vector.shape_cast %722 : vector<1x1x128xf32> to vector<1x128xf32>
    %724 = arith.addf %723, %721 : vector<1x128xf32>
    %c0_355 = arith.constant 0 : index
    %c33_356 = arith.constant 33 : index
    %c0_357 = arith.constant 0 : index
    %725 = vector.load %arg5[%c0_355, %c33_356, %c0_357] : memref<1x64x128xf32, #tpu.memory_space<vmem>>, vector<1x1x128xf32>
    %726 = vector.shape_cast %725 : vector<1x1x128xf32> to vector<1x128xf32>
    %727 = vector.shape_cast %724 : vector<1x128xf32> to vector<1x1x128xf32>
    tpu.vector_store %arg5[%c0_355, %c33_356, %c0_357], %727 {strides = array<i32>} : memref<1x64x128xf32, #tpu.memory_space<vmem>>, vector<1x1x128xf32>,
    %728 = vector.broadcast %86 : f32 to vector<16x128xf32>
    %729 = arith.cmpf ogt, %663, %728 : vector<16x128xf32>
    %730 = vector.broadcast %88 : f32 to vector<16x128xf32>
    %731 = arith.cmpf olt, %663, %730 : vector<16x128xf32>
    %732 = arith.andi %729, %731 : vector<16x128xi1>
    %cst_358 = arith.constant 1.000000e+00 : f32
    %cst_359 = arith.constant 0.000000e+00 : f32
    %733 = vector.broadcast %cst_358 : f32 to vector<16x128xf32>
    %734 = vector.broadcast %cst_359 : f32 to vector<16x128xf32>
    %735 = arith.select %732, %733, %734 : vector<16x128xi1>, vector<16x128xf32>
    %cst_360 = arith.constant dense<0.000000e+00> : vector<128xf32>
    %736 = vector.multi_reduction <add>, %735, %cst_360 [0] : vector<16x128xf32> to vector<128xf32>
    %737 = vector.shape_cast %736 : vector<128xf32> to vector<1x128xf32>
    %c0_361 = arith.constant 0 : index
    %c34 = arith.constant 34 : index
    %c0_362 = arith.constant 0 : index
    %738 = vector.load %arg5[%c0_361, %c34, %c0_362] : memref<1x64x128xf32, #tpu.memory_space<vmem>>, vector<1x1x128xf32>
    %739 = vector.shape_cast %738 : vector<1x1x128xf32> to vector<1x128xf32>
    %740 = arith.addf %739, %737 : vector<1x128xf32>
    %c0_363 = arith.constant 0 : index
    %c34_364 = arith.constant 34 : index
    %c0_365 = arith.constant 0 : index
    %741 = vector.load %arg5[%c0_363, %c34_364, %c0_365] : memref<1x64x128xf32, #tpu.memory_space<vmem>>, vector<1x1x128xf32>
    %742 = vector.shape_cast %741 : vector<1x1x128xf32> to vector<1x128xf32>
    %743 = vector.shape_cast %740 : vector<1x128xf32> to vector<1x1x128xf32>
    tpu.vector_store %arg5[%c0_363, %c34_364, %c0_365], %743 {strides = array<i32>} : memref<1x64x128xf32, #tpu.memory_space<vmem>>, vector<1x1x128xf32>,
    %744 = vector.broadcast %88 : f32 to vector<16x128xf32>
    %745 = arith.cmpf ogt, %663, %744 : vector<16x128xf32>
    %746 = vector.broadcast %90 : f32 to vector<16x128xf32>
    %747 = arith.cmpf olt, %663, %746 : vector<16x128xf32>
    %748 = arith.andi %745, %747 : vector<16x128xi1>
    %cst_366 = arith.constant 1.000000e+00 : f32
    %cst_367 = arith.constant 0.000000e+00 : f32
    %749 = vector.broadcast %cst_366 : f32 to vector<16x128xf32>
    %750 = vector.broadcast %cst_367 : f32 to vector<16x128xf32>
    %751 = arith.select %748, %749, %750 : vector<16x128xi1>, vector<16x128xf32>
    %cst_368 = arith.constant dense<0.000000e+00> : vector<128xf32>
    %752 = vector.multi_reduction <add>, %751, %cst_368 [0] : vector<16x128xf32> to vector<128xf32>
    %753 = vector.shape_cast %752 : vector<128xf32> to vector<1x128xf32>
    %c0_369 = arith.constant 0 : index
    %c35 = arith.constant 35 : index
    %c0_370 = arith.constant 0 : index
    %754 = vector.load %arg5[%c0_369, %c35, %c0_370] : memref<1x64x128xf32, #tpu.memory_space<vmem>>, vector<1x1x128xf32>
    %755 = vector.shape_cast %754 : vector<1x1x128xf32> to vector<1x128xf32>
    %756 = arith.addf %755, %753 : vector<1x128xf32>
    %c0_371 = arith.constant 0 : index
    %c35_372 = arith.constant 35 : index
    %c0_373 = arith.constant 0 : index
    %757 = vector.load %arg5[%c0_371, %c35_372, %c0_373] : memref<1x64x128xf32, #tpu.memory_space<vmem>>, vector<1x1x128xf32>
    %758 = vector.shape_cast %757 : vector<1x1x128xf32> to vector<1x128xf32>
    %759 = vector.shape_cast %756 : vector<1x128xf32> to vector<1x1x128xf32>
    tpu.vector_store %arg5[%c0_371, %c35_372, %c0_373], %759 {strides = array<i32>} : memref<1x64x128xf32, #tpu.memory_space<vmem>>, vector<1x1x128xf32>,
    %760 = vector.broadcast %90 : f32 to vector<16x128xf32>
    %761 = arith.cmpf ogt, %663, %760 : vector<16x128xf32>
    %762 = vector.broadcast %92 : f32 to vector<16x128xf32>
    %763 = arith.cmpf olt, %663, %762 : vector<16x128xf32>
    %764 = arith.andi %761, %763 : vector<16x128xi1>
    %cst_374 = arith.constant 1.000000e+00 : f32
    %cst_375 = arith.constant 0.000000e+00 : f32
    %765 = vector.broadcast %cst_374 : f32 to vector<16x128xf32>
    %766 = vector.broadcast %cst_375 : f32 to vector<16x128xf32>
    %767 = arith.select %764, %765, %766 : vector<16x128xi1>, vector<16x128xf32>
    %cst_376 = arith.constant dense<0.000000e+00> : vector<128xf32>
    %768 = vector.multi_reduction <add>, %767, %cst_376 [0] : vector<16x128xf32> to vector<128xf32>
    %769 = vector.shape_cast %768 : vector<128xf32> to vector<1x128xf32>
    %c0_377 = arith.constant 0 : index
    %c36 = arith.constant 36 : index
    %c0_378 = arith.constant 0 : index
    %770 = vector.load %arg5[%c0_377, %c36, %c0_378] : memref<1x64x128xf32, #tpu.memory_space<vmem>>, vector<1x1x128xf32>
    %771 = vector.shape_cast %770 : vector<1x1x128xf32> to vector<1x128xf32>
    %772 = arith.addf %771, %769 : vector<1x128xf32>
    %c0_379 = arith.constant 0 : index
    %c36_380 = arith.constant 36 : index
    %c0_381 = arith.constant 0 : index
    %773 = vector.load %arg5[%c0_379, %c36_380, %c0_381] : memref<1x64x128xf32, #tpu.memory_space<vmem>>, vector<1x1x128xf32>
    %774 = vector.shape_cast %773 : vector<1x1x128xf32> to vector<1x128xf32>
    %775 = vector.shape_cast %772 : vector<1x128xf32> to vector<1x1x128xf32>
    tpu.vector_store %arg5[%c0_379, %c36_380, %c0_381], %775 {strides = array<i32>} : memref<1x64x128xf32, #tpu.memory_space<vmem>>, vector<1x1x128xf32>,
    %776 = vector.broadcast %92 : f32 to vector<16x128xf32>
    %777 = arith.cmpf ogt, %663, %776 : vector<16x128xf32>
    %778 = vector.broadcast %94 : f32 to vector<16x128xf32>
    %779 = arith.cmpf olt, %663, %778 : vector<16x128xf32>
    %780 = arith.andi %777, %779 : vector<16x128xi1>
    %cst_382 = arith.constant 1.000000e+00 : f32
    %cst_383 = arith.constant 0.000000e+00 : f32
    %781 = vector.broadcast %cst_382 : f32 to vector<16x128xf32>
    %782 = vector.broadcast %cst_383 : f32 to vector<16x128xf32>
    %783 = arith.select %780, %781, %782 : vector<16x128xi1>, vector<16x128xf32>
    %cst_384 = arith.constant dense<0.000000e+00> : vector<128xf32>
    %784 = vector.multi_reduction <add>, %783, %cst_384 [0] : vector<16x128xf32> to vector<128xf32>
    %785 = vector.shape_cast %784 : vector<128xf32> to vector<1x128xf32>
    %c0_385 = arith.constant 0 : index
    %c37 = arith.constant 37 : index
    %c0_386 = arith.constant 0 : index
    %786 = vector.load %arg5[%c0_385, %c37, %c0_386] : memref<1x64x128xf32, #tpu.memory_space<vmem>>, vector<1x1x128xf32>
    %787 = vector.shape_cast %786 : vector<1x1x128xf32> to vector<1x128xf32>
    %788 = arith.addf %787, %785 : vector<1x128xf32>
    %c0_387 = arith.constant 0 : index
    %c37_388 = arith.constant 37 : index
    %c0_389 = arith.constant 0 : index
    %789 = vector.load %arg5[%c0_387, %c37_388, %c0_389] : memref<1x64x128xf32, #tpu.memory_space<vmem>>, vector<1x1x128xf32>
    %790 = vector.shape_cast %789 : vector<1x1x128xf32> to vector<1x128xf32>
    %791 = vector.shape_cast %788 : vector<1x128xf32> to vector<1x1x128xf32>
    tpu.vector_store %arg5[%c0_387, %c37_388, %c0_389], %791 {strides = array<i32>} : memref<1x64x128xf32, #tpu.memory_space<vmem>>, vector<1x1x128xf32>,
    %792 = vector.broadcast %94 : f32 to vector<16x128xf32>
    %793 = arith.cmpf ogt, %663, %792 : vector<16x128xf32>
    %794 = vector.broadcast %96 : f32 to vector<16x128xf32>
    %795 = arith.cmpf olt, %663, %794 : vector<16x128xf32>
    %796 = arith.andi %793, %795 : vector<16x128xi1>
    %cst_390 = arith.constant 1.000000e+00 : f32
    %cst_391 = arith.constant 0.000000e+00 : f32
    %797 = vector.broadcast %cst_390 : f32 to vector<16x128xf32>
    %798 = vector.broadcast %cst_391 : f32 to vector<16x128xf32>
    %799 = arith.select %796, %797, %798 : vector<16x128xi1>, vector<16x128xf32>
    %cst_392 = arith.constant dense<0.000000e+00> : vector<128xf32>
    %800 = vector.multi_reduction <add>, %799, %cst_392 [0] : vector<16x128xf32> to vector<128xf32>
    %801 = vector.shape_cast %800 : vector<128xf32> to vector<1x128xf32>
    %c0_393 = arith.constant 0 : index
    %c38 = arith.constant 38 : index
    %c0_394 = arith.constant 0 : index
    %802 = vector.load %arg5[%c0_393, %c38, %c0_394] : memref<1x64x128xf32, #tpu.memory_space<vmem>>, vector<1x1x128xf32>
    %803 = vector.shape_cast %802 : vector<1x1x128xf32> to vector<1x128xf32>
    %804 = arith.addf %803, %801 : vector<1x128xf32>
    %c0_395 = arith.constant 0 : index
    %c38_396 = arith.constant 38 : index
    %c0_397 = arith.constant 0 : index
    %805 = vector.load %arg5[%c0_395, %c38_396, %c0_397] : memref<1x64x128xf32, #tpu.memory_space<vmem>>, vector<1x1x128xf32>
    %806 = vector.shape_cast %805 : vector<1x1x128xf32> to vector<1x128xf32>
    %807 = vector.shape_cast %804 : vector<1x128xf32> to vector<1x1x128xf32>
    tpu.vector_store %arg5[%c0_395, %c38_396, %c0_397], %807 {strides = array<i32>} : memref<1x64x128xf32, #tpu.memory_space<vmem>>, vector<1x1x128xf32>,
    %808 = vector.broadcast %96 : f32 to vector<16x128xf32>
    %809 = arith.cmpf ogt, %663, %808 : vector<16x128xf32>
    %810 = vector.broadcast %98 : f32 to vector<16x128xf32>
    %811 = arith.cmpf olt, %663, %810 : vector<16x128xf32>
    %812 = arith.andi %809, %811 : vector<16x128xi1>
    %cst_398 = arith.constant 1.000000e+00 : f32
    %cst_399 = arith.constant 0.000000e+00 : f32
    %813 = vector.broadcast %cst_398 : f32 to vector<16x128xf32>
    %814 = vector.broadcast %cst_399 : f32 to vector<16x128xf32>
    %815 = arith.select %812, %813, %814 : vector<16x128xi1>, vector<16x128xf32>
    %cst_400 = arith.constant dense<0.000000e+00> : vector<128xf32>
    %816 = vector.multi_reduction <add>, %815, %cst_400 [0] : vector<16x128xf32> to vector<128xf32>
    %817 = vector.shape_cast %816 : vector<128xf32> to vector<1x128xf32>
    %c0_401 = arith.constant 0 : index
    %c39 = arith.constant 39 : index
    %c0_402 = arith.constant 0 : index
    %818 = vector.load %arg5[%c0_401, %c39, %c0_402] : memref<1x64x128xf32, #tpu.memory_space<vmem>>, vector<1x1x128xf32>
    %819 = vector.shape_cast %818 : vector<1x1x128xf32> to vector<1x128xf32>
    %820 = arith.addf %819, %817 : vector<1x128xf32>
    %c0_403 = arith.constant 0 : index
    %c39_404 = arith.constant 39 : index
    %c0_405 = arith.constant 0 : index
    %821 = vector.load %arg5[%c0_403, %c39_404, %c0_405] : memref<1x64x128xf32, #tpu.memory_space<vmem>>, vector<1x1x128xf32>
    %822 = vector.shape_cast %821 : vector<1x1x128xf32> to vector<1x128xf32>
    %823 = vector.shape_cast %820 : vector<1x128xf32> to vector<1x1x128xf32>
    tpu.vector_store %arg5[%c0_403, %c39_404, %c0_405], %823 {strides = array<i32>} : memref<1x64x128xf32, #tpu.memory_space<vmem>>, vector<1x1x128xf32>,
    %824 = vector.broadcast %99 : f32 to vector<16x128xf32>
    %825 = arith.select %147, %127, %824 : vector<16x128xi1>, vector<16x128xf32>
    %826 = vector.broadcast %102 : f32 to vector<16x128xf32>
    %827 = arith.cmpf ogt, %825, %826 : vector<16x128xf32>
    %828 = vector.broadcast %104 : f32 to vector<16x128xf32>
    %829 = arith.cmpf olt, %825, %828 : vector<16x128xf32>
    %830 = arith.andi %827, %829 : vector<16x128xi1>
    %cst_406 = arith.constant 1.000000e+00 : f32
    %cst_407 = arith.constant 0.000000e+00 : f32
    %831 = vector.broadcast %cst_406 : f32 to vector<16x128xf32>
    %832 = vector.broadcast %cst_407 : f32 to vector<16x128xf32>
    %833 = arith.select %830, %831, %832 : vector<16x128xi1>, vector<16x128xf32>
    %cst_408 = arith.constant dense<0.000000e+00> : vector<128xf32>
    %834 = vector.multi_reduction <add>, %833, %cst_408 [0] : vector<16x128xf32> to vector<128xf32>
    %835 = vector.shape_cast %834 : vector<128xf32> to vector<1x128xf32>
    %c0_409 = arith.constant 0 : index
    %c40 = arith.constant 40 : index
    %c0_410 = arith.constant 0 : index
    %836 = vector.load %arg5[%c0_409, %c40, %c0_410] : memref<1x64x128xf32, #tpu.memory_space<vmem>>, vector<1x1x128xf32>
    %837 = vector.shape_cast %836 : vector<1x1x128xf32> to vector<1x128xf32>
    %838 = arith.addf %837, %835 : vector<1x128xf32>
    %c0_411 = arith.constant 0 : index
    %c40_412 = arith.constant 40 : index
    %c0_413 = arith.constant 0 : index
    %839 = vector.load %arg5[%c0_411, %c40_412, %c0_413] : memref<1x64x128xf32, #tpu.memory_space<vmem>>, vector<1x1x128xf32>
    %840 = vector.shape_cast %839 : vector<1x1x128xf32> to vector<1x128xf32>
    %841 = vector.shape_cast %838 : vector<1x128xf32> to vector<1x1x128xf32>
    tpu.vector_store %arg5[%c0_411, %c40_412, %c0_413], %841 {strides = array<i32>} : memref<1x64x128xf32, #tpu.memory_space<vmem>>, vector<1x1x128xf32>,
    %842 = vector.broadcast %104 : f32 to vector<16x128xf32>
    %843 = arith.cmpf ogt, %825, %842 : vector<16x128xf32>
    %844 = vector.broadcast %106 : f32 to vector<16x128xf32>
    %845 = arith.cmpf olt, %825, %844 : vector<16x128xf32>
    %846 = arith.andi %843, %845 : vector<16x128xi1>
    %cst_414 = arith.constant 1.000000e+00 : f32
    %cst_415 = arith.constant 0.000000e+00 : f32
    %847 = vector.broadcast %cst_414 : f32 to vector<16x128xf32>
    %848 = vector.broadcast %cst_415 : f32 to vector<16x128xf32>
    %849 = arith.select %846, %847, %848 : vector<16x128xi1>, vector<16x128xf32>
    %cst_416 = arith.constant dense<0.000000e+00> : vector<128xf32>
    %850 = vector.multi_reduction <add>, %849, %cst_416 [0] : vector<16x128xf32> to vector<128xf32>
    %851 = vector.shape_cast %850 : vector<128xf32> to vector<1x128xf32>
    %c0_417 = arith.constant 0 : index
    %c41 = arith.constant 41 : index
    %c0_418 = arith.constant 0 : index
    %852 = vector.load %arg5[%c0_417, %c41, %c0_418] : memref<1x64x128xf32, #tpu.memory_space<vmem>>, vector<1x1x128xf32>
    %853 = vector.shape_cast %852 : vector<1x1x128xf32> to vector<1x128xf32>
    %854 = arith.addf %853, %851 : vector<1x128xf32>
    %c0_419 = arith.constant 0 : index
    %c41_420 = arith.constant 41 : index
    %c0_421 = arith.constant 0 : index
    %855 = vector.load %arg5[%c0_419, %c41_420, %c0_421] : memref<1x64x128xf32, #tpu.memory_space<vmem>>, vector<1x1x128xf32>
    %856 = vector.shape_cast %855 : vector<1x1x128xf32> to vector<1x128xf32>
    %857 = vector.shape_cast %854 : vector<1x128xf32> to vector<1x1x128xf32>
    tpu.vector_store %arg5[%c0_419, %c41_420, %c0_421], %857 {strides = array<i32>} : memref<1x64x128xf32, #tpu.memory_space<vmem>>, vector<1x1x128xf32>,
    %858 = vector.broadcast %106 : f32 to vector<16x128xf32>
    %859 = arith.cmpf ogt, %825, %858 : vector<16x128xf32>
    %860 = vector.broadcast %108 : f32 to vector<16x128xf32>
    %861 = arith.cmpf olt, %825, %860 : vector<16x128xf32>
    %862 = arith.andi %859, %861 : vector<16x128xi1>
    %cst_422 = arith.constant 1.000000e+00 : f32
    %cst_423 = arith.constant 0.000000e+00 : f32
    %863 = vector.broadcast %cst_422 : f32 to vector<16x128xf32>
    %864 = vector.broadcast %cst_423 : f32 to vector<16x128xf32>
    %865 = arith.select %862, %863, %864 : vector<16x128xi1>, vector<16x128xf32>
    %cst_424 = arith.constant dense<0.000000e+00> : vector<128xf32>
    %866 = vector.multi_reduction <add>, %865, %cst_424 [0] : vector<16x128xf32> to vector<128xf32>
    %867 = vector.shape_cast %866 : vector<128xf32> to vector<1x128xf32>
    %c0_425 = arith.constant 0 : index
    %c42 = arith.constant 42 : index
    %c0_426 = arith.constant 0 : index
    %868 = vector.load %arg5[%c0_425, %c42, %c0_426] : memref<1x64x128xf32, #tpu.memory_space<vmem>>, vector<1x1x128xf32>
    %869 = vector.shape_cast %868 : vector<1x1x128xf32> to vector<1x128xf32>
    %870 = arith.addf %869, %867 : vector<1x128xf32>
    %c0_427 = arith.constant 0 : index
    %c42_428 = arith.constant 42 : index
    %c0_429 = arith.constant 0 : index
    %871 = vector.load %arg5[%c0_427, %c42_428, %c0_429] : memref<1x64x128xf32, #tpu.memory_space<vmem>>, vector<1x1x128xf32>
    %872 = vector.shape_cast %871 : vector<1x1x128xf32> to vector<1x128xf32>
    %873 = vector.shape_cast %870 : vector<1x128xf32> to vector<1x1x128xf32>
    tpu.vector_store %arg5[%c0_427, %c42_428, %c0_429], %873 {strides = array<i32>} : memref<1x64x128xf32, #tpu.memory_space<vmem>>, vector<1x1x128xf32>,
    %874 = vector.broadcast %108 : f32 to vector<16x128xf32>
    %875 = arith.cmpf ogt, %825, %874 : vector<16x128xf32>
    %876 = vector.broadcast %110 : f32 to vector<16x128xf32>
    %877 = arith.cmpf olt, %825, %876 : vector<16x128xf32>
    %878 = arith.andi %875, %877 : vector<16x128xi1>
    %cst_430 = arith.constant 1.000000e+00 : f32
    %cst_431 = arith.constant 0.000000e+00 : f32
    %879 = vector.broadcast %cst_430 : f32 to vector<16x128xf32>
    %880 = vector.broadcast %cst_431 : f32 to vector<16x128xf32>
    %881 = arith.select %878, %879, %880 : vector<16x128xi1>, vector<16x128xf32>
    %cst_432 = arith.constant dense<0.000000e+00> : vector<128xf32>
    %882 = vector.multi_reduction <add>, %881, %cst_432 [0] : vector<16x128xf32> to vector<128xf32>
    %883 = vector.shape_cast %882 : vector<128xf32> to vector<1x128xf32>
    %c0_433 = arith.constant 0 : index
    %c43 = arith.constant 43 : index
    %c0_434 = arith.constant 0 : index
    %884 = vector.load %arg5[%c0_433, %c43, %c0_434] : memref<1x64x128xf32, #tpu.memory_space<vmem>>, vector<1x1x128xf32>
    %885 = vector.shape_cast %884 : vector<1x1x128xf32> to vector<1x128xf32>
    %886 = arith.addf %885, %883 : vector<1x128xf32>
    %c0_435 = arith.constant 0 : index
    %c43_436 = arith.constant 43 : index
    %c0_437 = arith.constant 0 : index
    %887 = vector.load %arg5[%c0_435, %c43_436, %c0_437] : memref<1x64x128xf32, #tpu.memory_space<vmem>>, vector<1x1x128xf32>
    %888 = vector.shape_cast %887 : vector<1x1x128xf32> to vector<1x128xf32>
    %889 = vector.shape_cast %886 : vector<1x128xf32> to vector<1x1x128xf32>
    tpu.vector_store %arg5[%c0_435, %c43_436, %c0_437], %889 {strides = array<i32>} : memref<1x64x128xf32, #tpu.memory_space<vmem>>, vector<1x1x128xf32>,
    %890 = vector.broadcast %110 : f32 to vector<16x128xf32>
    %891 = arith.cmpf ogt, %825, %890 : vector<16x128xf32>
    %892 = vector.broadcast %112 : f32 to vector<16x128xf32>
    %893 = arith.cmpf olt, %825, %892 : vector<16x128xf32>
    %894 = arith.andi %891, %893 : vector<16x128xi1>
    %cst_438 = arith.constant 1.000000e+00 : f32
    %cst_439 = arith.constant 0.000000e+00 : f32
    %895 = vector.broadcast %cst_438 : f32 to vector<16x128xf32>
    %896 = vector.broadcast %cst_439 : f32 to vector<16x128xf32>
    %897 = arith.select %894, %895, %896 : vector<16x128xi1>, vector<16x128xf32>
    %cst_440 = arith.constant dense<0.000000e+00> : vector<128xf32>
    %898 = vector.multi_reduction <add>, %897, %cst_440 [0] : vector<16x128xf32> to vector<128xf32>
    %899 = vector.shape_cast %898 : vector<128xf32> to vector<1x128xf32>
    %c0_441 = arith.constant 0 : index
    %c44 = arith.constant 44 : index
    %c0_442 = arith.constant 0 : index
    %900 = vector.load %arg5[%c0_441, %c44, %c0_442] : memref<1x64x128xf32, #tpu.memory_space<vmem>>, vector<1x1x128xf32>
    %901 = vector.shape_cast %900 : vector<1x1x128xf32> to vector<1x128xf32>
    %902 = arith.addf %901, %899 : vector<1x128xf32>
    %c0_443 = arith.constant 0 : index
    %c44_444 = arith.constant 44 : index
    %c0_445 = arith.constant 0 : index
    %903 = vector.load %arg5[%c0_443, %c44_444, %c0_445] : memref<1x64x128xf32, #tpu.memory_space<vmem>>, vector<1x1x128xf32>
    %904 = vector.shape_cast %903 : vector<1x1x128xf32> to vector<1x128xf32>
    %905 = vector.shape_cast %902 : vector<1x128xf32> to vector<1x1x128xf32>
    tpu.vector_store %arg5[%c0_443, %c44_444, %c0_445], %905 {strides = array<i32>} : memref<1x64x128xf32, #tpu.memory_space<vmem>>, vector<1x1x128xf32>,
    %906 = vector.broadcast %112 : f32 to vector<16x128xf32>
    %907 = arith.cmpf ogt, %825, %906 : vector<16x128xf32>
    %908 = vector.broadcast %114 : f32 to vector<16x128xf32>
    %909 = arith.cmpf olt, %825, %908 : vector<16x128xf32>
    %910 = arith.andi %907, %909 : vector<16x128xi1>
    %cst_446 = arith.constant 1.000000e+00 : f32
    %cst_447 = arith.constant 0.000000e+00 : f32
    %911 = vector.broadcast %cst_446 : f32 to vector<16x128xf32>
    %912 = vector.broadcast %cst_447 : f32 to vector<16x128xf32>
    %913 = arith.select %910, %911, %912 : vector<16x128xi1>, vector<16x128xf32>
    %cst_448 = arith.constant dense<0.000000e+00> : vector<128xf32>
    %914 = vector.multi_reduction <add>, %913, %cst_448 [0] : vector<16x128xf32> to vector<128xf32>
    %915 = vector.shape_cast %914 : vector<128xf32> to vector<1x128xf32>
    %c0_449 = arith.constant 0 : index
    %c45 = arith.constant 45 : index
    %c0_450 = arith.constant 0 : index
    %916 = vector.load %arg5[%c0_449, %c45, %c0_450] : memref<1x64x128xf32, #tpu.memory_space<vmem>>, vector<1x1x128xf32>
    %917 = vector.shape_cast %916 : vector<1x1x128xf32> to vector<1x128xf32>
    %918 = arith.addf %917, %915 : vector<1x128xf32>
    %c0_451 = arith.constant 0 : index
    %c45_452 = arith.constant 45 : index
    %c0_453 = arith.constant 0 : index
    %919 = vector.load %arg5[%c0_451, %c45_452, %c0_453] : memref<1x64x128xf32, #tpu.memory_space<vmem>>, vector<1x1x128xf32>
    %920 = vector.shape_cast %919 : vector<1x1x128xf32> to vector<1x128xf32>
    %921 = vector.shape_cast %918 : vector<1x128xf32> to vector<1x1x128xf32>
    tpu.vector_store %arg5[%c0_451, %c45_452, %c0_453], %921 {strides = array<i32>} : memref<1x64x128xf32, #tpu.memory_space<vmem>>, vector<1x1x128xf32>,
    %922 = vector.broadcast %114 : f32 to vector<16x128xf32>
    %923 = arith.cmpf ogt, %825, %922 : vector<16x128xf32>
    %924 = vector.broadcast %116 : f32 to vector<16x128xf32>
    %925 = arith.cmpf olt, %825, %924 : vector<16x128xf32>
    %926 = arith.andi %923, %925 : vector<16x128xi1>
    %cst_454 = arith.constant 1.000000e+00 : f32
    %cst_455 = arith.constant 0.000000e+00 : f32
    %927 = vector.broadcast %cst_454 : f32 to vector<16x128xf32>
    %928 = vector.broadcast %cst_455 : f32 to vector<16x128xf32>
    %929 = arith.select %926, %927, %928 : vector<16x128xi1>, vector<16x128xf32>
    %cst_456 = arith.constant dense<0.000000e+00> : vector<128xf32>
    %930 = vector.multi_reduction <add>, %929, %cst_456 [0] : vector<16x128xf32> to vector<128xf32>
    %931 = vector.shape_cast %930 : vector<128xf32> to vector<1x128xf32>
    %c0_457 = arith.constant 0 : index
    %c46 = arith.constant 46 : index
    %c0_458 = arith.constant 0 : index
    %932 = vector.load %arg5[%c0_457, %c46, %c0_458] : memref<1x64x128xf32, #tpu.memory_space<vmem>>, vector<1x1x128xf32>
    %933 = vector.shape_cast %932 : vector<1x1x128xf32> to vector<1x128xf32>
    %934 = arith.addf %933, %931 : vector<1x128xf32>
    %c0_459 = arith.constant 0 : index
    %c46_460 = arith.constant 46 : index
    %c0_461 = arith.constant 0 : index
    %935 = vector.load %arg5[%c0_459, %c46_460, %c0_461] : memref<1x64x128xf32, #tpu.memory_space<vmem>>, vector<1x1x128xf32>
    %936 = vector.shape_cast %935 : vector<1x1x128xf32> to vector<1x128xf32>
    %937 = vector.shape_cast %934 : vector<1x128xf32> to vector<1x1x128xf32>
    tpu.vector_store %arg5[%c0_459, %c46_460, %c0_461], %937 {strides = array<i32>} : memref<1x64x128xf32, #tpu.memory_space<vmem>>, vector<1x1x128xf32>,
    %938 = vector.broadcast %116 : f32 to vector<16x128xf32>
    %939 = arith.cmpf ogt, %825, %938 : vector<16x128xf32>
    %940 = vector.broadcast %118 : f32 to vector<16x128xf32>
    %941 = arith.cmpf olt, %825, %940 : vector<16x128xf32>
    %942 = arith.andi %939, %941 : vector<16x128xi1>
    %cst_462 = arith.constant 1.000000e+00 : f32
    %cst_463 = arith.constant 0.000000e+00 : f32
    %943 = vector.broadcast %cst_462 : f32 to vector<16x128xf32>
    %944 = vector.broadcast %cst_463 : f32 to vector<16x128xf32>
    %945 = arith.select %942, %943, %944 : vector<16x128xi1>, vector<16x128xf32>
    %cst_464 = arith.constant dense<0.000000e+00> : vector<128xf32>
    %946 = vector.multi_reduction <add>, %945, %cst_464 [0] : vector<16x128xf32> to vector<128xf32>
    %947 = vector.shape_cast %946 : vector<128xf32> to vector<1x128xf32>
    %c0_465 = arith.constant 0 : index
    %c47 = arith.constant 47 : index
    %c0_466 = arith.constant 0 : index
    %948 = vector.load %arg5[%c0_465, %c47, %c0_466] : memref<1x64x128xf32, #tpu.memory_space<vmem>>, vector<1x1x128xf32>
    %949 = vector.shape_cast %948 : vector<1x1x128xf32> to vector<1x128xf32>
    %950 = arith.addf %949, %947 : vector<1x128xf32>
    %c0_467 = arith.constant 0 : index
    %c47_468 = arith.constant 47 : index
    %c0_469 = arith.constant 0 : index
    %951 = vector.load %arg5[%c0_467, %c47_468, %c0_469] : memref<1x64x128xf32, #tpu.memory_space<vmem>>, vector<1x1x128xf32>
    %952 = vector.shape_cast %951 : vector<1x1x128xf32> to vector<1x128xf32>
    %953 = vector.shape_cast %950 : vector<1x128xf32> to vector<1x1x128xf32>
    tpu.vector_store %arg5[%c0_467, %c47_468, %c0_469], %953 {strides = array<i32>} : memref<1x64x128xf32, #tpu.memory_space<vmem>>, vector<1x1x128xf32>,
    %954 = vector.broadcast %118 : f32 to vector<16x128xf32>
    %955 = arith.cmpf ogt, %825, %954 : vector<16x128xf32>
    %956 = vector.broadcast %120 : f32 to vector<16x128xf32>
    %957 = arith.cmpf olt, %825, %956 : vector<16x128xf32>
    %958 = arith.andi %955, %957 : vector<16x128xi1>
    %cst_470 = arith.constant 1.000000e+00 : f32
    %cst_471 = arith.constant 0.000000e+00 : f32
    %959 = vector.broadcast %cst_470 : f32 to vector<16x128xf32>
    %960 = vector.broadcast %cst_471 : f32 to vector<16x128xf32>
    %961 = arith.select %958, %959, %960 : vector<16x128xi1>, vector<16x128xf32>
    %cst_472 = arith.constant dense<0.000000e+00> : vector<128xf32>
    %962 = vector.multi_reduction <add>, %961, %cst_472 [0] : vector<16x128xf32> to vector<128xf32>
    %963 = vector.shape_cast %962 : vector<128xf32> to vector<1x128xf32>
    %c0_473 = arith.constant 0 : index
    %c48 = arith.constant 48 : index
    %c0_474 = arith.constant 0 : index
    %964 = vector.load %arg5[%c0_473, %c48, %c0_474] : memref<1x64x128xf32, #tpu.memory_space<vmem>>, vector<1x1x128xf32>
    %965 = vector.shape_cast %964 : vector<1x1x128xf32> to vector<1x128xf32>
    %966 = arith.addf %965, %963 : vector<1x128xf32>
    %c0_475 = arith.constant 0 : index
    %c48_476 = arith.constant 48 : index
    %c0_477 = arith.constant 0 : index
    %967 = vector.load %arg5[%c0_475, %c48_476, %c0_477] : memref<1x64x128xf32, #tpu.memory_space<vmem>>, vector<1x1x128xf32>
    %968 = vector.shape_cast %967 : vector<1x1x128xf32> to vector<1x128xf32>
    %969 = vector.shape_cast %966 : vector<1x128xf32> to vector<1x1x128xf32>
    tpu.vector_store %arg5[%c0_475, %c48_476, %c0_477], %969 {strides = array<i32>} : memref<1x64x128xf32, #tpu.memory_space<vmem>>, vector<1x1x128xf32>,
    %970 = vector.broadcast %120 : f32 to vector<16x128xf32>
    %971 = arith.cmpf ogt, %825, %970 : vector<16x128xf32>
    %972 = vector.broadcast %122 : f32 to vector<16x128xf32>
    %973 = arith.cmpf olt, %825, %972 : vector<16x128xf32>
    %974 = arith.andi %971, %973 : vector<16x128xi1>
    %cst_478 = arith.constant 1.000000e+00 : f32
    %cst_479 = arith.constant 0.000000e+00 : f32
    %975 = vector.broadcast %cst_478 : f32 to vector<16x128xf32>
    %976 = vector.broadcast %cst_479 : f32 to vector<16x128xf32>
    %977 = arith.select %974, %975, %976 : vector<16x128xi1>, vector<16x128xf32>
    %cst_480 = arith.constant dense<0.000000e+00> : vector<128xf32>
    %978 = vector.multi_reduction <add>, %977, %cst_480 [0] : vector<16x128xf32> to vector<128xf32>
    %979 = vector.shape_cast %978 : vector<128xf32> to vector<1x128xf32>
    %c0_481 = arith.constant 0 : index
    %c49 = arith.constant 49 : index
    %c0_482 = arith.constant 0 : index
    %980 = vector.load %arg5[%c0_481, %c49, %c0_482] : memref<1x64x128xf32, #tpu.memory_space<vmem>>, vector<1x1x128xf32>
    %981 = vector.shape_cast %980 : vector<1x1x128xf32> to vector<1x128xf32>
    %982 = arith.addf %981, %979 : vector<1x128xf32>
    %c0_483 = arith.constant 0 : index
    %c49_484 = arith.constant 49 : index
    %c0_485 = arith.constant 0 : index
    %983 = vector.load %arg5[%c0_483, %c49_484, %c0_485] : memref<1x64x128xf32, #tpu.memory_space<vmem>>, vector<1x1x128xf32>
    %984 = vector.shape_cast %983 : vector<1x1x128xf32> to vector<1x128xf32>
    %985 = vector.shape_cast %982 : vector<1x128xf32> to vector<1x1x128xf32>
    tpu.vector_store %arg5[%c0_483, %c49_484, %c0_485], %985 {strides = array<i32>} : memref<1x64x128xf32, #tpu.memory_space<vmem>>, vector<1x1x128xf32>,
    %986 = vector.broadcast %99 : f32 to vector<16x128xf32>
    %987 = arith.select %147, %130, %986 : vector<16x128xi1>, vector<16x128xf32>
    %988 = vector.broadcast %102 : f32 to vector<16x128xf32>
    %989 = arith.cmpf ogt, %987, %988 : vector<16x128xf32>
    %990 = vector.broadcast %104 : f32 to vector<16x128xf32>
    %991 = arith.cmpf olt, %987, %990 : vector<16x128xf32>
    %992 = arith.andi %989, %991 : vector<16x128xi1>
    %cst_486 = arith.constant 1.000000e+00 : f32
    %cst_487 = arith.constant 0.000000e+00 : f32
    %993 = vector.broadcast %cst_486 : f32 to vector<16x128xf32>
    %994 = vector.broadcast %cst_487 : f32 to vector<16x128xf32>
    %995 = arith.select %992, %993, %994 : vector<16x128xi1>, vector<16x128xf32>
    %cst_488 = arith.constant dense<0.000000e+00> : vector<128xf32>
    %996 = vector.multi_reduction <add>, %995, %cst_488 [0] : vector<16x128xf32> to vector<128xf32>
    %997 = vector.shape_cast %996 : vector<128xf32> to vector<1x128xf32>
    %c0_489 = arith.constant 0 : index
    %c50 = arith.constant 50 : index
    %c0_490 = arith.constant 0 : index
    %998 = vector.load %arg5[%c0_489, %c50, %c0_490] : memref<1x64x128xf32, #tpu.memory_space<vmem>>, vector<1x1x128xf32>
    %999 = vector.shape_cast %998 : vector<1x1x128xf32> to vector<1x128xf32>
    %1000 = arith.addf %999, %997 : vector<1x128xf32>
    %c0_491 = arith.constant 0 : index
    %c50_492 = arith.constant 50 : index
    %c0_493 = arith.constant 0 : index
    %1001 = vector.load %arg5[%c0_491, %c50_492, %c0_493] : memref<1x64x128xf32, #tpu.memory_space<vmem>>, vector<1x1x128xf32>
    %1002 = vector.shape_cast %1001 : vector<1x1x128xf32> to vector<1x128xf32>
    %1003 = vector.shape_cast %1000 : vector<1x128xf32> to vector<1x1x128xf32>
    tpu.vector_store %arg5[%c0_491, %c50_492, %c0_493], %1003 {strides = array<i32>} : memref<1x64x128xf32, #tpu.memory_space<vmem>>, vector<1x1x128xf32>,
    %1004 = vector.broadcast %104 : f32 to vector<16x128xf32>
    %1005 = arith.cmpf ogt, %987, %1004 : vector<16x128xf32>
    %1006 = vector.broadcast %106 : f32 to vector<16x128xf32>
    %1007 = arith.cmpf olt, %987, %1006 : vector<16x128xf32>
    %1008 = arith.andi %1005, %1007 : vector<16x128xi1>
    %cst_494 = arith.constant 1.000000e+00 : f32
    %cst_495 = arith.constant 0.000000e+00 : f32
    %1009 = vector.broadcast %cst_494 : f32 to vector<16x128xf32>
    %1010 = vector.broadcast %cst_495 : f32 to vector<16x128xf32>
    %1011 = arith.select %1008, %1009, %1010 : vector<16x128xi1>, vector<16x128xf32>
    %cst_496 = arith.constant dense<0.000000e+00> : vector<128xf32>
    %1012 = vector.multi_reduction <add>, %1011, %cst_496 [0] : vector<16x128xf32> to vector<128xf32>
    %1013 = vector.shape_cast %1012 : vector<128xf32> to vector<1x128xf32>
    %c0_497 = arith.constant 0 : index
    %c51 = arith.constant 51 : index
    %c0_498 = arith.constant 0 : index
    %1014 = vector.load %arg5[%c0_497, %c51, %c0_498] : memref<1x64x128xf32, #tpu.memory_space<vmem>>, vector<1x1x128xf32>
    %1015 = vector.shape_cast %1014 : vector<1x1x128xf32> to vector<1x128xf32>
    %1016 = arith.addf %1015, %1013 : vector<1x128xf32>
    %c0_499 = arith.constant 0 : index
    %c51_500 = arith.constant 51 : index
    %c0_501 = arith.constant 0 : index
    %1017 = vector.load %arg5[%c0_499, %c51_500, %c0_501] : memref<1x64x128xf32, #tpu.memory_space<vmem>>, vector<1x1x128xf32>
    %1018 = vector.shape_cast %1017 : vector<1x1x128xf32> to vector<1x128xf32>
    %1019 = vector.shape_cast %1016 : vector<1x128xf32> to vector<1x1x128xf32>
    tpu.vector_store %arg5[%c0_499, %c51_500, %c0_501], %1019 {strides = array<i32>} : memref<1x64x128xf32, #tpu.memory_space<vmem>>, vector<1x1x128xf32>,
    %1020 = vector.broadcast %106 : f32 to vector<16x128xf32>
    %1021 = arith.cmpf ogt, %987, %1020 : vector<16x128xf32>
    %1022 = vector.broadcast %108 : f32 to vector<16x128xf32>
    %1023 = arith.cmpf olt, %987, %1022 : vector<16x128xf32>
    %1024 = arith.andi %1021, %1023 : vector<16x128xi1>
    %cst_502 = arith.constant 1.000000e+00 : f32
    %cst_503 = arith.constant 0.000000e+00 : f32
    %1025 = vector.broadcast %cst_502 : f32 to vector<16x128xf32>
    %1026 = vector.broadcast %cst_503 : f32 to vector<16x128xf32>
    %1027 = arith.select %1024, %1025, %1026 : vector<16x128xi1>, vector<16x128xf32>
    %cst_504 = arith.constant dense<0.000000e+00> : vector<128xf32>
    %1028 = vector.multi_reduction <add>, %1027, %cst_504 [0] : vector<16x128xf32> to vector<128xf32>
    %1029 = vector.shape_cast %1028 : vector<128xf32> to vector<1x128xf32>
    %c0_505 = arith.constant 0 : index
    %c52 = arith.constant 52 : index
    %c0_506 = arith.constant 0 : index
    %1030 = vector.load %arg5[%c0_505, %c52, %c0_506] : memref<1x64x128xf32, #tpu.memory_space<vmem>>, vector<1x1x128xf32>
    %1031 = vector.shape_cast %1030 : vector<1x1x128xf32> to vector<1x128xf32>
    %1032 = arith.addf %1031, %1029 : vector<1x128xf32>
    %c0_507 = arith.constant 0 : index
    %c52_508 = arith.constant 52 : index
    %c0_509 = arith.constant 0 : index
    %1033 = vector.load %arg5[%c0_507, %c52_508, %c0_509] : memref<1x64x128xf32, #tpu.memory_space<vmem>>, vector<1x1x128xf32>
    %1034 = vector.shape_cast %1033 : vector<1x1x128xf32> to vector<1x128xf32>
    %1035 = vector.shape_cast %1032 : vector<1x128xf32> to vector<1x1x128xf32>
    tpu.vector_store %arg5[%c0_507, %c52_508, %c0_509], %1035 {strides = array<i32>} : memref<1x64x128xf32, #tpu.memory_space<vmem>>, vector<1x1x128xf32>,
    %1036 = vector.broadcast %108 : f32 to vector<16x128xf32>
    %1037 = arith.cmpf ogt, %987, %1036 : vector<16x128xf32>
    %1038 = vector.broadcast %110 : f32 to vector<16x128xf32>
    %1039 = arith.cmpf olt, %987, %1038 : vector<16x128xf32>
    %1040 = arith.andi %1037, %1039 : vector<16x128xi1>
    %cst_510 = arith.constant 1.000000e+00 : f32
    %cst_511 = arith.constant 0.000000e+00 : f32
    %1041 = vector.broadcast %cst_510 : f32 to vector<16x128xf32>
    %1042 = vector.broadcast %cst_511 : f32 to vector<16x128xf32>
    %1043 = arith.select %1040, %1041, %1042 : vector<16x128xi1>, vector<16x128xf32>
    %cst_512 = arith.constant dense<0.000000e+00> : vector<128xf32>
    %1044 = vector.multi_reduction <add>, %1043, %cst_512 [0] : vector<16x128xf32> to vector<128xf32>
    %1045 = vector.shape_cast %1044 : vector<128xf32> to vector<1x128xf32>
    %c0_513 = arith.constant 0 : index
    %c53 = arith.constant 53 : index
    %c0_514 = arith.constant 0 : index
    %1046 = vector.load %arg5[%c0_513, %c53, %c0_514] : memref<1x64x128xf32, #tpu.memory_space<vmem>>, vector<1x1x128xf32>
    %1047 = vector.shape_cast %1046 : vector<1x1x128xf32> to vector<1x128xf32>
    %1048 = arith.addf %1047, %1045 : vector<1x128xf32>
    %c0_515 = arith.constant 0 : index
    %c53_516 = arith.constant 53 : index
    %c0_517 = arith.constant 0 : index
    %1049 = vector.load %arg5[%c0_515, %c53_516, %c0_517] : memref<1x64x128xf32, #tpu.memory_space<vmem>>, vector<1x1x128xf32>
    %1050 = vector.shape_cast %1049 : vector<1x1x128xf32> to vector<1x128xf32>
    %1051 = vector.shape_cast %1048 : vector<1x128xf32> to vector<1x1x128xf32>
    tpu.vector_store %arg5[%c0_515, %c53_516, %c0_517], %1051 {strides = array<i32>} : memref<1x64x128xf32, #tpu.memory_space<vmem>>, vector<1x1x128xf32>,
    %1052 = vector.broadcast %110 : f32 to vector<16x128xf32>
    %1053 = arith.cmpf ogt, %987, %1052 : vector<16x128xf32>
    %1054 = vector.broadcast %112 : f32 to vector<16x128xf32>
    %1055 = arith.cmpf olt, %987, %1054 : vector<16x128xf32>
    %1056 = arith.andi %1053, %1055 : vector<16x128xi1>
    %cst_518 = arith.constant 1.000000e+00 : f32
    %cst_519 = arith.constant 0.000000e+00 : f32
    %1057 = vector.broadcast %cst_518 : f32 to vector<16x128xf32>
    %1058 = vector.broadcast %cst_519 : f32 to vector<16x128xf32>
    %1059 = arith.select %1056, %1057, %1058 : vector<16x128xi1>, vector<16x128xf32>
    %cst_520 = arith.constant dense<0.000000e+00> : vector<128xf32>
    %1060 = vector.multi_reduction <add>, %1059, %cst_520 [0] : vector<16x128xf32> to vector<128xf32>
    %1061 = vector.shape_cast %1060 : vector<128xf32> to vector<1x128xf32>
    %c0_521 = arith.constant 0 : index
    %c54 = arith.constant 54 : index
    %c0_522 = arith.constant 0 : index
    %1062 = vector.load %arg5[%c0_521, %c54, %c0_522] : memref<1x64x128xf32, #tpu.memory_space<vmem>>, vector<1x1x128xf32>
    %1063 = vector.shape_cast %1062 : vector<1x1x128xf32> to vector<1x128xf32>
    %1064 = arith.addf %1063, %1061 : vector<1x128xf32>
    %c0_523 = arith.constant 0 : index
    %c54_524 = arith.constant 54 : index
    %c0_525 = arith.constant 0 : index
    %1065 = vector.load %arg5[%c0_523, %c54_524, %c0_525] : memref<1x64x128xf32, #tpu.memory_space<vmem>>, vector<1x1x128xf32>
    %1066 = vector.shape_cast %1065 : vector<1x1x128xf32> to vector<1x128xf32>
    %1067 = vector.shape_cast %1064 : vector<1x128xf32> to vector<1x1x128xf32>
    tpu.vector_store %arg5[%c0_523, %c54_524, %c0_525], %1067 {strides = array<i32>} : memref<1x64x128xf32, #tpu.memory_space<vmem>>, vector<1x1x128xf32>,
    %1068 = vector.broadcast %112 : f32 to vector<16x128xf32>
    %1069 = arith.cmpf ogt, %987, %1068 : vector<16x128xf32>
    %1070 = vector.broadcast %114 : f32 to vector<16x128xf32>
    %1071 = arith.cmpf olt, %987, %1070 : vector<16x128xf32>
    %1072 = arith.andi %1069, %1071 : vector<16x128xi1>
    %cst_526 = arith.constant 1.000000e+00 : f32
    %cst_527 = arith.constant 0.000000e+00 : f32
    %1073 = vector.broadcast %cst_526 : f32 to vector<16x128xf32>
    %1074 = vector.broadcast %cst_527 : f32 to vector<16x128xf32>
    %1075 = arith.select %1072, %1073, %1074 : vector<16x128xi1>, vector<16x128xf32>
    %cst_528 = arith.constant dense<0.000000e+00> : vector<128xf32>
    %1076 = vector.multi_reduction <add>, %1075, %cst_528 [0] : vector<16x128xf32> to vector<128xf32>
    %1077 = vector.shape_cast %1076 : vector<128xf32> to vector<1x128xf32>
    %c0_529 = arith.constant 0 : index
    %c55 = arith.constant 55 : index
    %c0_530 = arith.constant 0 : index
    %1078 = vector.load %arg5[%c0_529, %c55, %c0_530] : memref<1x64x128xf32, #tpu.memory_space<vmem>>, vector<1x1x128xf32>
    %1079 = vector.shape_cast %1078 : vector<1x1x128xf32> to vector<1x128xf32>
    %1080 = arith.addf %1079, %1077 : vector<1x128xf32>
    %c0_531 = arith.constant 0 : index
    %c55_532 = arith.constant 55 : index
    %c0_533 = arith.constant 0 : index
    %1081 = vector.load %arg5[%c0_531, %c55_532, %c0_533] : memref<1x64x128xf32, #tpu.memory_space<vmem>>, vector<1x1x128xf32>
    %1082 = vector.shape_cast %1081 : vector<1x1x128xf32> to vector<1x128xf32>
    %1083 = vector.shape_cast %1080 : vector<1x128xf32> to vector<1x1x128xf32>
    tpu.vector_store %arg5[%c0_531, %c55_532, %c0_533], %1083 {strides = array<i32>} : memref<1x64x128xf32, #tpu.memory_space<vmem>>, vector<1x1x128xf32>,
    %1084 = vector.broadcast %114 : f32 to vector<16x128xf32>
    %1085 = arith.cmpf ogt, %987, %1084 : vector<16x128xf32>
    %1086 = vector.broadcast %116 : f32 to vector<16x128xf32>
    %1087 = arith.cmpf olt, %987, %1086 : vector<16x128xf32>
    %1088 = arith.andi %1085, %1087 : vector<16x128xi1>
    %cst_534 = arith.constant 1.000000e+00 : f32
    %cst_535 = arith.constant 0.000000e+00 : f32
    %1089 = vector.broadcast %cst_534 : f32 to vector<16x128xf32>
    %1090 = vector.broadcast %cst_535 : f32 to vector<16x128xf32>
    %1091 = arith.select %1088, %1089, %1090 : vector<16x128xi1>, vector<16x128xf32>
    %cst_536 = arith.constant dense<0.000000e+00> : vector<128xf32>
    %1092 = vector.multi_reduction <add>, %1091, %cst_536 [0] : vector<16x128xf32> to vector<128xf32>
    %1093 = vector.shape_cast %1092 : vector<128xf32> to vector<1x128xf32>
    %c0_537 = arith.constant 0 : index
    %c56 = arith.constant 56 : index
    %c0_538 = arith.constant 0 : index
    %1094 = vector.load %arg5[%c0_537, %c56, %c0_538] : memref<1x64x128xf32, #tpu.memory_space<vmem>>, vector<1x1x128xf32>
    %1095 = vector.shape_cast %1094 : vector<1x1x128xf32> to vector<1x128xf32>
    %1096 = arith.addf %1095, %1093 : vector<1x128xf32>
    %c0_539 = arith.constant 0 : index
    %c56_540 = arith.constant 56 : index
    %c0_541 = arith.constant 0 : index
    %1097 = vector.load %arg5[%c0_539, %c56_540, %c0_541] : memref<1x64x128xf32, #tpu.memory_space<vmem>>, vector<1x1x128xf32>
    %1098 = vector.shape_cast %1097 : vector<1x1x128xf32> to vector<1x128xf32>
    %1099 = vector.shape_cast %1096 : vector<1x128xf32> to vector<1x1x128xf32>
    tpu.vector_store %arg5[%c0_539, %c56_540, %c0_541], %1099 {strides = array<i32>} : memref<1x64x128xf32, #tpu.memory_space<vmem>>, vector<1x1x128xf32>,
    %1100 = vector.broadcast %116 : f32 to vector<16x128xf32>
    %1101 = arith.cmpf ogt, %987, %1100 : vector<16x128xf32>
    %1102 = vector.broadcast %118 : f32 to vector<16x128xf32>
    %1103 = arith.cmpf olt, %987, %1102 : vector<16x128xf32>
    %1104 = arith.andi %1101, %1103 : vector<16x128xi1>
    %cst_542 = arith.constant 1.000000e+00 : f32
    %cst_543 = arith.constant 0.000000e+00 : f32
    %1105 = vector.broadcast %cst_542 : f32 to vector<16x128xf32>
    %1106 = vector.broadcast %cst_543 : f32 to vector<16x128xf32>
    %1107 = arith.select %1104, %1105, %1106 : vector<16x128xi1>, vector<16x128xf32>
    %cst_544 = arith.constant dense<0.000000e+00> : vector<128xf32>
    %1108 = vector.multi_reduction <add>, %1107, %cst_544 [0] : vector<16x128xf32> to vector<128xf32>
    %1109 = vector.shape_cast %1108 : vector<128xf32> to vector<1x128xf32>
    %c0_545 = arith.constant 0 : index
    %c57 = arith.constant 57 : index
    %c0_546 = arith.constant 0 : index
    %1110 = vector.load %arg5[%c0_545, %c57, %c0_546] : memref<1x64x128xf32, #tpu.memory_space<vmem>>, vector<1x1x128xf32>
    %1111 = vector.shape_cast %1110 : vector<1x1x128xf32> to vector<1x128xf32>
    %1112 = arith.addf %1111, %1109 : vector<1x128xf32>
    %c0_547 = arith.constant 0 : index
    %c57_548 = arith.constant 57 : index
    %c0_549 = arith.constant 0 : index
    %1113 = vector.load %arg5[%c0_547, %c57_548, %c0_549] : memref<1x64x128xf32, #tpu.memory_space<vmem>>, vector<1x1x128xf32>
    %1114 = vector.shape_cast %1113 : vector<1x1x128xf32> to vector<1x128xf32>
    %1115 = vector.shape_cast %1112 : vector<1x128xf32> to vector<1x1x128xf32>
    tpu.vector_store %arg5[%c0_547, %c57_548, %c0_549], %1115 {strides = array<i32>} : memref<1x64x128xf32, #tpu.memory_space<vmem>>, vector<1x1x128xf32>,
    %1116 = vector.broadcast %118 : f32 to vector<16x128xf32>
    %1117 = arith.cmpf ogt, %987, %1116 : vector<16x128xf32>
    %1118 = vector.broadcast %120 : f32 to vector<16x128xf32>
    %1119 = arith.cmpf olt, %987, %1118 : vector<16x128xf32>
    %1120 = arith.andi %1117, %1119 : vector<16x128xi1>
    %cst_550 = arith.constant 1.000000e+00 : f32
    %cst_551 = arith.constant 0.000000e+00 : f32
    %1121 = vector.broadcast %cst_550 : f32 to vector<16x128xf32>
    %1122 = vector.broadcast %cst_551 : f32 to vector<16x128xf32>
    %1123 = arith.select %1120, %1121, %1122 : vector<16x128xi1>, vector<16x128xf32>
    %cst_552 = arith.constant dense<0.000000e+00> : vector<128xf32>
    %1124 = vector.multi_reduction <add>, %1123, %cst_552 [0] : vector<16x128xf32> to vector<128xf32>
    %1125 = vector.shape_cast %1124 : vector<128xf32> to vector<1x128xf32>
    %c0_553 = arith.constant 0 : index
    %c58 = arith.constant 58 : index
    %c0_554 = arith.constant 0 : index
    %1126 = vector.load %arg5[%c0_553, %c58, %c0_554] : memref<1x64x128xf32, #tpu.memory_space<vmem>>, vector<1x1x128xf32>
    %1127 = vector.shape_cast %1126 : vector<1x1x128xf32> to vector<1x128xf32>
    %1128 = arith.addf %1127, %1125 : vector<1x128xf32>
    %c0_555 = arith.constant 0 : index
    %c58_556 = arith.constant 58 : index
    %c0_557 = arith.constant 0 : index
    %1129 = vector.load %arg5[%c0_555, %c58_556, %c0_557] : memref<1x64x128xf32, #tpu.memory_space<vmem>>, vector<1x1x128xf32>
    %1130 = vector.shape_cast %1129 : vector<1x1x128xf32> to vector<1x128xf32>
    %1131 = vector.shape_cast %1128 : vector<1x128xf32> to vector<1x1x128xf32>
    tpu.vector_store %arg5[%c0_555, %c58_556, %c0_557], %1131 {strides = array<i32>} : memref<1x64x128xf32, #tpu.memory_space<vmem>>, vector<1x1x128xf32>,
    %1132 = vector.broadcast %120 : f32 to vector<16x128xf32>
    %1133 = arith.cmpf ogt, %987, %1132 : vector<16x128xf32>
    %1134 = vector.broadcast %122 : f32 to vector<16x128xf32>
    %1135 = arith.cmpf olt, %987, %1134 : vector<16x128xf32>
    %1136 = arith.andi %1133, %1135 : vector<16x128xi1>
    %cst_558 = arith.constant 1.000000e+00 : f32
    %cst_559 = arith.constant 0.000000e+00 : f32
    %1137 = vector.broadcast %cst_558 : f32 to vector<16x128xf32>
    %1138 = vector.broadcast %cst_559 : f32 to vector<16x128xf32>
    %1139 = arith.select %1136, %1137, %1138 : vector<16x128xi1>, vector<16x128xf32>
    %cst_560 = arith.constant dense<0.000000e+00> : vector<128xf32>
    %1140 = vector.multi_reduction <add>, %1139, %cst_560 [0] : vector<16x128xf32> to vector<128xf32>
    %1141 = vector.shape_cast %1140 : vector<128xf32> to vector<1x128xf32>
    %c0_561 = arith.constant 0 : index
    %c59 = arith.constant 59 : index
    %c0_562 = arith.constant 0 : index
    %1142 = vector.load %arg5[%c0_561, %c59, %c0_562] : memref<1x64x128xf32, #tpu.memory_space<vmem>>, vector<1x1x128xf32>
    %1143 = vector.shape_cast %1142 : vector<1x1x128xf32> to vector<1x128xf32>
    %1144 = arith.addf %1143, %1141 : vector<1x128xf32>
    %c0_563 = arith.constant 0 : index
    %c59_564 = arith.constant 59 : index
    %c0_565 = arith.constant 0 : index
    %1145 = vector.load %arg5[%c0_563, %c59_564, %c0_565] : memref<1x64x128xf32, #tpu.memory_space<vmem>>, vector<1x1x128xf32>
    %1146 = vector.shape_cast %1145 : vector<1x1x128xf32> to vector<1x128xf32>
    %1147 = vector.shape_cast %1144 : vector<1x128xf32> to vector<1x1x128xf32>
    tpu.vector_store %arg5[%c0_563, %c59_564, %c0_565], %1147 {strides = array<i32>} : memref<1x64x128xf32, #tpu.memory_space<vmem>>, vector<1x1x128xf32>,
    %c1_i32 = arith.constant 1 : i32
    return
  }
  func.func @transform_0(%arg0: i32, %arg1: i32) -> i32 {
    %c0_i32 = arith.constant 0 : i32
    %c0_i32_0 = arith.constant 0 : i32
    return %c0_i32 : i32
  }
  func.func @transform_1(%arg0: i32, %arg1: i32) -> (i32, i32, i32) {
    %c1_i32 = arith.constant 1 : i32
    %0 = arith.muli %arg0, %c1_i32 : i32
    %1 = arith.addi %0, %arg1 : i32
    %c0_i32 = arith.constant 0 : i32
    %c0_i32_0 = arith.constant 0 : i32
    %c0_i32_1 = arith.constant 0 : i32
    return %1, %c0_i32, %c0_i32_0 : i32, i32, i32
  }
  func.func @transform_2(%arg0: i32, %arg1: i32) -> (i32, i32, i32) {
    %c1_i32 = arith.constant 1 : i32
    %0 = arith.muli %arg0, %c1_i32 : i32
    %1 = arith.addi %0, %arg1 : i32
    %c0_i32 = arith.constant 0 : i32
    %c0_i32_0 = arith.constant 0 : i32
    %c0_i32_1 = arith.constant 0 : i32
    return %1, %c0_i32, %c0_i32_0 : i32, i32, i32
  }
  func.func @transform_3(%arg0: i32, %arg1: i32) -> (i32, i32, i32) {
    %c0_i32 = arith.constant 0 : i32
    %c0_i32_0 = arith.constant 0 : i32
    %c0_i32_1 = arith.constant 0 : i32
    return %arg0, %c0_i32, %c0_i32_0 : i32, i32, i32
  }
}

</mosaic_0001>

<bundles_post_ra>
// kernel: total_variation_loss.2
= control target key start
LH: loop header
LB: loop body
LE: loop exit
PB: predicated region body
PF: predicated region fallthrough
CT: control target
= control target key end

     0   :  { %s666_s9 = smov 0   ;;  %s668_s10 = smov 0   ;;  %s852_s0 = inlined_call_operand.vmem [shape: f32[2,16,128], index: 0, kind: input, shape index: {}]   ;;  %s853_s1 = inlined_call_operand.vmem [shape: f32[2,16,128], index: 1, kind: input, shape index: {}]   ;;  %s854_s2 = inlined_call_operand.vmem [shape: f32[2,24,128], index: 2, kind: output, shape index: {}]  }
   0x1   :  { %s670_s11 = smov 0  }
   0x2 LB: > { %s24_s12 = sadd.s32 1, %s641_s10  ;;  %p580_p0 = scmp.ge.s32.totalorder %s645_s11, 1  ;;  %s645_s11 = sphi %s670_s11, %s12_s11   ;;  %s641_s10 = sphi %s668_s10, %s858_s10   ;;  %s637_s9 = sphi %s666_s9, %s857_s9  }
   0x3   : > { %p26_p1 = scmp.ge.s32.totalorder %s24_s12, 2  ;;  %p142_p2 = scmp.lt.s32.totalorder %s645_s11, 3 }
   0x5   : > { %s860_s12 = smov (%p26_p1, %s24_s12), 0  ;;  %p143_p3 = pnand %p580_p0, %p142_p2 }
   0x6   : > { %p172_p4 = scmp.lt.s32.totalorder (!%p143_p3), %s637_s9, 1  ;;  %s647_s24 = smov (!%p143_p3), 127  }
   0x7   : > { %146 = sbr.rel (%p143_p3) target bundleno = 160 (0xa0), region = 28 }
   0xc   : > { %v224_v0 = vlaneseq  ;;  %s862_s9 = smov (!%p172_p4, %s637_s9), 1  ;;  %v648_v10 = vmov inf   ;;  %v649_v11 = vmov -inf   ;;  %v650_v12 = vmov 0.0  }
   0xd   : > { %s592_s13 = sshll.u32 %s862_s9, 4  ;;  %s594_s14 = smul.u32 24, %s862_s9 }
   0xe   : > { %v225_v1 = vshrl.u32 %v224_v0, 7  ;;  %v684_v3 = vand.u32 127, %v224_v0  ;;  %s183_s17 = scalar_lea.vmem %s853_s1, %s592_s13  ;;  %s692_s20 = scalar_lea.vmem %s852_s0, %s592_s13 }
   0xf   : > { %s697_s23 = scalar_lea.vmem %s854_s2, %s594_s14  ;;  %v699_v4 = vld [vmem:[%s183_s17] sm:$0xff]  ;;  %v589_v5 = vld [vmem:[%s183_s17 + $0xf] ss:$0 sm:$0xff] }
  0x10   : > { %v226_v2 = vadd.s32 8, %v225_v1  ;;  %v702_v6 = vld [vmem:[%s692_s20] sm:$0xff]  ;;  %vm234_vm0 = vcmp.lt.s32.totalorder %v684_v3, 16  ;;  %vm258_vm1 = vcmp.lt.s32.totalorder %v225_v1, 7  ;;  %250 = vrot.lane.b32.xlu1 %v699_v4, %s647_s24  ;;  %v271_v7 = vrot.slane %v699_v4, 1  ;;  %v711_v9 = vld [vmem:[%s183_s17 + $0x8] sm:$0xff]  ;;  %210 = vst [vmem:[%s697_s23] sm:$0xff] %v648_v10 }
  0x11   : > { %244 = vrot.lane.b32.xlu0 %v702_v6, %s647_s24  ;;  %v256_v8 = vrot.slane %v702_v6, 1  ;;  %211 = vst [vmem:[%s697_s23 + $0x8] sm:$0xff] %v649_v11  ;;  %212 = vst [vmem:[%s697_s23 + $0x10] sm:$0xff] %v650_v12  ;;  %v475_v13 = vsel %vm234_vm0, %v699_v4, inf  ;;  %v272_v14 = vrot.slane %v711_v9, 1  ;;  %v721_v15 = vld [vmem:[%s692_s20 + $0x8] sm:$0xff] }
  0x12   : > { %vm262_vm2 = vcmp.eq.s32.totalorder %v226_v2, 15  ;;  %v476_v16 = vsel %vm234_vm0, %v711_v9, inf  ;;  %v484_v17 = vsel %vm234_vm0, %v699_v4, -inf  ;;  %v485_v18 = vsel %vm234_vm0, %v711_v9, -inf  ;;  %v588_v24 = vld [vmem:[%s692_s20 + $0xf] ss:$0 sm:$0xff] }
  0x13   : > { %v257_v19 = vrot.slane %v721_v15, 1  ;;  %v477_v20 = vmin.f32 %v475_v13, %v476_v16  ;;  %v486_v21 = vmax.f32 %v484_v17, %v485_v18  ;;  %vm241_vm3 = vcmp.lt.s32.totalorder %v226_v2, 15 }
  0x14   : > { %v273_v22 = vsel %vm258_vm1, %v271_v7, %v272_v14  ;;  %v274_v23 = vsel %vm258_vm1, %v272_v14, %v271_v7  ;;  %252 = vrot.lane.b32.xlu1 %v711_v9, %s647_s24  ;;  %vm747_vm4 = vmand %vm241_vm3, %vm234_vm0  ;;  %vm237_vm5 = vcmp.lt.s32.totalorder %v684_v3, 15 }
  0x15   : > { %v280_v25 = vsel %vm262_vm2, %v589_v5, %v274_v23  ;;  %v281_v26 = vsub.f32 %v699_v4, %v273_v22  ;;  %v478_v27 = vrot.slane %v477_v20, 4  ;;  %v487_v28 = vrot.slane %v486_v21, 4  ;;  %246 = vrot.lane.b32.xlu0 %v721_v15, %s647_s24 }
  0x16   : > { %v282_v29 = vsub.f32 %v711_v9, %v280_v25  ;;  %v259_v30 = vsel %vm258_vm1, %v256_v8, %v257_v19  ;;  %v260_v31 = vsel %vm258_vm1, %v257_v19, %v256_v8 }
  0x17   : > { %v427_v33 = vsel %vm234_vm0, %v281_v26, inf  ;;  %v436_v34 = vsel %vm234_vm0, %v281_v26, -inf  ;;  %v451_v35 = vsel %vm234_vm0, %v281_v26, 0.0  ;;  %v479_v36 = vmin.f32 %v477_v20, %v478_v27  ;;  %v493_v5 = vld [vmem:[%s697_s23 + $0x4] sm:$0x1] }
  0x18   : > { %v464_v37 = vmul.f32 %v451_v35, %v451_v35  ;;  %v488_v38 = vmax.f32 %v486_v21, %v487_v28  ;;  %v268_v39 = vsel %vm262_vm2, %v588_v24, %v260_v31  ;;  %v428_v40 = vsel %vm747_vm4, %v282_v29, inf  ;;  %v496_v12 = vld [vmem:[%s697_s23 + $0xc] sm:$0x1]  ;;  %v445_v31 = vld [vmem:[%s697_s23 + $0x3] sm:$0x1] }
  0x19   : > { %v437_v41 = vsel %vm747_vm4, %v282_v29, -inf  ;;  %v269_v42 = vsub.f32 %v702_v6, %v259_v30  ;;  %v270_v43 = vsub.f32 %v721_v15, %v268_v39  ;;  %v429_v44 = vmin.f32 %v427_v33, %v428_v40  ;;  %v448_v33 = vld [vmem:[%s697_s23 + $0xb] sm:$0x1]  ;;  %v453_v40 = vld [vmem:[%s697_s23 + $0x13] sm:$0x1] }
  0x1a   : > { %v438_v45 = vmax.f32 %v436_v34, %v437_v41  ;;  %v452_v46 = vsel %vm747_vm4, %v282_v29, 0.0  ;;  %v480_v47 = vrot.slane %v479_v36, 2  ;;  %v489_v50 = vrot.slane %v488_v38, 2 }
  0x1b   : > { %v454_v48 = vadd.f32 %v452_v46, %v451_v35  ;;  %v465_v49 = vmul.f32 %v452_v46, %v452_v46  ;;  %v379_v51 = vsel %vm234_vm0, %v269_v42, inf  ;;  %v430_v52 = vrot.slane %v429_v44, 4 }
  0x1c   : > { %v439_v53 = vrot.slane %v438_v45, 4  ;;  %v481_v54 = vmin.f32 %v479_v36, %v480_v47  ;;  %v380_v55 = vsel %vm747_vm4, %v270_v43, inf  ;;  %v490_v58 = vmax.f32 %v488_v38, %v489_v50 }
  0x1d   : > { %v455_v56 = vrot.slane %v454_v48, 4  ;;  %v466_v57 = vadd.f32 %v465_v49, %v464_v37  ;;  %v381_v59 = vmin.f32 %v379_v51, %v380_v55  ;;  %v431_v60 = vmin.f32 %v429_v44, %v430_v52  ;;  %v463_v51 = vld [vmem:[%s697_s23 + $0x17] sm:$0x1] }
  0x1e   : > { %v440_v61 = vmax.f32 %v438_v45, %v439_v53  ;;  %v482_v62 = vrot.slane %v481_v54, 1  ;;  %v388_v63 = vsel %vm234_vm0, %v269_v42, -inf  ;;  %v491_v2 = vrot.slane %v490_v58, 1 }
  0x1f   : > { %v456_v0 = vadd.f32 %v455_v56, %v454_v48  ;;  %v467_v1 = vrot.slane %v466_v57, 4  ;;  %v382_v7 = vrot.slane %v381_v59, 4  ;;  %v432_v8 = vrot.slane %v431_v60, 2  ;;  %v397_v48 = vld [vmem:[%s697_s23 + $0x2] sm:$0x1] }
  0x20   : > { %v441_v10 = vrot.slane %v440_v61, 2  ;;  %v483_v11 = vmin.f32 %v481_v54, %v482_v62  ;;  %v389_v13 = vsel %vm747_vm4, %v270_v43, -inf  ;;  %v492_v17 = vmax.f32 %v490_v58, %v491_v2 }
  0x21   : > { %v457_v14 = vrot.slane %v456_v0, 2  ;;  %v468_v16 = vadd.f32 %v467_v1, %v466_v57  ;;  %v383_v18 = vmin.f32 %v381_v59, %v382_v7  ;;  %v433_v19 = vmin.f32 %v431_v60, %v432_v8 }
  0x22   : > { %v442_v20 = vmax.f32 %v440_v61, %v441_v10  ;;  %v494_v21 = vmin.f32 %v493_v5, %v483_v11  ;;  %v390_v22 = vmax.f32 %v388_v63, %v389_v13  ;;  %v497_v25 = vmax.f32 %v496_v12, %v492_v17  ;;  %v400_v63 = vld [vmem:[%s697_s23 + $0xa] sm:$0x1]  ;;  %v405_v10 = vld [vmem:[%s697_s23 + $0x12] sm:$0x1]  ;;  %v415_v17 = vld [vmem:[%s697_s23 + $0x16] sm:$0x1] }
  0x23   : > { %v458_v23 = vadd.f32 %v457_v14, %v456_v0  ;;  %v469_v24 = vrot.slane %v468_v16, 2  ;;  %v384_v26 = vrot.slane %v383_v18, 2  ;;  %v434_v27 = vrot.slane %v433_v19, 1 }
  0x24   : > { %v443_v28 = vrot.slane %v442_v20, 1  ;;  %495 = vst [vmem:[%s697_s23 + $0x4] sm:$0x1] %v494_v21  ;;  %v391_v29 = vrot.slane %v390_v22, 4  ;;  %v403_v30 = vsel %vm234_vm0, %v269_v42, 0.0  ;;  %v404_v37 = vsel %vm747_vm4, %v270_v43, 0.0 }
  0x25   : > { %v459_v34 = vrot.slane %v458_v23, 1  ;;  %v470_v35 = vadd.f32 %v469_v24, %v468_v16  ;;  %498 = vst [vmem:[%s697_s23 + $0xc] sm:$0x1] %v497_v25  ;;  %v385_v36 = vmin.f32 %v383_v18, %v384_v26  ;;  %v435_v38 = vmin.f32 %v433_v19, %v434_v27 }
  0x26   : > { %v444_v39 = vmax.f32 %v442_v20, %v443_v28  ;;  %v392_v41 = vmax.f32 %v390_v22, %v391_v29  ;;  %v406_v44 = vadd.f32 %v404_v37, %v403_v30  ;;  %v416_v47 = vmul.f32 %v403_v30, %v403_v30 }
  0x27   : > { %v460_v45 = vadd.f32 %v459_v34, %v458_v23  ;;  %v471_v42 = vrot.slane %v470_v35, 1  ;;  %v386_v46 = vrot.slane %v385_v36, 1  ;;  %v446_v49 = vmin.f32 %v445_v31, %v435_v38 }
  0x28   : > { %v449_v50 = vmax.f32 %v448_v33, %v444_v39  ;;  %v393_v52 = vrot.slane %v392_v41, 2  ;;  %v407_v32 = vrot.slane %v406_v44, 4  ;;  %v417_v55 = vmul.f32 %v404_v37, %v404_v37 }
  0x29   : > { %v461_v43 = vadd.f32 %v460_v45, %v453_v40  ;;  %v472_v53 = vadd.f32 %v471_v42, %v470_v35  ;;  %v387_v54 = vmin.f32 %v385_v36, %v386_v46  ;;  %447 = vst [vmem:[%s697_s23 + $0x3] sm:$0x1] %v446_v49 }
  0x2a   : > { %450 = vst [vmem:[%s697_s23 + $0xb] sm:$0x1] %v449_v50  ;;  %v394_v56 = vmax.f32 %v392_v41, %v393_v52  ;;  %v408_v57 = vadd.f32 %v407_v32, %v406_v44  ;;  %v418_v60 = vadd.f32 %v417_v55, %v416_v47 }
  0x2b   : > { %462 = vst [vmem:[%s697_s23 + $0x13] sm:$0x1] %v461_v43  ;;  %v473_v58 = vadd.f32 %v472_v53, %v463_v51  ;;  %v398_v59 = vmin.f32 %v397_v48, %v387_v54 }
  0x2c   : > { %v395_v61 = vrot.slane %v394_v56, 1  ;;  %v409_v62 = vrot.slane %v408_v57, 2  ;;  %v419_v0 = vrot.slane %v418_v60, 4 }
  0x2d   : > { %474 = vst [vmem:[%s697_s23 + $0x17] sm:$0x1] %v473_v58  ;;  %399 = vst [vmem:[%s697_s23 + $0x2] sm:$0x1] %v398_v59 }
  0x2e   : > { %v396_v1 = vmax.f32 %v394_v56, %v395_v61  ;;  %v410_v2 = vadd.f32 %v409_v62, %v408_v57  ;;  %v420_v5 = vadd.f32 %v419_v0, %v418_v60 }
  0x30   : > { %v401_v7 = vmax.f32 %v400_v63, %v396_v1  ;;  %v411_v8 = vrot.slane %v410_v2, 1  ;;  %v421_v11 = vrot.slane %v420_v5, 2 }
  0x32   : > { %402 = vst [vmem:[%s697_s23 + $0xa] sm:$0x1] %v401_v7  ;;  %v412_v12 = vadd.f32 %v411_v8, %v410_v2  ;;  %v422_v13 = vadd.f32 %v421_v11, %v420_v5 }
  0x34   : > { %v413_v14 = vadd.f32 %v412_v12, %v405_v10  ;;  %v423_v16 = vrot.slane %v422_v13, 1 }
  0x36   : > { %414 = vst [vmem:[%s697_s23 + $0x12] sm:$0x1] %v413_v14  ;;  %v424_v18 = vadd.f32 %v423_v16, %v422_v13  ;;  %v349_v14 = vld [vmem:[%s697_s23 + $0x1] sm:$0x1] }
  0x38   : > { %v425_v19 = vadd.f32 %v424_v18, %v415_v17 }
  0x3a   : > { %426 = vst [vmem:[%s697_s23 + $0x16] sm:$0x1] %v425_v19 }
  0x82   : > { %v251_v20 = vpop.permute.xlu1 %250 }
  0x83   : > { %v245_v21 = vpop.permute.xlu0 %244  ;;  %v254_v22 = vsub.f32 %v699_v4, %v251_v20  ;;  %v352_v20 = vld [vmem:[%s697_s23 + $0x9] sm:$0x1] }
  0x84   : > { %v248_v23 = vsub.f32 %v702_v6, %v245_v21  ;;  %v357_v21 = vld [vmem:[%s697_s23 + $0x11] sm:$0x1] }
  0x85   : > { %v355_v24 = vsel %vm237_vm5, %v254_v22, 0.0  ;;  %v331_v27 = vsel %vm237_vm5, %v254_v22, inf  ;;  %v340_v28 = vsel %vm237_vm5, %v254_v22, -inf }
  0x86   : > { %v253_v25 = vpop.permute.xlu1 %252  ;;  %v368_v31 = vmul.f32 %v355_v24, %v355_v24  ;;  %v283_v4 = vsel %vm237_vm5, %v248_v23, inf  ;;  %v292_v6 = vsel %vm237_vm5, %v248_v23, -inf  ;;  %v307_v33 = vsel %vm237_vm5, %v248_v23, 0.0 }
  0x87   : > { %v247_v26 = vpop.permute.xlu0 %246  ;;  %v255_v29 = vsub.f32 %v711_v9, %v253_v25  ;;  %v320_v40 = vmul.f32 %v307_v33, %v307_v33 }
  0x88   : > { %v249_v30 = vsub.f32 %v721_v15, %v247_v26 }
  0x89   : > { %v332_v34 = vsel %vm237_vm5, %v255_v29, inf  ;;  %v341_v35 = vsel %vm237_vm5, %v255_v29, -inf  ;;  %v356_v9 = vsel %vm237_vm5, %v255_v29, 0.0 }
  0x8a   : > { %v284_v15 = vsel %vm237_vm5, %v249_v30, inf  ;;  %v333_v36 = vmin.f32 %v331_v27, %v332_v34  ;;  %v342_v37 = vmax.f32 %v340_v28, %v341_v35  ;;  %v358_v38 = vadd.f32 %v356_v9, %v355_v24 }
  0x8b   : > { %v369_v39 = vmul.f32 %v356_v9, %v356_v9  ;;  %v285_v41 = vmin.f32 %v283_v4, %v284_v15  ;;  %v293_v44 = vsel %vm237_vm5, %v249_v30, -inf  ;;  %v308_v45 = vsel %vm237_vm5, %v249_v30, 0.0  ;;  %v301_v30 = vld [vmem:[%s697_s23] sm:$0x1] }
  0x8c   : > { %v334_v42 = vrot.slane %v333_v36, 4  ;;  %v343_v46 = vrot.slane %v342_v37, 4  ;;  %v359_v47 = vrot.slane %v358_v38, 4  ;;  %v294_v50 = vmax.f32 %v292_v6, %v293_v44 }
  0x8d   : > { %v370_v48 = vadd.f32 %v369_v39, %v368_v31  ;;  %v286_v49 = vrot.slane %v285_v41, 4  ;;  %v310_v51 = vadd.f32 %v308_v45, %v307_v33  ;;  %v321_v52 = vmul.f32 %v308_v45, %v308_v45  ;;  %v367_v31 = vld [vmem:[%s697_s23 + $0x15] sm:$0x1] }
  0x8e   : > { %v335_v32 = vmin.f32 %v333_v36, %v334_v42  ;;  %v344_v43 = vmax.f32 %v342_v37, %v343_v46  ;;  %v360_v53 = vadd.f32 %v359_v47, %v358_v38  ;;  %v295_v56 = vrot.slane %v294_v50, 4  ;;  %v304_v37 = vld [vmem:[%s697_s23 + $0x8] sm:$0x1]  ;;  %v309_v38 = vld [vmem:[%s697_s23 + $0x10] sm:$0x1] }
  0x8f   : > { %v371_v54 = vrot.slane %v370_v48, 4  ;;  %v287_v55 = vmin.f32 %v285_v41, %v286_v49  ;;  %v311_v57 = vrot.slane %v310_v51, 4  ;;  %v322_v58 = vadd.f32 %v321_v52, %v320_v40  ;;  %v319_v42 = vld [vmem:[%s697_s23 + $0x14] sm:$0x1] }
  0x90   : > { %v336_v59 = vrot.slane %v335_v32, 2  ;;  %v345_v3 = vrot.slane %v344_v43, 2  ;;  %v361_v60 = vrot.slane %v360_v53, 2  ;;  %v296_v63 = vmax.f32 %v294_v50, %v295_v56 }
  0x91   : > { %v372_v61 = vadd.f32 %v371_v54, %v370_v48  ;;  %v288_v62 = vrot.slane %v287_v55, 2  ;;  %v312_v0 = vadd.f32 %v311_v57, %v310_v51  ;;  %v323_v1 = vrot.slane %v322_v58, 4 }
  0x92   : > { %v337_v2 = vmin.f32 %v335_v32, %v336_v59  ;;  %v346_v5 = vmax.f32 %v344_v43, %v345_v3  ;;  %v362_v7 = vadd.f32 %v361_v60, %v360_v53  ;;  %v297_v11 = vrot.slane %v296_v63, 2 }
  0x93   : > { %v373_v8 = vrot.slane %v372_v61, 2  ;;  %v289_v10 = vmin.f32 %v287_v55, %v288_v62  ;;  %v313_v12 = vrot.slane %v312_v0, 2  ;;  %v324_v13 = vadd.f32 %v323_v1, %v322_v58 }
  0x94   : > { %v338_v16 = vrot.slane %v337_v2, 1  ;;  %v347_v17 = vrot.slane %v346_v5, 1  ;;  %v363_v18 = vrot.slane %v362_v7, 1  ;;  %v298_v23 = vmax.f32 %v296_v63, %v297_v11 }
  0x95   : > { %v374_v19 = vadd.f32 %v373_v8, %v372_v61  ;;  %v290_v22 = vrot.slane %v289_v10, 1  ;;  %v314_v24 = vadd.f32 %v313_v12, %v312_v0  ;;  %v325_v25 = vrot.slane %v324_v13, 2 }
  0x96   : > { %v339_v26 = vmin.f32 %v337_v2, %v338_v16  ;;  %v348_v27 = vmax.f32 %v346_v5, %v347_v17  ;;  %v364_v28 = vadd.f32 %v363_v18, %v362_v7  ;;  %v299_v6 = vrot.slane %v298_v23, 1 }
  0x97   : > { %v375_v29 = vrot.slane %v374_v19, 1  ;;  %v291_v4 = vmin.f32 %v289_v10, %v290_v22  ;;  %v315_v33 = vrot.slane %v314_v24, 1  ;;  %v326_v34 = vadd.f32 %v325_v25, %v324_v13 }
  0x98   : > { %v350_v35 = vmin.f32 %v349_v14, %v339_v26  ;;  %v353_v9 = vmax.f32 %v352_v20, %v348_v27  ;;  %v365_v15 = vadd.f32 %v364_v28, %v357_v21  ;;  %v300_v39 = vmax.f32 %v298_v23, %v299_v6 }
  0x99   : > { %v376_v36 = vadd.f32 %v375_v29, %v374_v19  ;;  %v302_v40 = vmin.f32 %v301_v30, %v291_v4  ;;  %v316_v41 = vadd.f32 %v315_v33, %v314_v24  ;;  %v327_v44 = vrot.slane %v326_v34, 1 }
  0x9a   : > { %351 = vst [vmem:[%s697_s23 + $0x1] sm:$0x1] %v350_v35  ;;  %354 = vst [vmem:[%s697_s23 + $0x9] sm:$0x1] %v353_v9  ;;  %v305_v46 = vmax.f32 %v304_v37, %v300_v39 }
  0x9b   : > { %366 = vst [vmem:[%s697_s23 + $0x11] sm:$0x1] %v365_v15  ;;  %v377_v45 = vadd.f32 %v376_v36, %v367_v31  ;;  %303 = vst [vmem:[%s697_s23] sm:$0x1] %v302_v40  ;;  %v317_v47 = vadd.f32 %v316_v41, %v309_v38  ;;  %v328_v48 = vadd.f32 %v327_v44, %v326_v34 }
  0x9c   : > { %306 = vst [vmem:[%s697_s23 + $0x8] sm:$0x1] %v305_v46 }
  0x9d   : > { %378 = vst [vmem:[%s697_s23 + $0x15] sm:$0x1] %v377_v45  ;;  %318 = vst [vmem:[%s697_s23 + $0x10] sm:$0x1] %v317_v47  ;;  %v329_v49 = vadd.f32 %v328_v48, %v319_v42 }
  0x9f   : > { %330 = vst [vmem:[%s697_s23 + $0x14] sm:$0x1] %v329_v49 }
  0xa0 PF: > { %s12_s11 = sadd.s32 1, %s645_s11   ;;  %s857_s9 = smov %s641_s10 }
  0xa1   : > { %p9_p5 = scmp.ge.s32.totalorder %s12_s11, 4   ;;  %s858_s10 = smov %s860_s12 }
  0xa3   :  { %11 = sbr.rel (!%p9_p5) target bundleno = 2 (0x2), region = 67 }

// kernel: total_variation_loss.3
= control target key start
LH: loop header
LB: loop body
LE: loop exit
PB: predicated region body
PF: predicated region fallthrough
CT: control target
= control target key end

     0   :  { %s3328_s0 = inlined_call_operand.vmem [shape: f32[10], index: 0, kind: input, shape index: {}]   ;;  %s3329_s1 = inlined_call_operand.vmem [shape: f32[2,16,128], index: 1, kind: input, shape index: {}]   ;;  %s3330_s2 = inlined_call_operand.vmem [shape: f32[2,16,128], index: 2, kind: input, shape index: {}]   ;;  %s3331_s3 = inlined_call_operand.vmem [shape: f32[2,64,128], index: 3, kind: output, shape index: {}]  }
   0x1   :  { %3346 = sst [smem:[#allocation18_spill]] %s3328_s0 }
   0x2   :  { %3347 = sst [smem:[#allocation19_spill]] %s3329_s1 }
   0x3   :  { %3348 = sst [smem:[#allocation20_spill]] %s3330_s2 }
   0x4   :  { %3349 = sst [smem:[#allocation21_spill]] %s3331_s3 }
   0x5   :  { %8 = vsyncpa [#allocation3], 0  ;;  %s1810_s12 = smov 0   ;;  %s1812_s13 = smov 0  }
   0x6   :  { %s1814_s14 = smov 0  }
   0x7 LB: > { %3350 = sst [smem:[#allocation5_spill]] %s1781_s13  ;;  %s1670_s15 = sadd.s32 4294967295, %s1785_s14   ;;  %s1785_s14 = sphi %s1814_s14, %s14_s14   ;;  %s1781_s13 = sphi %s1812_s13, %s3424_s13   ;;  %s1777_s12 = sphi %s1810_s12, %s3423_s12  }
   0x8   : > { %3351 = sst [smem:[#allocation6_spill]] %s1785_s14  ;;  %s26_s16 = sadd.s32 1, %s1781_s13 }
   0x9   : > { %p28_p0 = scmp.ge.s32.totalorder %s26_s16, 2  ;;  %p1672_p1 = scmp.ge.s32.totalorder %s1785_s14, 1 }
   0xa   : > { %p134_p2 = scmp.lt.s32.totalorder %s1785_s14, 3  ;;  %p1835_p4 = scmp.eq.s32.totalorder %s1670_s15, 0 }
   0xb   : > { %s3426_s16 = smov (%p28_p0, %s26_s16), 0  ;;  %s3355_s0 = sld [smem:[#allocation18_spill]] }
   0xc   : > { %3352 = sst [smem:[#allocation7_spill]] %s3426_s16  ;;  %p1831_p3 = pnand %p1672_p1, %p134_p2 }
   0xe   : > { %p1705_p5 = pneg %p1831_p3 }
  0x10   : > { %p1706_p6 = pnand %p1835_p4, %p1705_p5 }
  0x11   : > { %s147_s21 = sshll.u32 %s3355_s0, 4  ;;  %s148_s21 = int_to_ptr.vmem [resolvable:$true] %s147_s21 }
  0x12   : > { %s1744_s22 = scalar_lea.vmem %s148_s21, 16  ;;  %p1746_p8 = pneg %p1706_p6 }
  0x13   : > { %p1745_p7 = scmp.ne.s32.totalorder %s148_s21, %s1744_s22  ;;  %p1752_p11 = scmp.lt.s32.totalorder %s148_s21, %s148_s21 }
  0x14   : > { %p1753_p12 = scmp.lt.s32.totalorder %s1744_s22, %s1744_s22 }
  0x15   : > { %p1747_p9 = pnand %p1746_p8, %p1745_p7 }
  0x16   : > { %p1754_p13 = por %p1753_p12, %p1752_p11 }
  0x17   : > { %p1748_p10 = pneg %p1747_p9 }
  0x19   : > { %p1755_p0 = pnand %p1754_p13, %p1748_p10 }
  0x1b   : > { %1758 = shalt.err (!%p1755_p0)
}
  0x1c   : > { %s1787_s23 = smov [#allocation2]   ;;  %180 = sbr.rel (%p1831_p3) target bundleno = 337 (0x151), region = 32 }
  0x1d   : > { %1708 = dma.vmem_to_smem (!%p1706_p6), %s148_s21, 16, %s1787_s23, [#allocation3]  }
  0x21   : > { %1772 = dma.done.wait (%p1835_p4), [#allocation3], 16  }
  0x22   : > { %1774 = vsyncadd (%p1835_p4), [#allocation3], 4294967280 }
  0x23   : > { %186 = sfence }
  0x24   : > { %p213_p1 = scmp.lt.s32.totalorder %s1777_s12, 1  ;;  %s3356_s2 = sld [smem:[#allocation20_spill]]  ;;  %v1789_v2 = vmov 0.0   ;;  %v369_v5 = vlaneseq }
  0x25   : > { %s3358_s1 = sld [smem:[#allocation19_spill]]  ;;  %s1788_s8 = smov 127  }
  0x26   : > { %s3428_s12 = smov (!%p213_p1, %s1777_s12), 1  ;;  %s3360_s3 = sld [smem:[#allocation21_spill]]  ;;  %v370_v6 = vshrl.u32 %v369_v5, 7  ;;  %v2011_v16 = vand.u32 127, %v369_v5 }
  0x27   : > { %s1698_s24 = sshll.u32 %s3428_s12, 4  ;;  %s1700_s25 = sshll.u32 %s3428_s12, 6 }
  0x28   : > { %s1901_s9 = sld [smem:[#allocation2 + $0x1]]  ;;  %v371_v7 = vadd.s32 8, %v370_v6  ;;  %vm403_vm0 = vcmp.lt.s32.totalorder %v370_v6, 7  ;;  %vm3344_vm2 = vcmp.lt.s32.totalorder %v2011_v16, 16 }
  0x29   : > { %s1903_s10 = sld [smem:[#allocation2]] }
  0x2a   : > { %s1857_s28 = scalar_lea.vmem %s3356_s2, %s1698_s24  ;;  %s1905_s11 = sld [smem:[#allocation2 + $0x2]]  ;;  %vm407_vm1 = vcmp.eq.s32.totalorder %v371_v7, 15  ;;  %vm386_vm3 = vcmp.lt.s32.totalorder %v371_v7, 15 }
  0x2b   : > { %3357 = sst [smem:[#allocation8_spill]] %s1857_s28  ;;  %s1862_s4 = scalar_lea.vmem %s3358_s1, %s1698_s24  ;;  %v1865_v0 = vld [vmem:[%s1857_s28] sm:$0xff]  ;;  %v1894_v3 = vld [vmem:[%s1857_s28 + $0x8] sm:$0xff]  ;;  %vm2089_vm4 = vmand %vm386_vm3, %vm3344_vm2 }
  0x2c   : > { %3359 = sst [smem:[#allocation9_spill]] %s1862_s4  ;;  %v1868_v1 = vld [vmem:[%s1862_s4] sm:$0xff]  ;;  %s1873_s7 = scalar_lea.vmem %s3360_s3, %s1700_s25  ;;  %395 = vrot.lane.b32.xlu1 %v1865_v0, %s1788_s8  ;;  %v1897_v4 = vld [vmem:[%s1862_s4 + $0x8] sm:$0xff]  ;;  %v416_v10 = vrot.slane %v1865_v0, 1  ;;  %v417_v11 = vrot.slane %v1894_v3, 1 }
  0x2d   : > { %3361 = sst [smem:[#allocation10_spill]] %s1873_s7  ;;  %389 = vrot.lane.b32.xlu0 %v1868_v1, %s1788_s8  ;;  %235 = vst [vmem:[%s1873_s7] sm:$0xff] %v1789_v2  ;;  %236 = vst [vmem:[%s1873_s7 + $0x8] sm:$0xff] %v1789_v2  ;;  %v401_v8 = vrot.slane %v1868_v1, 1  ;;  %v402_v9 = vrot.slane %v1897_v4, 1  ;;  %v1694_v12 = vld [vmem:[%s1862_s4 + $0xf] ss:$0 sm:$0xff] }
  0x2e   : > { %237 = vst [vmem:[%s1873_s7 + $0x10] sm:$0xff] %v1789_v2  ;;  %238 = vst [vmem:[%s1873_s7 + $0x18] sm:$0xff] %v1789_v2  ;;  %s245_s12 = smul.f32 0.0, %s1901_s9  ;;  %s1908_s15 = sld [smem:[#allocation2 + $0x3]]  ;;  %v1695_v14 = vld [vmem:[%s1857_s28 + $0xf] ss:$0 sm:$0xff]  ;;  %v419_v15 = vsel %vm403_vm0, %v417_v11, %v416_v10  ;;  %v2019_v19 = vsel %vm403_vm0, %v416_v10, %v417_v11 }
  0x2f   : > { %239 = vst [vmem:[%s1873_s7 + $0x20] sm:$0xff] %v1789_v2  ;;  %240 = vst [vmem:[%s1873_s7 + $0x28] sm:$0xff] %v1789_v2  ;;  %3362 = sst [smem:[#allocation11_spill]] %s1903_s10  ;;  %s248_s17 = smul.f32 2.0, %s1901_s9  ;;  %v405_v13 = vsel %vm403_vm0, %v402_v9, %v401_v8  ;;  %v404_v17 = vsel %vm403_vm0, %v401_v8, %v402_v9  ;;  %v2021_v20 = vsel %vm407_vm1, %v1695_v14, %v419_v15  ;;  %v428_v23 = vstv %s1903_s10 }
  0x30   : > { %241 = vst [vmem:[%s1873_s7 + $0x30] sm:$0xff] %v1789_v2  ;;  %242 = vst [vmem:[%s1873_s7 + $0x38] sm:$0xff] %v1789_v2  ;;  %397 = vrot.lane.b32.xlu1 %v1894_v3, %s1788_s8  ;;  %s1911_s18 = sld [smem:[#allocation2 + $0x4]]  ;;  %s250_s20 = smul.f32 3.0, %s1901_s9  ;;  %v413_v18 = vsel %vm407_vm1, %v1694_v12, %v405_v13  ;;  %v414_v21 = vsub.f32 %v1868_v1, %v404_v17  ;;  %v426_v25 = vsub.f32 %v1865_v0, %v2019_v19 }
  0x31   : > { %391 = vrot.lane.b32.xlu0 %v1897_v4, %s1788_s8  ;;  %s252_s21 = smul.f32 4.0, %s1901_s9  ;;  %s1917_s22 = sld [smem:[#allocation2 + $0x5]]  ;;  %v415_v22 = vsub.f32 %v1897_v4, %v413_v18  ;;  %v427_v26 = vsub.f32 %v1894_v3, %v2021_v20  ;;  %v622_v38 = vstv %s1905_s11 }
  0x32   : > { %s1920_s23 = sadd.f32 %s245_s12, %s1903_s10  ;;  %s254_s24 = smul.f32 5.0, %s1901_s9 }
  0x33   : > { %s1924_s25 = sadd.f32 %s248_s17, %s1903_s10  ;;  %s256_s26 = smul.f32 6.0, %s1901_s9 }
  0x34   : > { %3363 = sst [smem:[#allocation12_spill]] %s1920_s23  ;;  %s258_s29 = smul.f32 7.0, %s1901_s9  ;;  %v431_v27 = vstv %s1920_s23 }
  0x35   : > { %s1928_s27 = sadd.f32 %s250_s20, %s1903_s10  ;;  %s260_s5 = smul.f32 8.0, %s1901_s9  ;;  %v2050_v28 = vstv %s1924_s25 }
  0x36   : > { %s1932_s30 = sadd.f32 %s252_s21, %s1903_s10  ;;  %s262_s8 = smul.f32 9.0, %s1901_s9  ;;  %v816_v48 = vstv %s1911_s18 }
  0x37   : > { %s1936_s6 = sadd.f32 %s254_s24, %s1903_s10  ;;  %s264_s17 = smul.f32 10.0, %s1901_s9  ;;  %v2057_v29 = vstv %s1928_s27  ;;  %v2137_v50 = vsel %vm3344_vm2, %v414_v21, %v816_v48  ;;  %v2141_v51 = vsel %vm2089_vm4, %v415_v22, %v816_v48 }
  0x38   : > { %s1940_s12 = sadd.f32 %s256_s26, %s1903_s10  ;;  %s268_s19 = smul.f32 0.0, %s1908_s15  ;;  %v2060_v30 = vstv %s1932_s30 }
  0x39   : > { %s1944_s20 = sadd.f32 %s258_s29, %s1903_s10  ;;  %s271_s24 = smul.f32 2.0, %s1908_s15  ;;  %v2063_v31 = vstv %s1936_s6 }
  0x3a   : > { %s1948_s21 = sadd.f32 %s260_s5, %s1903_s10  ;;  %s273_s2 = smul.f32 3.0, %s1908_s15  ;;  %v2066_v32 = vstv %s1940_s12 }
  0x3b   : > { %s1951_s0 = sadd.f32 %s262_s8, %s1903_s10  ;;  %s275_s3 = smul.f32 4.0, %s1908_s15  ;;  %v2073_v33 = vstv %s1944_s20 }
  0x3c   : > { %s1955_s1 = sadd.f32 %s264_s17, %s1903_s10  ;;  %s277_s13 = smul.f32 5.0, %s1908_s15  ;;  %v2076_v34 = vstv %s1948_s21 }
  0x3d   : > { %s1959_s26 = sadd.f32 %s1905_s11, %s268_s19  ;;  %s279_s17 = smul.f32 6.0, %s1908_s15  ;;  %v2079_v35 = vstv %s1951_s0 }
  0x3e   : > { %s1965_s29 = sadd.f32 %s1905_s11, %s271_s24  ;;  %s281_s14 = smul.f32 7.0, %s1908_s15  ;;  %v605_v36 = vstv %s1955_s1 }
  0x3f   : > { %s1969_s5 = sadd.f32 %s1905_s11, %s273_s2  ;;  %s283_s2 = smul.f32 8.0, %s1908_s15  ;;  %v625_v39 = vstv %s1959_s26 }
  0x40   : > { %s1972_s8 = sadd.f32 %s1905_s11, %s275_s3  ;;  %s291_s3 = smul.f32 0.0, %s1917_s22  ;;  %v2101_v41 = vstv %s1965_s29 }
  0x41   : > { %3364 = sst [smem:[#allocation13_spill]] %s1969_s5  ;;  %s296_s5 = smul.f32 3.0, %s1917_s22 }
  0x42   : > { %3365 = sst [smem:[#allocation14_spill]] %s1972_s8  ;;  %s302_s12 = smul.f32 6.0, %s1917_s22 }
  0x43   : > { %s1976_s7 = sld [smem:[#allocation2 + $0x7]] }
  0x44   : > { %s1981_s19 = sadd.f32 %s1905_s11, %s277_s13  ;;  %s294_s13 = smul.f32 2.0, %s1917_s22 }
  0x45   : > { %s1987_s24 = sld [smem:[#allocation2 + $0x6]] }
  0x46   : > { %3366 = sst [smem:[#allocation15_spill]] %s1981_s19 }
  0x47   : > { %s1990_s16 = sadd.f32 %s1905_s11, %s279_s17 }
  0x48   : > { %s1993_s8 = sadd.f32 %s1905_s11, %s281_s14 }
  0x49   : > { %3367 = sst [smem:[#allocation16_spill]] %s1990_s16  ;;  %s321_s28 = smul.f32 4.0, %s1976_s7 }
  0x4a   : > { %3368 = sst [smem:[#allocation17_spill]] %s1993_s8  ;;  %s323_s16 = smul.f32 5.0, %s1976_s7 }
  0x4b   : > { %s1999_s19 = sadd.f32 %s1905_s11, %s283_s2  ;;  %s325_s8 = smul.f32 6.0, %s1976_s7  ;;  %v1010_v49 = vstv %s1987_s24 }
  0x4c   : > { %s2005_s17 = sadd.f32 %s1911_s18, %s291_s3  ;;  %s331_s4 = smul.f32 9.0, %s1976_s7 }
  0x4d   : > { %s2015_s2 = sadd.f32 %s1911_s18, %s294_s13  ;;  %s333_s6 = smul.f32 10.0, %s1976_s7  ;;  %v2126_v47 = vstv %s1999_s19 }
  0x4e   : > { %s2024_s3 = sadd.f32 %s1911_s18, %s296_s5  ;;  %v819_v52 = vstv %s2005_s17  ;;  %s304_s17 = smul.f32 7.0, %s1917_s22 }
  0x4f   : > { %s2029_s13 = sadd.f32 %s1987_s24, %s321_s28  ;;  %s327_s28 = smul.f32 7.0, %s1976_s7  ;;  %vm820_vm5 = vcmp.gt.f32.partialorder %v2137_v50, %v819_v52  ;;  %vm821_vm6 = vcmp.gt.f32.partialorder %v2141_v51, %v819_v52  ;;  %v841_v54 = vstv %s2015_s2 }
  0x50   : > { %s3369_s5 = sadd.f32 %s1901_s9, %s1903_s10  ;;  %v860_v55 = vstv %s2024_s3  ;;  %vm842_vm13 = vcmp.lt.f32.partialorder %v2137_v50, %v841_v54  ;;  %vm843_vm14 = vcmp.lt.f32.partialorder %v2141_v51, %v841_v54  ;;  %vm858_vm15 = vcmp.gt.f32.partialorder %v2137_v50, %v841_v54  ;;  %s306_s2 = smul.f32 8.0, %s1917_s22 }
  0x51   : > { %s2041_s14 = sadd.f32 %s1987_s24, %s323_s16  ;;  %s329_s16 = smul.f32 8.0, %s1976_s7  ;;  %vm859_vm1 = vcmp.gt.f32.partialorder %v2141_v51, %v841_v54  ;;  %vm861_vm3 = vcmp.lt.f32.partialorder %v2137_v50, %v860_v55 }
  0x52   : > { %v2038_v24 = vstv %s3369_s5  ;;  %s2053_s9 = sadd.f32 %s1987_s24, %s325_s8 }
  0x53   : > { %s3370_s25 = sld [smem:[#allocation13_spill]] }
  0x54   : > { %s2069_s5 = sadd.f32 %s1987_s24, %s327_s28 }
  0x55   : > { %s3371_s8 = sld [smem:[#allocation14_spill]] }
  0x56   : > { %s3372_s23 = sld [smem:[#allocation15_spill]] }
  0x57   : > { %s3373_s10 = sld [smem:[#allocation16_spill]] }
  0x58   : > { %s3374_s27 = sld [smem:[#allocation17_spill]] }
  0x59   : > { %s2083_s30 = sadd.f32 %s1987_s24, %s329_s16  ;;  %v2108_v42 = vstv %s3370_s25 }
  0x5a   : > { %s3377_s0 = sadd.f32 %s1908_s15, %s1905_s11 }
  0x5b   : > { %s2105_s20 = sadd.f32 %s1987_s24, %s331_s4  ;;  %v2111_v43 = vstv %s3371_s8  ;;  %s3378_s4 = smul.f32 4.0, %s1917_s22 }
  0x5c   : > { %v2098_v40 = vstv %s3377_s0  ;;  %v2114_v44 = vstv %s3372_s23  ;;  %s2120_s21 = sadd.f32 %s1987_s24, %s333_s6  ;;  %s3380_s23 = smul.f32 5.0, %s1917_s22 }
  0x5d   : > { %v2117_v45 = vstv %s3373_s10  ;;  %s2133_s29 = sadd.f32 %s1911_s18, %s3378_s4  ;;  %s308_s8 = smul.f32 9.0, %s1917_s22 }
  0x5e   : > { %v2123_v46 = vstv %s3374_s27  ;;  %s3379_s10 = sadd.f32 %s1917_s22, %s1911_s18  ;;  %s310_s6 = smul.f32 10.0, %s1917_s22 }
  0x5f   : > { %s301_s19 = sadd.f32 %s1911_s18, %s3380_s23  ;;  %v879_v61 = vstv %s2133_s29  ;;  %s314_s22 = smul.f32 0.0, %s1976_s7 }
  0x60   : > { %v822_v53 = vstv %s3379_s10  ;;  %s303_s28 = sadd.f32 %s1911_s18, %s302_s12  ;;  %s317_s12 = smul.f32 2.0, %s1976_s7 }
  0x61   : > { %vm823_vm7 = vcmp.lt.f32.partialorder %v2137_v50, %v822_v53  ;;  %vm824_vm8 = vcmp.lt.f32.partialorder %v2141_v51, %v822_v53  ;;  %vm839_vm10 = vcmp.gt.f32.partialorder %v2137_v50, %v822_v53  ;;  %vm840_vm11 = vcmp.gt.f32.partialorder %v2141_v51, %v822_v53  ;;  %s305_s3 = sadd.f32 %s1911_s18, %s304_s17  ;;  %s319_s29 = smul.f32 3.0, %s1976_s7 }
  0x62   : > { %vm825_vm9 = vmand %vm820_vm5, %vm823_vm7  ;;  %vm862_vm5 = vcmp.lt.f32.partialorder %v2141_v51, %v860_v55  ;;  %vm877_vm7 = vcmp.gt.f32.partialorder %v2137_v50, %v860_v55  ;;  %v898_v62 = vstv %s301_s19  ;;  %v2172_v63 = vstv %s303_s28  ;;  %s307_s16 = sadd.f32 %s1911_s18, %s306_s2 }
  0x63   : > { %vm826_vm12 = vmand %vm821_vm6, %vm824_vm8  ;;  %v827_v56 = vsel %vm825_vm9, 1.0, %v1789_v2  ;;  %vm878_vm8 = vcmp.gt.f32.partialorder %v2141_v51, %v860_v55  ;;  %s3381_s25 = sld [smem:[#allocation10_spill]] }
  0x64   : > { %v828_v57 = vsel %vm826_vm12, 1.0, %v1789_v2  ;;  %vm844_vm0 = vmand %vm839_vm10, %vm842_vm13  ;;  %vm881_vm12 = vcmp.lt.f32.partialorder %v2141_v51, %v879_v61  ;;  %s309_s27 = sadd.f32 %s1911_s18, %s308_s8 }
  0x65   : > { %v829_v58 = vadd.f32 %v828_v57, %v827_v56  ;;  %vm845_vm6 = vmand %vm840_vm11, %vm843_vm14  ;;  %v846_v59 = vsel %vm844_vm0, 1.0, %v1789_v2  ;;  %vm880_vm11 = vcmp.lt.f32.partialorder %v2137_v50, %v879_v61  ;;  %vm896_vm14 = vcmp.gt.f32.partialorder %v2137_v50, %v879_v61  ;;  %s2247_s0 = sadd.f32 %s1911_s18, %s310_s6 }
  0x66   : > { %v847_v60 = vsel %vm845_vm6, 1.0, %v1789_v2  ;;  %vm863_vm9 = vmand %vm858_vm15, %vm861_vm3  ;;  %vm897_vm15 = vcmp.gt.f32.partialorder %v2141_v51, %v879_v61  ;;  %vm900_vm3 = vcmp.lt.f32.partialorder %v2141_v51, %v898_v62  ;;  %s2262_s18 = sadd.f32 %s1987_s24, %s314_s22 }
  0x67   : > { %v830_v5 = vrot.slane %v829_v58, 4  ;;  %v848_v6 = vadd.f32 %v847_v60, %v846_v59  ;;  %vm864_vm10 = vmand %vm859_vm1, %vm862_vm5  ;;  %v865_v7 = vsel %vm863_vm9, 1.0, %v1789_v2  ;;  %vm899_vm1 = vcmp.lt.f32.partialorder %v2137_v50, %v898_v62  ;;  %s316_s4 = sadd.f32 %s1976_s7, %s1987_s24 }
  0x68   : > { %v866_v8 = vsel %vm864_vm10, 1.0, %v1789_v2  ;;  %vm882_vm13 = vmand %vm877_vm7, %vm880_vm11  ;;  %vm915_vm5 = vcmp.gt.f32.partialorder %v2137_v50, %v898_v62  ;;  %vm918_vm9 = vcmp.lt.f32.partialorder %v2137_v50, %v2172_v63  ;;  %vm919_vm10 = vcmp.lt.f32.partialorder %v2141_v51, %v2172_v63  ;;  %s318_s7 = sadd.f32 %s1987_s24, %s317_s12 }
  0x69   : > { %v831_v9 = vadd.f32 %v830_v5, %v829_v58  ;;  %v849_v10 = vrot.slane %v848_v6, 4  ;;  %v867_v11 = vadd.f32 %v866_v8, %v865_v7  ;;  %vm883_vm0 = vmand %vm878_vm8, %vm881_vm12  ;;  %v884_v12 = vsel %vm882_vm13, 1.0, %v1789_v2  ;;  %v836_v7 = vld [vmem:[%s3381_s25 + $0x14] sm:$0x1]  ;;  %s320_s10 = sadd.f32 %s1987_s24, %s319_s29  ;;  %s285_s24 = smul.f32 9.0, %s1908_s15 }
  0x6a   : > { %v885_v13 = vsel %vm883_vm0, 1.0, %v1789_v2  ;;  %vm901_vm6 = vmand %vm896_vm14, %vm899_vm1  ;;  %vm916_vm8 = vcmp.gt.f32.partialorder %v2141_v51, %v898_v62  ;;  %vm934_vm13 = vcmp.gt.f32.partialorder %v2137_v50, %v2172_v63  ;;  %vm935_vm14 = vcmp.gt.f32.partialorder %v2141_v51, %v2172_v63  ;;  %s2800_s1 = sld [smem:[#allocation2 + $0x9]] }
  0x6b   : > { %v832_v14 = vrot.slane %v831_v9, 2  ;;  %v850_v15 = vadd.f32 %v849_v10, %v848_v6  ;;  %v868_v17 = vrot.slane %v867_v11, 4  ;;  %v886_v18 = vadd.f32 %v885_v13, %v884_v12  ;;  %vm902_vm7 = vmand %vm897_vm15, %vm900_vm3 }
  0x6c   : > { %v903_v21 = vsel %vm901_vm6, 1.0, %v1789_v2  ;;  %vm920_vm11 = vmand %vm915_vm5, %vm918_vm9  ;;  %v904_v54 = vsel %vm902_vm7, 1.0, %v1789_v2  ;;  %v936_v62 = vstv %s305_s3  ;;  %v2214_v5 = vstv %s307_s16 }
  0x6d   : > { %v833_v22 = vadd.f32 %v832_v14, %v831_v9  ;;  %v851_v48 = vrot.slane %v850_v15, 2  ;;  %v869_v52 = vadd.f32 %v868_v17, %v867_v11  ;;  %v887_v53 = vrot.slane %v886_v18, 4  ;;  %vm921_vm12 = vmand %vm916_vm8, %vm919_vm10  ;;  %v855_v11 = vld [vmem:[%s3381_s25 + $0x15] sm:$0x1] }
  0x6e   : > { %v922_v55 = vsel %vm920_vm11, 1.0, %v1789_v2  ;;  %v905_v60 = vadd.f32 %v904_v54, %v903_v21  ;;  %v923_v61 = vsel %vm921_vm12, 1.0, %v1789_v2  ;;  %vm937_vm15 = vcmp.lt.f32.partialorder %v2137_v50, %v936_v62  ;;  %v874_v21 = vld [vmem:[%s3381_s25 + $0x16] sm:$0x1] }
  0x6f   : > { %v834_v56 = vrot.slane %v833_v22, 1  ;;  %v852_v57 = vadd.f32 %v851_v48, %v850_v15  ;;  %v870_v58 = vrot.slane %v869_v52, 2  ;;  %v888_v59 = vadd.f32 %v887_v53, %v886_v18  ;;  %vm939_vm1 = vmand %vm934_vm13, %vm937_vm15 }
  0x70   : > { %v906_v12 = vrot.slane %v905_v60, 4  ;;  %v924_v13 = vadd.f32 %v923_v61, %v922_v55  ;;  %vm938_vm0 = vcmp.lt.f32.partialorder %v2141_v51, %v936_v62  ;;  %vm953_vm5 = vcmp.gt.f32.partialorder %v2137_v50, %v936_v62  ;;  %s337_s26 = smul.f32 0.0, %s2800_s1 }
  0x71   : > { %v835_v6 = vadd.f32 %v834_v56, %v833_v22  ;;  %v853_v8 = vrot.slane %v852_v57, 1  ;;  %v871_v9 = vadd.f32 %v870_v58, %v869_v52  ;;  %v889_v10 = vrot.slane %v888_v59, 2  ;;  %vm940_vm3 = vmand %vm935_vm14, %vm938_vm0  ;;  %s342_s19 = smul.f32 3.0, %s2800_s1 }
  0x72   : > { %v907_v22 = vadd.f32 %v906_v12, %v905_v60  ;;  %v925_v48 = vrot.slane %v924_v13, 4  ;;  %v941_v52 = vsel %vm939_vm1, 1.0, %v1789_v2  ;;  %v942_v56 = vsel %vm940_vm3, 1.0, %v1789_v2  ;;  %s344_s17 = smul.f32 4.0, %s2800_s1 }
  0x73   : > { %v837_v14 = vadd.f32 %v836_v7, %v835_v6  ;;  %v854_v15 = vadd.f32 %v853_v8, %v852_v57  ;;  %v872_v17 = vrot.slane %v871_v9, 1  ;;  %v890_v18 = vadd.f32 %v889_v10, %v888_v59  ;;  %v893_v57 = vld [vmem:[%s3381_s25 + $0x17] sm:$0x1]  ;;  %s346_s16 = smul.f32 5.0, %s2800_s1 }
  0x74   : > { %v908_v58 = vrot.slane %v907_v22, 2  ;;  %v926_v63 = vadd.f32 %v925_v48, %v924_v13  ;;  %v943_v59 = vadd.f32 %v942_v56, %v941_v52  ;;  %vm954_vm6 = vcmp.gt.f32.partialorder %v2141_v51, %v936_v62  ;;  %v931_v48 = vld [vmem:[%s3381_s25 + $0x19] sm:$0x1]  ;;  %s348_s8 = smul.f32 6.0, %s2800_s1 }
  0x75   : > { %838 = vst [vmem:[%s3381_s25 + $0x14] sm:$0x1] %v837_v14  ;;  %v856_v53 = vadd.f32 %v855_v11, %v854_v15  ;;  %v873_v54 = vadd.f32 %v872_v17, %v871_v9  ;;  %v891_v55 = vrot.slane %v890_v18, 1  ;;  %vm956_vm7 = vcmp.lt.f32.partialorder %v2137_v50, %v2214_v5  ;;  %v912_v17 = vld [vmem:[%s3381_s25 + $0x18] sm:$0x1]  ;;  %s350_s6 = smul.f32 7.0, %s2800_s1 }
  0x76   : > { %vm957_vm8 = vcmp.lt.f32.partialorder %v2141_v51, %v2214_v5  ;;  %v909_v6 = vadd.f32 %v908_v58, %v907_v22  ;;  %v927_v7 = vrot.slane %v926_v63, 2  ;;  %v944_v8 = vrot.slane %v943_v59, 4  ;;  %vm958_vm9 = vmand %vm953_vm5, %vm956_vm7  ;;  %s354_s12 = smul.f32 9.0, %s2800_s1 }
  0x77   : > { %857 = vst [vmem:[%s3381_s25 + $0x15] sm:$0x1] %v856_v53  ;;  %v875_v60 = vadd.f32 %v874_v21, %v873_v54  ;;  %v892_v61 = vadd.f32 %v891_v55, %v890_v18  ;;  %vm972_vm10 = vcmp.gt.f32.partialorder %v2137_v50, %v2214_v5  ;;  %vm959_vm11 = vmand %vm954_vm6, %vm957_vm8  ;;  %v960_v10 = vsel %vm958_vm9, 1.0, %v1789_v2 }
  0x78   : > { %vm973_vm12 = vcmp.gt.f32.partialorder %v2141_v51, %v2214_v5  ;;  %v974_v11 = vstv %s309_s27  ;;  %v910_v12 = vrot.slane %v909_v6, 1  ;;  %v928_v13 = vadd.f32 %v927_v7, %v926_v63 }
  0x79   : > { %876 = vst [vmem:[%s3381_s25 + $0x16] sm:$0x1] %v875_v60  ;;  %v894_v9 = vadd.f32 %v893_v57, %v892_v61  ;;  %v945_v14 = vadd.f32 %v944_v8, %v943_v59  ;;  %v961_v15 = vsel %vm959_vm11, 1.0, %v1789_v2  ;;  %vm975_vm13 = vcmp.lt.f32.partialorder %v2137_v50, %v974_v11 }
  0x7a   : > { %v962_v18 = vadd.f32 %v961_v15, %v960_v10  ;;  %vm976_vm14 = vcmp.lt.f32.partialorder %v2141_v51, %v974_v11  ;;  %vm991_vm15 = vcmp.gt.f32.partialorder %v2137_v50, %v974_v11  ;;  %v911_v62 = vadd.f32 %v910_v12, %v909_v6  ;;  %vm977_vm0 = vmand %vm972_vm10, %vm975_vm13  ;;  %v950_v6 = vld [vmem:[%s3381_s25 + $0x1a] sm:$0x1]  ;;  %v969_v15 = vld [vmem:[%s3381_s25 + $0x1b] sm:$0x1] }
  0x7b   : > { %895 = vst [vmem:[%s3381_s25 + $0x17] sm:$0x1] %v894_v9  ;;  %v929_v21 = vrot.slane %v928_v13, 1  ;;  %v946_v22 = vrot.slane %v945_v14, 2  ;;  %vm992_vm1 = vcmp.gt.f32.partialorder %v2141_v51, %v974_v11  ;;  %vm978_vm3 = vmand %vm973_vm12, %vm976_vm14  ;;  %v979_v53 = vsel %vm977_vm0, 1.0, %v1789_v2 }
  0x7c   : > { %v963_v52 = vrot.slane %v962_v18, 4  ;;  %v993_v54 = vstv %s2247_s0  ;;  %v2282_v55 = vsel %vm3344_vm2, %v426_v25, %v1010_v49  ;;  %v913_v56 = vadd.f32 %v912_v17, %v911_v62 }
  0x7d   : > { %v930_v5 = vadd.f32 %v929_v21, %v928_v13  ;;  %v947_v57 = vadd.f32 %v946_v22, %v945_v14  ;;  %v980_v58 = vsel %vm978_vm3, 1.0, %v1789_v2  ;;  %vm994_vm5 = vcmp.lt.f32.partialorder %v2137_v50, %v993_v54 }
  0x7e   : > { %v964_v63 = vadd.f32 %v963_v52, %v962_v18  ;;  %v981_v59 = vadd.f32 %v980_v58, %v979_v53  ;;  %vm995_vm6 = vcmp.lt.f32.partialorder %v2141_v51, %v993_v54  ;;  %914 = vst [vmem:[%s3381_s25 + $0x18] sm:$0x1] %v913_v56  ;;  %vm996_vm7 = vmand %vm991_vm15, %vm994_vm5  ;;  %v2300_v60 = vsel %vm2089_vm4, %v427_v26, %v1010_v49  ;;  %v988_v58 = vld [vmem:[%s3381_s25 + $0x1c] sm:$0x1] }
  0x7f   : > { %v932_v19 = vadd.f32 %v931_v48, %v930_v5  ;;  %v948_v25 = vrot.slane %v947_v57, 1  ;;  %v1013_v61 = vstv %s2262_s18  ;;  %vm997_vm8 = vmand %vm992_vm1, %vm995_vm6  ;;  %v998_v9 = vsel %vm996_vm7, 1.0, %v1789_v2  ;;  %s352_s18 = smul.f32 8.0, %s2800_s1 }
  0x80   : > { %v965_v7 = vrot.slane %v964_v63, 2  ;;  %v982_v8 = vrot.slane %v981_v59, 4  ;;  %vm1014_vm9 = vcmp.gt.f32.partialorder %v2282_v55, %v1013_v61  ;;  %v999_v20 = vsel %vm997_vm8, 1.0, %v1789_v2 }
  0x81   : > { %933 = vst [vmem:[%s3381_s25 + $0x19] sm:$0x1] %v932_v19  ;;  %v949_v50 = vadd.f32 %v948_v25, %v947_v57  ;;  %vm1015_vm4 = vcmp.gt.f32.partialorder %v2300_v60, %v1013_v61  ;;  %v1016_v26 = vstv %s316_s4  ;;  %v1000_v10 = vadd.f32 %v999_v20, %v998_v9  ;;  %s356_s4 = smul.f32 10.0, %s2800_s1 }
  0x82   : > { %v966_v37 = vadd.f32 %v965_v7, %v964_v63  ;;  %v983_v49 = vadd.f32 %v982_v8, %v981_v59  ;;  %vm1017_vm10 = vcmp.lt.f32.partialorder %v2282_v55, %v1016_v26  ;;  %vm1018_vm11 = vcmp.lt.f32.partialorder %v2300_v60, %v1016_v26 }
  0x83   : > { %v951_v51 = vadd.f32 %v950_v6, %v949_v50  ;;  %vm1019_vm12 = vmand %vm1014_vm9, %vm1017_vm10  ;;  %vm1033_vm13 = vcmp.gt.f32.partialorder %v2282_v55, %v1016_v26  ;;  %vm1034_vm14 = vcmp.gt.f32.partialorder %v2300_v60, %v1016_v26  ;;  %v1001_v13 = vrot.slane %v1000_v10, 4  ;;  %v1007_v26 = vld [vmem:[%s3381_s25 + $0x1d] sm:$0x1] }
  0x84   : > { %v967_v11 = vrot.slane %v966_v37, 1  ;;  %v984_v12 = vrot.slane %v983_v49, 2  ;;  %vm1020_vm15 = vmand %vm1015_vm4, %vm1018_vm11  ;;  %v1021_v14 = vsel %vm1019_vm12, 1.0, %v1789_v2  ;;  %v1035_v18 = vstv %s318_s7 }
  0x85   : > { %952 = vst [vmem:[%s3381_s25 + $0x1a] sm:$0x1] %v951_v51  ;;  %v1022_v17 = vsel %vm1020_vm15, 1.0, %v1789_v2  ;;  %v1054_v62 = vstv %s320_s10  ;;  %v2322_v21 = vstv %s2029_s13  ;;  %v1002_v52 = vadd.f32 %v1001_v13, %v1000_v10  ;;  %s286_s13 = sadd.f32 %s1905_s11, %s285_s24 }
  0x86   : > { %v968_v22 = vadd.f32 %v967_v11, %v966_v37  ;;  %v985_v48 = vadd.f32 %v984_v12, %v983_v49  ;;  %v1023_v53 = vadd.f32 %v1022_v17, %v1021_v14  ;;  %vm1036_vm0 = vcmp.lt.f32.partialorder %v2282_v55, %v1035_v18  ;;  %s3417_s24 = sld [smem:[#allocation8_spill]] }
  0x87   : > { %vm1037_vm1 = vcmp.lt.f32.partialorder %v2300_v60, %v1035_v18  ;;  %vm1052_vm3 = vcmp.gt.f32.partialorder %v2282_v55, %v1035_v18  ;;  %vm1053_vm5 = vcmp.gt.f32.partialorder %v2300_v60, %v1035_v18  ;;  %v1003_v5 = vrot.slane %v1002_v52, 2  ;;  %vm1038_vm6 = vmand %vm1033_vm13, %vm1036_vm0 }
  0x88   : > { %v970_v54 = vadd.f32 %v969_v15, %v968_v22  ;;  %v986_v56 = vrot.slane %v985_v48, 1  ;;  %v1024_v57 = vrot.slane %v1023_v53, 4  ;;  %vm1039_vm7 = vmand %vm1034_vm14, %vm1037_vm1  ;;  %v1040_v63 = vsel %vm1038_vm6, 1.0, %v1789_v2 }
  0x89   : > { %vm1055_vm8 = vcmp.lt.f32.partialorder %v2282_v55, %v1054_v62  ;;  %vm1056_vm9 = vcmp.lt.f32.partialorder %v2300_v60, %v1054_v62  ;;  %vm1071_vm4 = vcmp.gt.f32.partialorder %v2282_v55, %v1054_v62  ;;  %v1004_v19 = vadd.f32 %v1003_v5, %v1002_v52 }
  0x8a   : > { %971 = vst [vmem:[%s3381_s25 + $0x1b] sm:$0x1] %v970_v54  ;;  %v987_v59 = vadd.f32 %v986_v56, %v985_v48  ;;  %v1025_v25 = vadd.f32 %v1024_v57, %v1023_v53  ;;  %v1041_v61 = vsel %vm1039_vm7, 1.0, %v1789_v2  ;;  %vm1057_vm10 = vmand %vm1052_vm3, %vm1055_vm8  ;;  %vm1072_vm12 = vcmp.gt.f32.partialorder %v2300_v60, %v1054_v62  ;;  %v1030_v62 = vld [vmem:[%s3381_s25 + $0x1e] sm:$0x1] }
  0x8b   : > { %v1042_v6 = vadd.f32 %v1041_v61, %v1040_v63  ;;  %vm1058_vm11 = vmand %vm1053_vm5, %vm1056_vm9  ;;  %v1059_v7 = vsel %vm1057_vm10, 1.0, %v1789_v2  ;;  %vm1074_vm13 = vcmp.lt.f32.partialorder %v2282_v55, %v2322_v21  ;;  %v1005_v9 = vrot.slane %v1004_v19, 1 }
  0x8c   : > { %v989_v8 = vadd.f32 %v988_v58, %v987_v59  ;;  %v1026_v50 = vrot.slane %v1025_v25, 2  ;;  %v1060_v20 = vsel %vm1058_vm11, 1.0, %v1789_v2  ;;  %vm1076_vm14 = vmand %vm1071_vm4, %vm1074_vm13  ;;  %vm1075_vm15 = vcmp.lt.f32.partialorder %v2300_v60, %v2322_v21 }
  0x8d   : > { %v1043_v37 = vrot.slane %v1042_v6, 4  ;;  %v1061_v49 = vadd.f32 %v1060_v20, %v1059_v7  ;;  %v1078_v10 = vsel %vm1076_vm14, 1.0, %v1789_v2  ;;  %v1006_v51 = vadd.f32 %v1005_v9, %v1004_v19  ;;  %vm1077_vm0 = vmand %vm1072_vm12, %vm1075_vm15 }
  0x8e   : > { %990 = vst [vmem:[%s3381_s25 + $0x1c] sm:$0x1] %v989_v8  ;;  %v1027_v11 = vadd.f32 %v1026_v50, %v1025_v25  ;;  %vm1090_vm1 = vcmp.gt.f32.partialorder %v2282_v55, %v2322_v21  ;;  %vm1091_vm3 = vcmp.gt.f32.partialorder %v2300_v60, %v2322_v21  ;;  %v1079_v14 = vsel %vm1077_vm0, 1.0, %v1789_v2 }
  0x8f   : > { %v1044_v12 = vadd.f32 %v1043_v37, %v1042_v6  ;;  %v1062_v13 = vrot.slane %v1061_v49, 4  ;;  %v1092_v15 = vstv %s2041_s14  ;;  %v1008_v17 = vadd.f32 %v1007_v26, %v1006_v51  ;;  %s287_s14 = smul.f32 10.0, %s1908_s15  ;;  %v1049_v6 = vld [vmem:[%s3381_s25 + $0x1f] sm:$0x1] }
  0x90   : > { %v1028_v18 = vrot.slane %v1027_v11, 1  ;;  %v1080_v22 = vadd.f32 %v1079_v14, %v1078_v10  ;;  %vm1093_vm5 = vcmp.lt.f32.partialorder %v2282_v55, %v1092_v15  ;;  %vm1094_vm6 = vcmp.lt.f32.partialorder %v2300_v60, %v1092_v15 }
  0x91   : > { %v1045_v48 = vrot.slane %v1044_v12, 2  ;;  %v1063_v52 = vadd.f32 %v1062_v13, %v1061_v49  ;;  %vm1095_vm7 = vmand %vm1090_vm1, %vm1093_vm5  ;;  %vm1109_vm8 = vcmp.gt.f32.partialorder %v2282_v55, %v1092_v15  ;;  %vm3345_vm9 = vcmp.lt.s32.totalorder %v2011_v16, 15  ;;  %1009 = vst [vmem:[%s3381_s25 + $0x1d] sm:$0x1] %v1008_v17  ;;  %s2398_s15 = sadd.f32 %s1905_s11, %s287_s14  ;;  %v1068_v49 = vld [vmem:[%s3381_s25 + $0x20] sm:$0x1] }
  0x92   : > { %v1029_v53 = vadd.f32 %v1028_v18, %v1027_v11  ;;  %v1081_v54 = vrot.slane %v1080_v22, 4  ;;  %vm1096_vm4 = vmand %vm1091_vm3, %vm1094_vm6  ;;  %v1097_v56 = vsel %vm1095_vm7, 1.0, %v1789_v2  ;;  %vm1110_vm10 = vcmp.gt.f32.partialorder %v2300_v60, %v1092_v15  ;;  %s2811_s11 = sld [smem:[#allocation2 + $0x8]] }
  0x93   : > { %v1046_v5 = vadd.f32 %v1045_v48, %v1044_v12  ;;  %v1064_v57 = vrot.slane %v1063_v52, 2  ;;  %v1098_v58 = vsel %vm1096_vm4, 1.0, %v1789_v2  ;;  %v1111_v63 = vstv %s2053_s9 }
  0x94   : > { %v1031_v59 = vadd.f32 %v1030_v62, %v1029_v53  ;;  %v1082_v19 = vadd.f32 %v1081_v54, %v1080_v22  ;;  %v1099_v25 = vadd.f32 %v1098_v58, %v1097_v56  ;;  %vm1112_vm11 = vcmp.lt.f32.partialorder %v2282_v55, %v1111_v63 }
  0x95   : > { %v1047_v21 = vrot.slane %v1046_v5, 1  ;;  %v1065_v61 = vadd.f32 %v1064_v57, %v1063_v52  ;;  %vm1113_vm12 = vcmp.lt.f32.partialorder %v2300_v60, %v1111_v63  ;;  %vm1114_vm13 = vmand %vm1109_vm8, %vm1112_vm11  ;;  %vm1128_vm14 = vcmp.gt.f32.partialorder %v2282_v55, %v1111_v63 }
  0x96   : > { %1032 = vst [vmem:[%s3381_s25 + $0x1e] sm:$0x1] %v1031_v59  ;;  %v1083_v7 = vrot.slane %v1082_v19, 2  ;;  %v1100_v8 = vrot.slane %v1099_v25, 4  ;;  %vm1115_vm15 = vmand %vm1110_vm10, %vm1113_vm12  ;;  %v1116_v9 = vsel %vm1114_vm13, 1.0, %v1789_v2  ;;  %vm1129_vm0 = vcmp.gt.f32.partialorder %v2300_v60, %v1111_v63 }
  0x97   : > { %v1048_v50 = vadd.f32 %v1047_v21, %v1046_v5  ;;  %v1066_v20 = vrot.slane %v1065_v61, 1  ;;  %v1117_v26 = vsel %vm1115_vm15, 1.0, %v1789_v2  ;;  %v2395_v37 = vstv %s2069_s5 }
  0x98   : > { %v1084_v10 = vadd.f32 %v1083_v7, %v1082_v19  ;;  %v1101_v51 = vadd.f32 %v1100_v8, %v1099_v25  ;;  %v1118_v11 = vadd.f32 %v1117_v26, %v1116_v9  ;;  %vm1131_vm1 = vcmp.lt.f32.partialorder %v2282_v55, %v2395_v37  ;;  %s2855_s23 = sadd.f32 %s2811_s11, %s337_s26 }
  0x99   : > { %v2403_v12 = vstv %s286_s13  ;;  %v1050_v13 = vadd.f32 %v1049_v6, %v1048_v50  ;;  %v1067_v14 = vadd.f32 %v1066_v20, %v1065_v61  ;;  %vm1132_vm3 = vcmp.lt.f32.partialorder %v2300_v60, %v2395_v37  ;;  %vm1133_vm5 = vmand %vm1128_vm14, %vm1131_vm1  ;;  %s339_s28 = sadd.f32 %s2800_s1, %s2811_s11 }
  0x9a   : > { %v1085_v18 = vrot.slane %v1084_v10, 1  ;;  %v1102_v22 = vrot.slane %v1101_v51, 2  ;;  %v1119_v62 = vrot.slane %v1118_v11, 4  ;;  %vm1134_vm6 = vmand %vm1129_vm0, %vm1132_vm3  ;;  %v1135_v48 = vsel %vm1133_vm5, 1.0, %v1789_v2  ;;  %s2899_s2 = sadd.f32 %s2811_s11, %s342_s19 }
  0x9b   : > { %1051 = vst [vmem:[%s3381_s25 + $0x1f] sm:$0x1] %v1050_v13  ;;  %v1069_v54 = vadd.f32 %v1068_v49, %v1067_v14  ;;  %v1136_v56 = vsel %vm1134_vm6, 1.0, %v1789_v2  ;;  %v799_v5 = vstv %s2398_s15  ;;  %v2439_v19 = vstv %s2083_s30  ;;  %v2510_v49 = vld [vmem:[%s3381_s25] sm:$0xff]  ;;  %s340_s30 = smul.f32 2.0, %s2800_s1  ;;  %s345_s3 = sadd.f32 %s2811_s11, %s344_s17 }
  0x9c   : > { %v2417_v57 = vadd.f32 %v1085_v18, %v1084_v10  ;;  %v2419_v58 = vadd.f32 %v1102_v22, %v1101_v51  ;;  %v2421_v59 = vadd.f32 %v1136_v56, %v1135_v48  ;;  %s347_s27 = sadd.f32 %s2811_s11, %s346_s16 }
  0x9d   : > { %1070 = vst [vmem:[%s3381_s25 + $0x20] sm:$0x1] %v1069_v54  ;;  %s349_s22 = sadd.f32 %s2811_s11, %s348_s8 }
  0x9e   : > { %v396_v15 = vpop.permute.xlu1 %395  ;;  %s351_s0 = sadd.f32 %s2811_s11, %s350_s6 }
  0x9f   : > { %v390_v17 = vpop.permute.xlu0 %389  ;;  %v399_v53 = vsub.f32 %v1865_v0, %v396_v15  ;;  %s353_s29 = sadd.f32 %s2811_s11, %s352_s18 }
  0xa0   : > { %v393_v52 = vsub.f32 %v1868_v1, %v390_v17  ;;  %v2436_v1 = vadd.f32 %v1119_v62, %v1118_v11  ;;  %s355_s7 = sadd.f32 %s2811_s11, %s354_s12 }
  0xa1   : > { %v2433_v0 = vsel %vm3345_vm9, %v399_v53, %v622_v38  ;;  %v505_v53 = vld [vmem:[%s3381_s25 + $0x3] sm:$0x1]  ;;  %s357_s10 = sadd.f32 %s2811_s11, %s356_s4 }
  0xa2   : > { %v2427_v63 = vsel %vm3345_vm9, %v393_v52, %v428_v23  ;;  %v2441_v25 = vpop.permute.xlu1 %397 }
  0xa3   : > { %v392_v21 = vpop.permute.xlu0 %391  ;;  %vm432_vm7 = vcmp.gt.f32.partialorder %v2427_v63, %v431_v27  ;;  %vm435_vm8 = vcmp.lt.f32.partialorder %v2427_v63, %v2038_v24  ;;  %vm451_vm4 = vcmp.gt.f32.partialorder %v2427_v63, %v2038_v24  ;;  %vm454_vm10 = vcmp.lt.f32.partialorder %v2427_v63, %v2050_v28 }
  0xa4   : > { %v394_v61 = vsub.f32 %v1897_v4, %v392_v21  ;;  %v400_v6 = vsub.f32 %v1894_v3, %v2441_v25  ;;  %vm437_vm11 = vmand %vm432_vm7, %vm435_vm8  ;;  %vm470_vm12 = vcmp.gt.f32.partialorder %v2427_v63, %v2050_v28  ;;  %vm473_vm13 = vcmp.lt.f32.partialorder %v2427_v63, %v2057_v29 }
  0xa5   : > { %v439_v7 = vsel %vm437_vm11, 1.0, %v1789_v2  ;;  %vm456_vm14 = vmand %vm451_vm4, %vm454_vm10  ;;  %vm489_vm15 = vcmp.gt.f32.partialorder %v2427_v63, %v2057_v29  ;;  %vm492_vm0 = vcmp.lt.f32.partialorder %v2427_v63, %v2060_v30  ;;  %vm508_vm1 = vcmp.gt.f32.partialorder %v2427_v63, %v2060_v30 }
  0xa6   : > { %v2470_v4 = vsel %vm3345_vm9, %v394_v61, %v428_v23  ;;  %v458_v8 = vsel %vm456_vm14, 1.0, %v1789_v2  ;;  %vm475_vm3 = vmand %vm470_vm12, %vm473_vm13  ;;  %vm511_vm5 = vcmp.lt.f32.partialorder %v2427_v63, %v2063_v31 }
  0xa7   : > { %vm433_vm7 = vcmp.gt.f32.partialorder %v2470_v4, %v431_v27  ;;  %vm436_vm8 = vcmp.lt.f32.partialorder %v2470_v4, %v2038_v24  ;;  %vm452_vm4 = vcmp.gt.f32.partialorder %v2470_v4, %v2038_v24  ;;  %vm455_vm10 = vcmp.lt.f32.partialorder %v2470_v4, %v2050_v28  ;;  %vm494_vm11 = vmand %vm489_vm15, %vm492_vm0 }
  0xa8   : > { %vm438_vm12 = vmand %vm433_vm7, %vm436_vm8  ;;  %vm471_vm13 = vcmp.gt.f32.partialorder %v2470_v4, %v2050_v28  ;;  %vm474_vm14 = vcmp.lt.f32.partialorder %v2470_v4, %v2057_v29  ;;  %v477_v23 = vsel %vm475_vm3, 1.0, %v1789_v2  ;;  %vm490_vm2 = vcmp.gt.f32.partialorder %v2470_v4, %v2057_v29 }
  0xa9   : > { %v440_v27 = vsel %vm438_vm12, 1.0, %v1789_v2  ;;  %vm457_vm9 = vmand %vm452_vm4, %vm455_vm10  ;;  %vm493_vm6 = vcmp.lt.f32.partialorder %v2470_v4, %v2060_v30  ;;  %v496_v24 = vsel %vm494_vm11, 1.0, %v1789_v2  ;;  %vm509_vm15 = vcmp.gt.f32.partialorder %v2470_v4, %v2060_v30 }
  0xaa   : > { %v441_v28 = vadd.f32 %v440_v27, %v439_v7  ;;  %v459_v9 = vsel %vm457_vm9, 1.0, %v1789_v2  ;;  %vm476_vm0 = vmand %vm471_vm13, %vm474_vm14  ;;  %vm512_vm3 = vcmp.lt.f32.partialorder %v2470_v4, %v2063_v31  ;;  %vm528_vm7 = vcmp.gt.f32.partialorder %v2470_v4, %v2063_v31 }
  0xab   : > { %v460_v29 = vadd.f32 %v459_v9, %v458_v8  ;;  %v478_v50 = vsel %vm476_vm0, 1.0, %v1789_v2  ;;  %vm495_vm8 = vmand %vm490_vm2, %vm493_vm6  ;;  %vm530_vm4 = vcmp.lt.f32.partialorder %v2427_v63, %v2066_v32  ;;  %vm531_vm10 = vcmp.lt.f32.partialorder %v2470_v4, %v2066_v32 }
  0xac   : > { %v442_v20 = vrot.slane %v441_v28, 4  ;;  %v479_v26 = vadd.f32 %v478_v50, %v477_v23  ;;  %v497_v10 = vsel %vm495_vm8, 1.0, %v2510_v49  ;;  %vm513_vm9 = vmand %vm508_vm1, %vm511_vm5  ;;  %vm546_vm2 = vcmp.gt.f32.partialorder %v2427_v63, %v2066_v32 }
  0xad   : > { %v461_v2 = vrot.slane %v460_v29, 4  ;;  %v498_v51 = vadd.f32 %v497_v10, %v496_v24  ;;  %vm514_vm6 = vmand %vm509_vm15, %vm512_vm3  ;;  %v515_v11 = vsel %vm513_vm9, 1.0, %v2510_v49  ;;  %vm547_vm11 = vcmp.gt.f32.partialorder %v2470_v4, %v2066_v32  ;;  %v448_v32 = vld [vmem:[%s3381_s25] sm:$0x1] }
  0xae   : > { %v443_v13 = vadd.f32 %v442_v20, %v441_v28  ;;  %v480_v14 = vrot.slane %v479_v26, 4  ;;  %v516_v15 = vsel %vm514_vm6, 1.0, %v2510_v49  ;;  %vm3384_vm1 = vcmp.gt.f32.partialorder %v2427_v63, %v2063_v31  ;;  %vm533_vm13 = vmand %vm528_vm7, %vm531_vm10 }
  0xaf   : > { %vm532_vm5 = vmand %vm3384_vm1, %vm530_vm4  ;;  %vm549_vm12 = vcmp.lt.f32.partialorder %v2427_v63, %v2073_v33  ;;  %v462_v30 = vadd.f32 %v461_v2, %v460_v29  ;;  %v499_v17 = vrot.slane %v498_v51, 4  ;;  %v517_v18 = vadd.f32 %v516_v15, %v515_v11 }
  0xb0   : > { %v534_v22 = vsel %vm532_vm5, 1.0, %v2510_v49  ;;  %v444_v62 = vrot.slane %v443_v13, 2  ;;  %v481_v48 = vadd.f32 %v480_v14, %v479_v26  ;;  %v535_v52 = vsel %vm533_vm13, 1.0, %v2510_v49  ;;  %vm2552_vm15 = vmand %vm546_vm2, %vm549_vm12 }
  0xb1   : > { %vm550_vm14 = vcmp.lt.f32.partialorder %v2470_v4, %v2073_v33  ;;  %v463_v54 = vrot.slane %v462_v30, 2  ;;  %v500_v56 = vadd.f32 %v499_v17, %v498_v51  ;;  %v518_v31 = vrot.slane %v517_v18, 4  ;;  %v486_v17 = vld [vmem:[%s3381_s25 + $0x2] sm:$0x1] }
  0xb2   : > { %v536_v21 = vadd.f32 %v535_v52, %v534_v22  ;;  %vm552_vm0 = vmand %vm547_vm11, %vm550_vm14  ;;  %v445_v61 = vadd.f32 %v444_v62, %v443_v13  ;;  %v482_v7 = vrot.slane %v481_v48, 2  ;;  %v553_v8 = vsel %vm2552_vm15, 1.0, %v2510_v49  ;;  %v467_v13 = vld [vmem:[%s3381_s25 + $0x1] sm:$0x1] }
  0xb3   : > { %v554_v23 = vsel %vm552_vm0, 1.0, %v2510_v49  ;;  %v464_v27 = vadd.f32 %v463_v54, %v462_v30  ;;  %v501_v24 = vrot.slane %v500_v56, 2  ;;  %v519_v28 = vadd.f32 %v518_v31, %v517_v18 }
  0xb4   : > { %v537_v9 = vrot.slane %v536_v21, 4  ;;  %v446_v29 = vrot.slane %v445_v61, 1  ;;  %v483_v50 = vadd.f32 %v482_v7, %v481_v48  ;;  %v555_v20 = vadd.f32 %v554_v23, %v553_v8  ;;  %v524_v23 = vld [vmem:[%s3381_s25 + $0x4] sm:$0x1] }
  0xb5   : > { %vm565_vm3 = vcmp.gt.f32.partialorder %v2427_v63, %v2073_v33  ;;  %v465_v26 = vrot.slane %v464_v27, 1  ;;  %v502_v10 = vadd.f32 %v501_v24, %v500_v56  ;;  %v520_v2 = vrot.slane %v519_v28, 2 }
  0xb6   : > { %v538_v51 = vadd.f32 %v537_v9, %v536_v21  ;;  %v447_v11 = vadd.f32 %v446_v29, %v445_v61  ;;  %v484_v14 = vrot.slane %v483_v50, 1  ;;  %v556_v15 = vrot.slane %v555_v20, 4 }
  0xb7   : > { %vm566_vm7 = vcmp.gt.f32.partialorder %v2470_v4, %v2073_v33  ;;  %v466_v30 = vadd.f32 %v465_v26, %v464_v27  ;;  %v503_v18 = vrot.slane %v502_v10, 1  ;;  %v521_v22 = vadd.f32 %v520_v2, %v519_v28 }
  0xb8   : > { %v539_v62 = vrot.slane %v538_v51, 2  ;;  %v449_v48 = vadd.f32 %v448_v32, %v447_v11  ;;  %v485_v52 = vadd.f32 %v484_v14, %v483_v50  ;;  %v557_v54 = vadd.f32 %v556_v15, %v555_v20  ;;  %v543_v50 = vld [vmem:[%s3381_s25 + $0x5] sm:$0x1]  ;;  %v562_v11 = vld [vmem:[%s3381_s25 + $0x6] sm:$0x1] }
  0xb9   : > { %vm568_vm8 = vcmp.lt.f32.partialorder %v2427_v63, %v2076_v34  ;;  %v468_v56 = vadd.f32 %v467_v13, %v466_v30  ;;  %v504_v31 = vadd.f32 %v503_v18, %v502_v10  ;;  %v522_v21 = vrot.slane %v521_v22, 1 }
  0xba   : > { %v540_v61 = vadd.f32 %v539_v62, %v538_v51  ;;  %vm2576_vm4 = vmand %vm565_vm3, %vm568_vm8  ;;  %450 = vst [vmem:[%s3381_s25] sm:$0x1] %v449_v48  ;;  %v487_v8 = vadd.f32 %v486_v17, %v485_v52  ;;  %v558_v27 = vrot.slane %v557_v54, 2  ;;  %vm569_vm10 = vcmp.lt.f32.partialorder %v2470_v4, %v2076_v34 }
  0xbb   : > { %v572_v24 = vsel %vm2576_vm4, 1.0, %v2510_v49  ;;  %469 = vst [vmem:[%s3381_s25 + $0x1] sm:$0x1] %v468_v56  ;;  %v506_v28 = vadd.f32 %v505_v53, %v504_v31  ;;  %v523_v9 = vadd.f32 %v522_v21, %v521_v22  ;;  %vm571_vm9 = vmand %vm566_vm7, %vm569_vm10  ;;  %vm584_vm2 = vcmp.gt.f32.partialorder %v2427_v63, %v2076_v34  ;;  %v581_v31 = vld [vmem:[%s3381_s25 + $0x7] sm:$0x1] }
  0xbc   : > { %v541_v29 = vrot.slane %v540_v61, 1  ;;  %488 = vst [vmem:[%s3381_s25 + $0x2] sm:$0x1] %v487_v8  ;;  %v559_v20 = vadd.f32 %v558_v27, %v557_v54  ;;  %v573_v32 = vsel %vm571_vm9, 1.0, %v2510_v49  ;;  %vm585_vm6 = vcmp.gt.f32.partialorder %v2470_v4, %v2076_v34 }
  0xbd   : > { %vm587_vm11 = vcmp.lt.f32.partialorder %v2427_v63, %v2079_v35  ;;  %507 = vst [vmem:[%s3381_s25 + $0x3] sm:$0x1] %v506_v28  ;;  %v525_v33 = vadd.f32 %v524_v23, %v523_v9  ;;  %v574_v10 = vadd.f32 %v573_v32, %v572_v24  ;;  %vm588_vm1 = vcmp.lt.f32.partialorder %v2470_v4, %v2079_v35 }
  0xbe   : > { %v542_v26 = vadd.f32 %v541_v29, %v540_v61  ;;  %vm589_vm5 = vmand %vm584_vm2, %vm587_vm11  ;;  %v560_v2 = vrot.slane %v559_v20, 1  ;;  %vm603_vm13 = vcmp.gt.f32.partialorder %v2427_v63, %v2079_v35  ;;  %vm604_vm14 = vcmp.gt.f32.partialorder %v2470_v4, %v2079_v35  ;;  %v600_v29 = vld [vmem:[%s3381_s25 + $0x8] sm:$0x1] }
  0xbf   : > { %vm590_vm12 = vmand %vm585_vm6, %vm588_vm1  ;;  %v591_v51 = vsel %vm589_vm5, 1.0, %v2510_v49  ;;  %526 = vst [vmem:[%s3381_s25 + $0x4] sm:$0x1] %v525_v33  ;;  %v575_v13 = vrot.slane %v574_v10, 4  ;;  %vm606_vm15 = vcmp.lt.f32.partialorder %v2427_v63, %v605_v36  ;;  %vm607_vm0 = vcmp.lt.f32.partialorder %v2470_v4, %v605_v36 }
  0xc0   : > { %v544_v34 = vadd.f32 %v543_v50, %v542_v26  ;;  %v592_v14 = vsel %vm590_vm12, 1.0, %v2510_v49  ;;  %v561_v15 = vadd.f32 %v560_v2, %v559_v20  ;;  %vm608_vm3 = vmand %vm603_vm13, %vm606_vm15  ;;  %vm3389_vm7 = vcmp.lt.s32.totalorder %v2011_v16, 15 }
  0xc1   : > { %v593_v30 = vadd.f32 %v592_v14, %v591_v51  ;;  %v2624_v35 = vsel %vm3389_vm7, %v400_v6, %v622_v38  ;;  %v576_v17 = vadd.f32 %v575_v13, %v574_v10  ;;  %vm609_vm8 = vmand %vm604_vm14, %vm607_vm0  ;;  %v610_v63 = vsel %vm608_vm3, 1.0, %v2510_v49 }
  0xc2   : > { %545 = vst [vmem:[%s3381_s25 + $0x5] sm:$0x1] %v544_v34  ;;  %vm626_vm4 = vcmp.gt.f32.partialorder %v2433_v0, %v625_v39  ;;  %vm627_vm10 = vcmp.gt.f32.partialorder %v2624_v35, %v625_v39  ;;  %v563_v36 = vadd.f32 %v562_v11, %v561_v15  ;;  %v611_v3 = vsel %vm609_vm8, 1.0, %v2510_v49  ;;  %v619_v34 = vld [vmem:[%s3381_s25 + $0x9] sm:$0x1] }
  0xc3   : > { %v594_v4 = vrot.slane %v593_v30, 4  ;;  %vm629_vm9 = vcmp.lt.f32.partialorder %v2433_v0, %v2098_v40  ;;  %v577_v38 = vrot.slane %v576_v17, 2  ;;  %v612_v25 = vadd.f32 %v611_v3, %v610_v63 }
  0xc4   : > { %vm630_vm2 = vcmp.lt.f32.partialorder %v2624_v35, %v2098_v40  ;;  %vm631_vm6 = vmand %vm626_vm4, %vm629_vm9  ;;  %vm645_vm11 = vcmp.gt.f32.partialorder %v2433_v0, %v2098_v40  ;;  %564 = vst [vmem:[%s3381_s25 + $0x6] sm:$0x1] %v563_v36  ;;  %vm646_vm5 = vcmp.gt.f32.partialorder %v2624_v35, %v2098_v40  ;;  %vm648_vm12 = vcmp.lt.f32.partialorder %v2433_v0, %v2101_v41 }
  0xc5   : > { %v595_v6 = vadd.f32 %v594_v4, %v593_v30  ;;  %vm632_vm1 = vmand %vm627_vm10, %vm630_vm2  ;;  %v633_v39 = vsel %vm631_vm6, 1.0, %v2510_v49  ;;  %v578_v18 = vadd.f32 %v577_v38, %v576_v17  ;;  %v613_v22 = vrot.slane %v612_v25, 4  ;;  %v642_v38 = vld [vmem:[%s3381_s25 + $0xa] sm:$0x1] }
  0xc6   : > { %v634_v62 = vsel %vm632_vm1, 1.0, %v2510_v49  ;;  %vm649_vm13 = vcmp.lt.f32.partialorder %v2624_v35, %v2101_v41  ;;  %vm650_vm14 = vmand %vm645_vm11, %vm648_vm12  ;;  %vm664_vm0 = vcmp.gt.f32.partialorder %v2433_v0, %v2101_v41  ;;  %vm665_vm3 = vcmp.gt.f32.partialorder %v2624_v35, %v2101_v41 }
  0xc7   : > { %v596_v48 = vrot.slane %v595_v6, 2  ;;  %v635_v52 = vadd.f32 %v634_v62, %v633_v39  ;;  %vm651_vm15 = vmand %vm646_vm5, %vm649_vm13  ;;  %v652_v53 = vsel %vm650_vm14, 1.0, %v2510_v49  ;;  %v579_v40 = vrot.slane %v578_v18, 1  ;;  %v661_v62 = vld [vmem:[%s3381_s25 + $0xb] sm:$0x1] }
  0xc8   : > { %v614_v54 = vadd.f32 %v613_v22, %v612_v25  ;;  %v653_v56 = vsel %vm651_vm15, 1.0, %v2510_v49  ;;  %vm667_vm7 = vcmp.lt.f32.partialorder %v2433_v0, %v2108_v42  ;;  %vm668_vm8 = vcmp.lt.f32.partialorder %v2624_v35, %v2108_v42 }
  0xc9   : > { %v597_v21 = vadd.f32 %v596_v48, %v595_v6  ;;  %v636_v61 = vrot.slane %v635_v52, 4  ;;  %v654_v7 = vadd.f32 %v653_v56, %v652_v53  ;;  %v580_v8 = vadd.f32 %v579_v40, %v578_v18  ;;  %vm669_vm4 = vmand %vm664_vm0, %vm667_vm7 }
  0xca   : > { %v615_v23 = vrot.slane %v614_v54, 2  ;;  %vm683_vm10 = vcmp.gt.f32.partialorder %v2433_v0, %v2108_v42  ;;  %vm670_vm9 = vmand %vm665_vm3, %vm668_vm8  ;;  %v671_v28 = vsel %vm669_vm4, 1.0, %v2510_v49  ;;  %vm684_vm2 = vcmp.gt.f32.partialorder %v2624_v35, %v2108_v42 }
  0xcb   : > { %v598_v27 = vrot.slane %v597_v21, 1  ;;  %v637_v41 = vadd.f32 %v636_v61, %v635_v52  ;;  %v655_v24 = vrot.slane %v654_v7, 4  ;;  %v582_v9 = vadd.f32 %v581_v31, %v580_v8 }
  0xcc   : > { %v616_v50 = vadd.f32 %v615_v23, %v614_v54  ;;  %v672_v20 = vsel %vm670_vm9, 1.0, %v2510_v49  ;;  %vm686_vm6 = vcmp.lt.f32.partialorder %v2433_v0, %v2111_v43  ;;  %vm687_vm11 = vcmp.lt.f32.partialorder %v2624_v35, %v2111_v43  ;;  %v680_v23 = vld [vmem:[%s3381_s25 + $0xc] sm:$0x1] }
  0xcd   : > { %v599_v32 = vadd.f32 %v598_v27, %v597_v21  ;;  %v638_v33 = vrot.slane %v637_v41, 2  ;;  %v656_v26 = vadd.f32 %v655_v24, %v654_v7  ;;  %v673_v10 = vadd.f32 %v672_v20, %v671_v28  ;;  %583 = vst [vmem:[%s3381_s25 + $0x7] sm:$0x1] %v582_v9  ;;  %vm688_vm5 = vmand %vm683_vm10, %vm686_vm6 }
  0xce   : > { %v617_v2 = vrot.slane %v616_v50, 1  ;;  %vm702_vm1 = vcmp.gt.f32.partialorder %v2433_v0, %v2111_v43  ;;  %vm689_vm12 = vmand %vm684_vm2, %vm687_vm11  ;;  %v690_v30 = vsel %vm688_vm5, 1.0, %v2510_v49  ;;  %vm703_vm13 = vcmp.gt.f32.partialorder %v2624_v35, %v2111_v43 }
  0xcf   : > { %v601_v51 = vadd.f32 %v600_v29, %v599_v32  ;;  %v639_v11 = vadd.f32 %v638_v33, %v637_v41  ;;  %v657_v13 = vrot.slane %v656_v26, 2  ;;  %v674_v14 = vrot.slane %v673_v10, 4 }
  0xd0   : > { %v618_v15 = vadd.f32 %v617_v2, %v616_v50  ;;  %vm705_vm14 = vcmp.lt.f32.partialorder %v2433_v0, %v2114_v44  ;;  %v691_v4 = vsel %vm689_vm12, 1.0, %v2510_v49  ;;  %vm706_vm0 = vcmp.lt.f32.partialorder %v2624_v35, %v2114_v44 }
  0xd1   : > { %602 = vst [vmem:[%s3381_s25 + $0x8] sm:$0x1] %v601_v51  ;;  %v640_v17 = vrot.slane %v639_v11, 1  ;;  %v658_v63 = vadd.f32 %v657_v13, %v656_v26  ;;  %v675_v36 = vadd.f32 %v674_v14, %v673_v10  ;;  %vm2692_vm15 = vmand %vm702_vm1, %vm705_vm14  ;;  %v692_v25 = vadd.f32 %v691_v4, %v690_v30  ;;  %v699_v51 = vld [vmem:[%s3381_s25 + $0xd] sm:$0x1] }
  0xd2   : > { %v620_v3 = vadd.f32 %v619_v34, %v618_v15  ;;  %v709_v6 = vsel %vm2692_vm15, 1.0, %v2510_v49  ;;  %vm708_vm3 = vmand %vm703_vm13, %vm706_vm0  ;;  %vm721_vm7 = vcmp.gt.f32.partialorder %v2433_v0, %v2114_v44  ;;  %vm722_vm8 = vcmp.gt.f32.partialorder %v2624_v35, %v2114_v44 }
  0xd3   : > { %v641_v39 = vadd.f32 %v640_v17, %v639_v11  ;;  %v659_v18 = vrot.slane %v658_v63, 1  ;;  %v676_v22 = vrot.slane %v675_v36, 2  ;;  %v693_v48 = vrot.slane %v692_v25, 4 }
  0xd4   : > { %621 = vst [vmem:[%s3381_s25 + $0x9] sm:$0x1] %v620_v3  ;;  %v710_v52 = vsel %vm708_vm3, 1.0, %v2510_v49  ;;  %vm724_vm4 = vcmp.lt.f32.partialorder %v2433_v0, %v2117_v45  ;;  %vm725_vm9 = vcmp.lt.f32.partialorder %v2624_v35, %v2117_v45  ;;  %vm740_vm2 = vcmp.gt.f32.partialorder %v2433_v0, %v2117_v45 }
  0xd5   : > { %v643_v53 = vadd.f32 %v642_v38, %v641_v39  ;;  %v660_v40 = vadd.f32 %v659_v18, %v658_v63  ;;  %v677_v43 = vadd.f32 %v676_v22, %v675_v36  ;;  %v711_v54 = vadd.f32 %v710_v52, %v709_v6  ;;  %vm2714_vm10 = vmand %vm721_vm7, %vm724_vm4  ;;  %v718_v36 = vld [vmem:[%s3381_s25 + $0xe] sm:$0x1]  ;;  %v1087_v39 = vld [vmem:[%s3381_s25 + $0x21] sm:$0x1] }
  0xd6   : > { %v694_v31 = vadd.f32 %v693_v48, %v692_v25  ;;  %v728_v21 = vsel %vm2714_vm10, 1.0, %v2510_v49  ;;  %vm727_vm6 = vmand %vm722_vm8, %vm725_vm9  ;;  %vm741_vm11 = vcmp.gt.f32.partialorder %v2624_v35, %v2117_v45  ;;  %vm743_vm1 = vcmp.lt.f32.partialorder %v2433_v0, %v2123_v46 }
  0xd7   : > { %644 = vst [vmem:[%s3381_s25 + $0xa] sm:$0x1] %v643_v53  ;;  %v662_v61 = vadd.f32 %v661_v62, %v660_v40  ;;  %v678_v7 = vrot.slane %v677_v43, 1  ;;  %v712_v8 = vrot.slane %v711_v54, 4  ;;  %v729_v41 = vsel %vm727_vm6, 1.0, %v2510_v49  ;;  %vm745_vm12 = vmand %vm740_vm2, %vm743_vm1 }
  0xd8   : > { %v695_v27 = vrot.slane %v694_v31, 2  ;;  %vm744_vm5 = vcmp.lt.f32.partialorder %v2624_v35, %v2123_v46  ;;  %v730_v9 = vadd.f32 %v729_v41, %v728_v21  ;;  %vm759_vm13 = vcmp.gt.f32.partialorder %v2433_v0, %v2123_v46  ;;  %v737_v53 = vld [vmem:[%s3381_s25 + $0xf] sm:$0x1] }
  0xd9   : > { %663 = vst [vmem:[%s3381_s25 + $0xb] sm:$0x1] %v662_v61  ;;  %v679_v24 = vadd.f32 %v678_v7, %v677_v43  ;;  %v713_v28 = vadd.f32 %v712_v8, %v711_v54  ;;  %vm746_vm14 = vmand %vm741_vm11, %vm744_vm5  ;;  %v747_v29 = vsel %vm745_vm12, 1.0, %v2510_v49  ;;  %vm760_vm15 = vcmp.gt.f32.partialorder %v2624_v35, %v2123_v46  ;;  %v1106_v7 = vld [vmem:[%s3381_s25 + $0x22] sm:$0x1] }
  0xda   : > { %v696_v44 = vadd.f32 %v695_v27, %v694_v31  ;;  %vm762_vm0 = vcmp.lt.f32.partialorder %v2433_v0, %v2126_v47  ;;  %v731_v32 = vrot.slane %v730_v9, 4  ;;  %v748_v45 = vsel %vm746_vm14, 1.0, %v2510_v49 }
  0xdb   : > { %v681_v50 = vadd.f32 %v680_v23, %v679_v24  ;;  %v714_v20 = vrot.slane %v713_v28, 2  ;;  %vm2749_vm3 = vmand %vm759_vm13, %vm762_vm0  ;;  %v749_v10 = vadd.f32 %v748_v45, %v747_v29  ;;  %vm763_vm7 = vcmp.lt.f32.partialorder %v2624_v35, %v2126_v47  ;;  %v775_v45 = vld [vmem:[%s3381_s25 + $0x11] sm:$0x1] }
  0xdc   : > { %v697_v26 = vrot.slane %v696_v44, 1  ;;  %v766_v2 = vsel %vm2749_vm3, 1.0, %v2510_v49  ;;  %v732_v11 = vadd.f32 %v731_v32, %v730_v9  ;;  %vm765_vm8 = vmand %vm760_vm15, %vm763_vm7  ;;  %vm778_vm4 = vcmp.gt.f32.partialorder %v2433_v0, %v2126_v47 }
  0xdd   : > { %682 = vst [vmem:[%s3381_s25 + $0xc] sm:$0x1] %v681_v50  ;;  %v715_v34 = vadd.f32 %v714_v20, %v713_v28  ;;  %vm779_vm10 = vcmp.gt.f32.partialorder %v2624_v35, %v2126_v47  ;;  %v750_v14 = vrot.slane %v749_v10, 4  ;;  %v767_v15 = vsel %vm765_vm8, 1.0, %v2510_v49 }
  0xde   : > { %v698_v13 = vadd.f32 %v697_v26, %v696_v44  ;;  %vm781_vm9 = vcmp.lt.f32.partialorder %v2433_v0, %v2403_v12  ;;  %v733_v17 = vrot.slane %v732_v11, 2  ;;  %v768_v63 = vadd.f32 %v767_v15, %v766_v2 }
  0xdf   : > { %v716_v30 = vrot.slane %v715_v34, 1  ;;  %vm782_vm2 = vcmp.lt.f32.partialorder %v2624_v35, %v2403_v12  ;;  %vm2772_vm6 = vmand %vm778_vm4, %vm781_vm9  ;;  %vm1147_vm11 = vcmp.gt.f32.partialorder %v2282_v55, %v2395_v37  ;;  %v751_v4 = vadd.f32 %v750_v14, %v749_v10 }
  0xe0   : > { %v700_v47 = vadd.f32 %v699_v51, %v698_v13  ;;  %vm784_vm1 = vmand %vm779_vm10, %vm782_vm2  ;;  %v785_v42 = vsel %vm2772_vm6, 1.0, %v2510_v49  ;;  %vm797_vm5 = vcmp.gt.f32.partialorder %v2433_v0, %v2403_v12  ;;  %v734_v38 = vadd.f32 %v733_v17, %v732_v11  ;;  %v1125_v51 = vld [vmem:[%s3381_s25 + $0x23] sm:$0x1] }
  0xe1   : > { %v717_v3 = vadd.f32 %v716_v30, %v715_v34  ;;  %v769_v25 = vrot.slane %v768_v63, 4  ;;  %v786_v6 = vsel %vm784_vm1, 1.0, %v2510_v49  ;;  %vm1148_vm12 = vcmp.gt.f32.partialorder %v2300_v60, %v2395_v37  ;;  %v794_v30 = vld [vmem:[%s3381_s25 + $0x12] sm:$0x1] }
  0xe2   : > { %701 = vst [vmem:[%s3381_s25 + $0xd] sm:$0x1] %v700_v47  ;;  %v752_v18 = vrot.slane %v751_v4, 2  ;;  %v787_v22 = vadd.f32 %v786_v6, %v785_v42  ;;  %vm798_vm13 = vcmp.gt.f32.partialorder %v2624_v35, %v2403_v12  ;;  %vm800_vm14 = vcmp.lt.f32.partialorder %v2433_v0, %v799_v5 }
  0xe3   : > { %v719_v62 = vadd.f32 %v718_v36, %v717_v3  ;;  %v735_v48 = vrot.slane %v734_v38, 1  ;;  %v770_v52 = vadd.f32 %v769_v25, %v768_v63  ;;  %vm801_vm15 = vcmp.lt.f32.partialorder %v2624_v35, %v799_v5  ;;  %vm802_vm0 = vmand %vm797_vm5, %vm800_vm14 }
  0xe4   : > { %v753_v40 = vadd.f32 %v752_v18, %v751_v4  ;;  %v788_v43 = vrot.slane %v787_v22, 4  ;;  %vm803_vm3 = vmand %vm798_vm13, %vm801_vm15  ;;  %v804_v54 = vsel %vm802_vm0, 1.0, %v2510_v49  ;;  %v1088_v56 = vadd.f32 %v1087_v39, %v2417_v57  ;;  %v756_v57 = vld [vmem:[%s3381_s25 + $0x10] sm:$0x1]  ;;  %v1144_v39 = vld [vmem:[%s3381_s25 + $0x24] sm:$0x1] }
  0xe5   : > { %720 = vst [vmem:[%s3381_s25 + $0xe] sm:$0x1] %v719_v62  ;;  %v736_v31 = vadd.f32 %v735_v48, %v734_v38  ;;  %v771_v5 = vrot.slane %v770_v52, 2  ;;  %v805_v35 = vsel %vm803_vm3, 1.0, %v2510_v49  ;;  %v1104_v12 = vrot.slane %v2419_v58, 1 }
  0xe6   : > { %v754_v0 = vrot.slane %v753_v40, 1  ;;  %v789_v21 = vadd.f32 %v788_v43, %v787_v22  ;;  %v806_v61 = vadd.f32 %v805_v35, %v804_v54  ;;  %1089 = vst [vmem:[%s3381_s25 + $0x21] sm:$0x1] %v1088_v56  ;;  %v1121_v8 = vrot.slane %v2436_v1, 2  ;;  %v813_v22 = vld [vmem:[%s3381_s25 + $0x13] sm:$0x1] }
  0xe7   : > { %v738_v23 = vadd.f32 %v737_v53, %v736_v31  ;;  %v772_v27 = vadd.f32 %v771_v5, %v770_v52  ;;  %v1105_v41 = vadd.f32 %v1104_v12, %v2419_v58  ;;  %v1138_v24 = vrot.slane %v2421_v59, 4 }
  0xe8   : > { %v755_v28 = vadd.f32 %v754_v0, %v753_v40  ;;  %v790_v9 = vrot.slane %v789_v21, 2  ;;  %v807_v44 = vrot.slane %v806_v61, 4  ;;  %v1122_v29 = vadd.f32 %v1121_v8, %v2436_v1 }
  0xe9   : > { %739 = vst [vmem:[%s3381_s25 + $0xf] sm:$0x1] %v738_v23  ;;  %v773_v50 = vrot.slane %v772_v27, 1  ;;  %v1107_v20 = vadd.f32 %v1106_v7, %v1105_v41  ;;  %v1139_v32 = vadd.f32 %v1138_v24, %v2421_v59  ;;  %vm1150_vm7 = vcmp.lt.f32.partialorder %v2282_v55, %v2439_v19 }
  0xea   : > { %v757_v58 = vadd.f32 %v756_v57, %v755_v28  ;;  %v791_v33 = vadd.f32 %v790_v9, %v789_v21  ;;  %v808_v26 = vadd.f32 %v807_v44, %v806_v61  ;;  %v1123_v10 = vrot.slane %v1122_v29, 1  ;;  %vm2825_vm8 = vmand %vm1147_vm11, %vm1150_vm7  ;;  %v1163_v28 = vld [vmem:[%s3381_s25 + $0x25] sm:$0x1] }
  0xeb   : > { %v774_v2 = vadd.f32 %v773_v50, %v772_v27  ;;  %1108 = vst [vmem:[%s3381_s25 + $0x22] sm:$0x1] %v1107_v20  ;;  %v1140_v59 = vrot.slane %v1139_v32, 2  ;;  %vm1151_vm4 = vcmp.lt.f32.partialorder %v2300_v60, %v2439_v19  ;;  %v1154_v34 = vsel %vm2825_vm8, 1.0, %v2510_v49 }
  0xec   : > { %758 = vst [vmem:[%s3381_s25 + $0x10] sm:$0x1] %v757_v58  ;;  %v792_v11 = vrot.slane %v791_v33, 1  ;;  %v809_v13 = vrot.slane %v808_v26, 2  ;;  %v1124_v14 = vadd.f32 %v1123_v10, %v1122_v29  ;;  %vm1153_vm10 = vmand %vm1148_vm12, %vm1151_vm4  ;;  %vm1166_vm9 = vcmp.gt.f32.partialorder %v2282_v55, %v2439_v19 }
  0xed   : > { %v776_v15 = vadd.f32 %v775_v45, %v774_v2  ;;  %v1141_v17 = vadd.f32 %v1140_v59, %v1139_v32  ;;  %v1155_v63 = vsel %vm1153_vm10, 1.0, %v2510_v49  ;;  %vm1167_vm2 = vcmp.gt.f32.partialorder %v2300_v60, %v2439_v19 }
  0xee   : > { %v793_v46 = vadd.f32 %v792_v11, %v791_v33  ;;  %v810_v37 = vadd.f32 %v809_v13, %v808_v26  ;;  %v1126_v47 = vadd.f32 %v1125_v51, %v1124_v14  ;;  %v1156_v36 = vadd.f32 %v1155_v63, %v1154_v34 }
  0xef   : > { %777 = vst [vmem:[%s3381_s25 + $0x11] sm:$0x1] %v776_v15  ;;  %v1142_v4 = vrot.slane %v1141_v17, 1  ;;  %v1168_v42 = vstv %s2105_s20  ;;  %v1187_v3 = vstv %s2120_s21  ;;  %v2852_v38 = vstv %s2811_s11  ;;  %s3400_s20 = sld [smem:[#allocation9_spill]] }
  0xf0   : > { %v795_v25 = vadd.f32 %v794_v30, %v793_v46  ;;  %v811_v6 = vrot.slane %v810_v37, 1  ;;  %1127 = vst [vmem:[%s3381_s25 + $0x23] sm:$0x1] %v1126_v47  ;;  %v1157_v18 = vrot.slane %v1156_v36, 4  ;;  %vm1169_vm6 = vcmp.lt.f32.partialorder %v2282_v55, %v1168_v42  ;;  %s2884_s21 = sadd.f32 %s2811_s11, %s340_s30  ;;  %v1182_v15 = vld [vmem:[%s3381_s25 + $0x26] sm:$0x1] }
  0xf1   : > { %v1143_v62 = vadd.f32 %v1142_v4, %v1141_v17  ;;  %vm1170_vm11 = vcmp.lt.f32.partialorder %v2300_v60, %v1168_v42  ;;  %vm2869_vm1 = vmand %vm1166_vm9, %vm1169_vm6  ;;  %vm1185_vm5 = vcmp.gt.f32.partialorder %v2282_v55, %v1168_v42  ;;  %vm1186_vm12 = vcmp.gt.f32.partialorder %v2300_v60, %v1168_v42 }
  0xf2   : > { %796 = vst [vmem:[%s3381_s25 + $0x12] sm:$0x1] %v795_v25  ;;  %v812_v52 = vadd.f32 %v811_v6, %v810_v37  ;;  %v1158_v53 = vadd.f32 %v1157_v18, %v1156_v36  ;;  %vm1172_vm13 = vmand %vm1167_vm2, %vm1170_vm11  ;;  %v1173_v40 = vsel %vm2869_vm1, 1.0, %v2510_v49  ;;  %vm1188_vm14 = vcmp.lt.f32.partialorder %v2282_v55, %v1187_v3  ;;  %v1201_v36 = vld [vmem:[%s3381_s25 + $0x27] sm:$0x1] }
  0xf3   : > { %v1145_v43 = vadd.f32 %v1144_v39, %v1143_v62  ;;  %v1174_v54 = vsel %vm1172_vm13, 1.0, %v2510_v49  ;;  %vm1189_vm15 = vcmp.lt.f32.partialorder %v2300_v60, %v1187_v3  ;;  %vm2888_vm0 = vmand %vm1185_vm5, %vm1188_vm14  ;;  %vm3405_vm3 = vcmp.lt.s32.totalorder %v2011_v16, 16 }
  0xf4   : > { %v814_v31 = vadd.f32 %v813_v22, %v812_v52  ;;  %v1159_v5 = vrot.slane %v1158_v53, 2  ;;  %v1175_v35 = vadd.f32 %v1174_v54, %v1173_v40  ;;  %vm1191_vm7 = vmand %vm1186_vm12, %vm1189_vm15  ;;  %v1192_v12 = vsel %vm2888_vm0, 1.0, %v2510_v49 }
  0xf5   : > { %v1739_v56 = vld [vmem:[%s3400_s20] sm:$0xff]  ;;  %1146 = vst [vmem:[%s3381_s25 + $0x24] sm:$0x1] %v1145_v43  ;;  %v1193_v0 = vsel %vm1191_vm7, 1.0, %v2510_v49  ;;  %v1740_v21 = vld [vmem:[%s3400_s20 + $0x8] sm:$0xff]  ;;  %vm3406_vm8 = vmmov %vm3405_vm3  ;;  %v2916_v7 = vstv %s2855_s23 }
  0xf6   : > { %v2896_v55 = vsel %vm3405_vm3, %v1739_v56, %v2852_v38  ;;  %v2913_v61 = vsel %vm3406_vm8, %v1740_v21, %v2852_v38  ;;  %v2921_v60 = vstv %s339_s28  ;;  %815 = vst [vmem:[%s3381_s25 + $0x13] sm:$0x1] %v814_v31  ;;  %v1160_v8 = vadd.f32 %v1159_v5, %v1158_v53  ;;  %v1224_v56 = vld [vmem:[%s3381_s25 + $0x28] sm:$0x1] }
  0xf7   : > { %v1176_v23 = vrot.slane %v1175_v35, 4  ;;  %v1194_v57 = vadd.f32 %v1193_v0, %v1192_v12  ;;  %vm1208_vm4 = vcmp.gt.f32.partialorder %v2896_v55, %v2916_v7  ;;  %vm1209_vm10 = vcmp.gt.f32.partialorder %v2913_v61, %v2916_v7 }
  0xf8   : > { %vm1211_vm9 = vcmp.lt.f32.partialorder %v2896_v55, %v2921_v60  ;;  %vm1212_vm2 = vcmp.lt.f32.partialorder %v2913_v61, %v2921_v60  ;;  %vm1227_vm6 = vcmp.gt.f32.partialorder %v2896_v55, %v2921_v60  ;;  %v1161_v27 = vrot.slane %v1160_v8, 1 }
  0xf9   : > { %v1177_v41 = vadd.f32 %v1176_v23, %v1175_v35  ;;  %v1195_v24 = vrot.slane %v1194_v57, 4  ;;  %vm1213_vm11 = vmand %vm1208_vm4, %vm1211_vm9  ;;  %vm1228_vm1 = vcmp.gt.f32.partialorder %v2913_v61, %v2921_v60  ;;  %v2939_v44 = vstv %s2884_s21 }
  0xfa   : > { %vm1214_vm5 = vmand %vm1209_vm10, %vm1212_vm2  ;;  %v1215_v9 = vsel %vm1213_vm11, 1.0, %v2510_v49  ;;  %v2942_v29 = vstv %s2899_s2  ;;  %v2944_v50 = vstv %s345_s3  ;;  %v1162_v20 = vadd.f32 %v1161_v27, %v1160_v8 }
  0xfb   : > { %v1178_v32 = vrot.slane %v1177_v41, 2  ;;  %v1196_v58 = vadd.f32 %v1195_v24, %v1194_v57  ;;  %v1216_v45 = vsel %vm1214_vm5, 1.0, %v2510_v49  ;;  %vm1230_vm12 = vcmp.lt.f32.partialorder %v2896_v55, %v2939_v44 }
  0xfc   : > { %v1217_v33 = vadd.f32 %v1216_v45, %v1215_v9  ;;  %vm1231_vm13 = vcmp.lt.f32.partialorder %v2913_v61, %v2939_v44  ;;  %vm1246_vm14 = vcmp.gt.f32.partialorder %v2896_v55, %v2939_v44  ;;  %v1164_v26 = vadd.f32 %v1163_v28, %v1162_v20  ;;  %vm2957_vm15 = vmand %vm1227_vm6, %vm1230_vm12  ;;  %v1243_v20 = vld [vmem:[%s3381_s25 + $0x29] sm:$0x1] }
  0xfd   : > { %v1179_v10 = vadd.f32 %v1178_v32, %v1177_v41  ;;  %v1197_v1 = vrot.slane %v1196_v58, 2  ;;  %vm1247_vm0 = vcmp.gt.f32.partialorder %v2913_v61, %v2939_v44  ;;  %vm1233_vm3 = vmand %vm1228_vm1, %vm1231_vm13  ;;  %v1234_v59 = vsel %vm2957_vm15, 1.0, %v2510_v49 }
  0xfe   : > { %v1218_v51 = vrot.slane %v1217_v33, 4  ;;  %vm1249_vm7 = vcmp.lt.f32.partialorder %v2896_v55, %v2942_v29  ;;  %vm1250_vm8 = vcmp.lt.f32.partialorder %v2913_v61, %v2942_v29  ;;  %1165 = vst [vmem:[%s3381_s25 + $0x25] sm:$0x1] %v1164_v26  ;;  %v1235_v13 = vsel %vm1233_vm3, 1.0, %v2510_v49 }
  0xff   : > { %v1180_v34 = vrot.slane %v1179_v10, 1  ;;  %v1198_v11 = vadd.f32 %v1197_v1, %v1196_v58  ;;  %vm2978_vm4 = vmand %vm1246_vm14, %vm1249_vm7  ;;  %vm1265_vm10 = vcmp.gt.f32.partialorder %v2896_v55, %v2942_v29  ;;  %v1236_v17 = vadd.f32 %v1235_v13, %v1234_v59 }
 0x100   : > { %v1219_v30 = vadd.f32 %v1218_v51, %v1217_v33  ;;  %vm1252_vm9 = vmand %vm1247_vm0, %vm1250_vm8  ;;  %v1253_v63 = vsel %vm2978_vm4, 1.0, %v2510_v49  ;;  %vm1266_vm2 = vcmp.gt.f32.partialorder %v2913_v61, %v2942_v29  ;;  %vm1268_vm6 = vcmp.lt.f32.partialorder %v2896_v55, %v2944_v50 }
 0x101   : > { %v1181_v46 = vadd.f32 %v1180_v34, %v1179_v10  ;;  %v1199_v37 = vrot.slane %v1198_v11, 1  ;;  %v1254_v47 = vsel %vm1252_vm9, 1.0, %v2510_v49  ;;  %v1237_v42 = vrot.slane %v1236_v17, 4  ;;  %vm1270_vm1 = vmand %vm1265_vm10, %vm1268_vm6  ;;  %v1262_v10 = vld [vmem:[%s3381_s25 + $0x2a] sm:$0x1] }
 0x102   : > { %v1220_v4 = vrot.slane %v1219_v30, 2  ;;  %v1255_v3 = vadd.f32 %v1254_v47, %v1253_v63  ;;  %vm1269_vm11 = vcmp.lt.f32.partialorder %v2913_v61, %v2944_v50  ;;  %v1272_v39 = vsel %vm1270_vm1, 1.0, %v2510_v49  ;;  %v1281_v63 = vld [vmem:[%s3381_s25 + $0x2b] sm:$0x1] }
 0x103   : > { %v1183_v25 = vadd.f32 %v1182_v15, %v1181_v46  ;;  %v1200_v6 = vadd.f32 %v1199_v37, %v1198_v11  ;;  %vm1271_vm5 = vmand %vm1266_vm2, %vm1269_vm11  ;;  %vm1284_vm12 = vcmp.gt.f32.partialorder %v2896_v55, %v2944_v50  ;;  %v1238_v22 = vadd.f32 %v1237_v42, %v1236_v17  ;;  %v3080_v11 = vld [vmem:[%s3381_s25 + $0x30] sm:$0xff] }
 0x104   : > { %v1221_v18 = vadd.f32 %v1220_v4, %v1219_v30  ;;  %v1256_v62 = vrot.slane %v1255_v3, 4  ;;  %v1273_v48 = vsel %vm1271_vm5, 1.0, %v2510_v49  ;;  %vm1285_vm13 = vcmp.gt.f32.partialorder %v2913_v61, %v2944_v50 }
 0x105   : > { %1184 = vst [vmem:[%s3381_s25 + $0x26] sm:$0x1] %v1183_v25  ;;  %v1202_v52 = vadd.f32 %v1201_v36, %v1200_v6  ;;  %v1274_v53 = vadd.f32 %v1273_v48, %v1272_v39  ;;  %v3017_v40 = vstv %s347_s27  ;;  %v1239_v54 = vrot.slane %v1238_v22, 2 }
 0x106   : > { %v1222_v43 = vrot.slane %v1221_v18, 1  ;;  %v1257_v19 = vadd.f32 %v1256_v62, %v1255_v3  ;;  %vm1287_vm14 = vcmp.lt.f32.partialorder %v2896_v55, %v3017_v40  ;;  %vm1288_vm15 = vcmp.lt.f32.partialorder %v2913_v61, %v3017_v40 }
 0x107   : > { %1203 = vst [vmem:[%s3381_s25 + $0x27] sm:$0x1] %v1202_v52  ;;  %v1275_v31 = vrot.slane %v1274_v53, 4  ;;  %vm3028_vm0 = vmand %vm1284_vm12, %vm1287_vm14  ;;  %vm1303_vm3 = vcmp.gt.f32.partialorder %v2896_v55, %v3017_v40  ;;  %vm1304_vm7 = vcmp.gt.f32.partialorder %v2913_v61, %v3017_v40  ;;  %v1240_v12 = vadd.f32 %v1239_v54, %v1238_v22  ;;  %v1300_v52 = vld [vmem:[%s3381_s25 + $0x2c] sm:$0x1] }
 0x108   : > { %v1223_v35 = vadd.f32 %v1222_v43, %v1221_v18  ;;  %v1258_v0 = vrot.slane %v1257_v19, 2  ;;  %vm1290_vm8 = vmand %vm1285_vm13, %vm1288_vm15  ;;  %v1291_v21 = vsel %vm3028_vm0, 1.0, %v2510_v49  ;;  %v3044_v57 = vstv %s349_s22 }
 0x109   : > { %v1276_v8 = vadd.f32 %v1275_v31, %v1274_v53  ;;  %v1292_v23 = vsel %vm1290_vm8, 1.0, %v2510_v49  ;;  %v3046_v27 = vstv %s351_s0  ;;  %v1241_v24 = vrot.slane %v1240_v12, 1 }
 0x10a   : > { %v1225_v41 = vadd.f32 %v1224_v56, %v1223_v35  ;;  %v1259_v28 = vadd.f32 %v1258_v0, %v1257_v19  ;;  %v1293_v9 = vadd.f32 %v1292_v23, %v1291_v21  ;;  %vm1306_vm4 = vcmp.lt.f32.partialorder %v2896_v55, %v3044_v57 }
 0x10b   : > { %v1277_v32 = vrot.slane %v1276_v8, 2  ;;  %vm1307_vm10 = vcmp.lt.f32.partialorder %v2913_v61, %v3044_v57  ;;  %vm1322_vm9 = vcmp.gt.f32.partialorder %v2896_v55, %v3044_v57  ;;  %v1242_v58 = vadd.f32 %v1241_v24, %v1240_v12  ;;  %vm3061_vm2 = vmand %vm1303_vm3, %vm1306_vm4 }
 0x10c   : > { %1226 = vst [vmem:[%s3381_s25 + $0x28] sm:$0x1] %v1225_v41  ;;  %v1260_v45 = vrot.slane %v1259_v28, 1  ;;  %v1294_v33 = vrot.slane %v1293_v9, 4  ;;  %vm1323_vm6 = vcmp.gt.f32.partialorder %v2913_v61, %v3044_v57  ;;  %vm1309_vm11 = vmand %vm1304_vm7, %vm1307_vm10  ;;  %v1310_v2 = vsel %vm3061_vm2, 1.0, %v2510_v49 }
 0x10d   : > { %v1278_v1 = vadd.f32 %v1277_v32, %v1276_v8  ;;  %vm1325_vm1 = vcmp.lt.f32.partialorder %v2896_v55, %v3046_v27  ;;  %vm1326_vm5 = vcmp.lt.f32.partialorder %v2913_v61, %v3046_v27  ;;  %v1244_v51 = vadd.f32 %v1243_v20, %v1242_v58  ;;  %v1743_v58 = vld [vmem:[%s3417_s24 + $0x8] sm:$0xff] }
 0x10e   : > { %v1261_v59 = vadd.f32 %v1260_v45, %v1259_v28  ;;  %v1295_v34 = vadd.f32 %v1294_v33, %v1293_v9  ;;  %v1311_v13 = vsel %vm1309_vm11, 1.0, %v3080_v11  ;;  %vm3086_vm12 = vmand %vm1322_vm9, %vm1325_vm1  ;;  %vm1341_vm14 = vcmp.gt.f32.partialorder %v2896_v55, %v3046_v27  ;;  %v1319_v28 = vld [vmem:[%s3381_s25 + $0x2d] sm:$0x1] }
 0x10f   : > { %v1279_v14 = vrot.slane %v1278_v1, 1  ;;  %v1312_v15 = vadd.f32 %v1311_v13, %v1310_v2  ;;  %vm1328_vm13 = vmand %vm1323_vm6, %vm1326_vm5  ;;  %v1329_v30 = vsel %vm3086_vm12, 1.0, %v3080_v11  ;;  %1245 = vst [vmem:[%s3381_s25 + $0x29] sm:$0x1] %v1244_v51  ;;  %vm1342_vm15 = vcmp.gt.f32.partialorder %v2913_v61, %v3046_v27 }
 0x110   : > { %v1263_v17 = vadd.f32 %v1262_v10, %v1261_v59  ;;  %v1296_v46 = vrot.slane %v1295_v34, 2  ;;  %v1330_v37 = vsel %vm1328_vm13, 1.0, %v3080_v11  ;;  %v3105_v42 = vstv %s353_s29 }
 0x111   : > { %v1280_v47 = vadd.f32 %v1279_v14, %v1278_v1  ;;  %v1313_v36 = vrot.slane %v1312_v15, 4  ;;  %v1331_v4 = vadd.f32 %v1330_v37, %v1329_v30  ;;  %vm1344_vm0 = vcmp.lt.f32.partialorder %v2896_v55, %v3105_v42  ;;  %v1338_v1 = vld [vmem:[%s3381_s25 + $0x2e] sm:$0x1] }
 0x112   : > { %1264 = vst [vmem:[%s3381_s25 + $0x2a] sm:$0x1] %v1263_v17  ;;  %v1297_v3 = vadd.f32 %v1296_v46, %v1295_v34  ;;  %vm1345_vm3 = vcmp.lt.f32.partialorder %v2913_v61, %v3105_v42  ;;  %vm1360_vm7 = vcmp.gt.f32.partialorder %v2896_v55, %v3105_v42  ;;  %vm1346_vm8 = vmand %vm1341_vm14, %vm1344_vm0  ;;  %vm1361_vm4 = vcmp.gt.f32.partialorder %v2913_v61, %v3105_v42 }
 0x113   : > { %v1282_v25 = vadd.f32 %v1281_v63, %v1280_v47  ;;  %v1314_v6 = vadd.f32 %v1313_v36, %v1312_v15  ;;  %v1332_v39 = vrot.slane %v1331_v4, 4  ;;  %vm1347_vm10 = vmand %vm1342_vm15, %vm1345_vm3  ;;  %v1348_v22 = vsel %vm1346_vm8, 1.0, %v3080_v11  ;;  %v1357_v63 = vld [vmem:[%s3381_s25 + $0x2f] sm:$0x1] }
 0x114   : > { %v1298_v18 = vrot.slane %v1297_v3, 1  ;;  %v3123_v62 = vstv %s355_s7  ;;  %v3125_v48 = vstv %s357_s10  ;;  %v1349_v54 = vsel %vm1347_vm10, 1.0, %v3080_v11 }
 0x115   : > { %1283 = vst [vmem:[%s3381_s25 + $0x2b] sm:$0x1] %v1282_v25  ;;  %v1315_v53 = vrot.slane %v1314_v6, 2  ;;  %v1333_v43 = vadd.f32 %v1332_v39, %v1331_v4  ;;  %vm1363_vm9 = vcmp.lt.f32.partialorder %v2896_v55, %v3123_v62  ;;  %v1350_v56 = vadd.f32 %v1349_v54, %v1348_v22  ;;  %v1376_v39 = vld [vmem:[%s3381_s25 + $0x30] sm:$0x1] }
 0x116   : > { %v1299_v19 = vadd.f32 %v1298_v18, %v1297_v3  ;;  %vm1364_vm2 = vcmp.lt.f32.partialorder %v2913_v61, %v3123_v62  ;;  %vm1365_vm6 = vmand %vm1360_vm7, %vm1363_vm9  ;;  %vm1379_vm11 = vcmp.gt.f32.partialorder %v2896_v55, %v3123_v62  ;;  %vm1380_vm5 = vcmp.gt.f32.partialorder %v2913_v61, %v3123_v62 }
 0x117   : > { %v1316_v31 = vadd.f32 %v1315_v53, %v1314_v6  ;;  %v1334_v5 = vrot.slane %v1333_v43, 2  ;;  %vm1366_vm1 = vmand %vm1361_vm4, %vm1364_vm2  ;;  %v1367_v35 = vsel %vm1365_vm6, 1.0, %v3080_v11  ;;  %v1351_v0 = vrot.slane %v1350_v56, 4 }
 0x118   : > { %v1301_v12 = vadd.f32 %v1300_v52, %v1299_v19  ;;  %v1368_v21 = vsel %vm1366_vm1, 1.0, %v3080_v11  ;;  %vm1382_vm12 = vcmp.lt.f32.partialorder %v2896_v55, %v3125_v48  ;;  %vm1383_vm13 = vcmp.lt.f32.partialorder %v2913_v61, %v3125_v48  ;;  %v1742_v55 = vld [vmem:[%s3417_s24] sm:$0xff] }
 0x119   : > { %v1317_v8 = vrot.slane %v1316_v31, 1  ;;  %v1335_v23 = vadd.f32 %v1334_v5, %v1333_v43  ;;  %v1369_v41 = vadd.f32 %v1368_v21, %v1367_v35  ;;  %vm3150_vm14 = vmand %vm1379_vm11, %vm1382_vm12  ;;  %v1352_v9 = vadd.f32 %v1351_v0, %v1350_v56 }
 0x11a   : > { %1302 = vst [vmem:[%s3381_s25 + $0x2c] sm:$0x1] %v1301_v12  ;;  %vm1385_vm15 = vmand %vm1380_vm5, %vm1383_vm13  ;;  %v1386_v20 = vsel %vm3150_vm14, 1.0, %v3080_v11  ;;  %vm3420_vm0 = vcmp.lt.s32.totalorder %v2011_v16, 16 }
 0x11b   : > { %v3163_v32 = vsel %vm3420_vm0, %v1742_v55, %v2852_v38  ;;  %vm3421_vm3 = vmmov %vm3420_vm0  ;;  %v1318_v45 = vadd.f32 %v1317_v8, %v1316_v31  ;;  %v1336_v33 = vrot.slane %v1335_v23, 1  ;;  %v1370_v26 = vrot.slane %v1369_v41, 4  ;;  %v1415_v55 = vld [vmem:[%s3381_s25 + $0x32] sm:$0x1] }
 0x11c   : > { %v3169_v61 = vsel %vm3421_vm3, %v1743_v58, %v2852_v38  ;;  %v1387_v10 = vsel %vm1385_vm15, 1.0, %v3080_v11  ;;  %v1353_v2 = vrot.slane %v1352_v9, 2  ;;  %vm1400_vm7 = vcmp.gt.f32.partialorder %v3163_v32, %v2916_v7 }
 0x11d   : > { %v1388_v51 = vadd.f32 %v1387_v10, %v1386_v20  ;;  %vm1401_vm8 = vcmp.gt.f32.partialorder %v3169_v61, %v2916_v7  ;;  %v1320_v59 = vadd.f32 %v1319_v28, %v1318_v45  ;;  %v1337_v34 = vadd.f32 %v1336_v33, %v1335_v23 }
 0x11e   : > { %v1371_v16 = vadd.f32 %v1370_v26, %v1369_v41  ;;  %vm1402_vm4 = vcmp.lt.f32.partialorder %v3163_v32, %v2921_v60  ;;  %v1354_v38 = vadd.f32 %v1353_v2, %v1352_v9  ;;  %vm1403_vm10 = vcmp.lt.f32.partialorder %v3169_v61, %v2921_v60 }
 0x11f   : > { %v1389_v13 = vrot.slane %v1388_v51, 4  ;;  %vm1404_vm9 = vmand %vm1400_vm7, %vm1402_vm4  ;;  %vm1418_vm2 = vcmp.gt.f32.partialorder %v3163_v32, %v2921_v60  ;;  %1321 = vst [vmem:[%s3381_s25 + $0x2d] sm:$0x1] %v1320_v59  ;;  %v1339_v49 = vadd.f32 %v1338_v1, %v1337_v34  ;;  %vm1419_vm11 = vcmp.gt.f32.partialorder %v3169_v61, %v2921_v60  ;;  %v1433_v59 = vld [vmem:[%s3381_s25 + $0x33] sm:$0x1] }
 0x120   : > { %v1372_v7 = vrot.slane %v1371_v16, 2  ;;  %vm1405_vm6 = vmand %vm1401_vm8, %vm1403_vm10  ;;  %v1406_v14 = vsel %vm1404_vm9, 1.0, %v3080_v11  ;;  %v1355_v15 = vrot.slane %v1354_v38, 1  ;;  %vm1420_vm1 = vcmp.lt.f32.partialorder %v3163_v32, %v2939_v44 }
 0x121   : > { %v1390_v30 = vadd.f32 %v1389_v13, %v1388_v51  ;;  %v1407_v17 = vsel %vm1405_vm6, 1.0, %v3080_v11  ;;  %1340 = vst [vmem:[%s3381_s25 + $0x2e] sm:$0x1] %v1339_v49  ;;  %vm1421_vm5 = vcmp.lt.f32.partialorder %v3169_v61, %v2939_v44  ;;  %vm1422_vm12 = vmand %vm1418_vm2, %vm1420_vm1  ;;  %vm1436_vm13 = vcmp.gt.f32.partialorder %v3163_v32, %v2939_v44 }
 0x122   : > { %v1373_v46 = vadd.f32 %v1372_v7, %v1371_v16  ;;  %v1408_v37 = vadd.f32 %v1407_v17, %v1406_v14  ;;  %v1356_v47 = vadd.f32 %v1355_v15, %v1354_v38  ;;  %vm1423_vm14 = vmand %vm1419_vm11, %vm1421_vm5  ;;  %v1424_v4 = vsel %vm1422_vm12, 1.0, %v3080_v11  ;;  %v1451_v17 = vld [vmem:[%s3381_s25 + $0x34] sm:$0x1] }
 0x123   : > { %v1391_v36 = vrot.slane %v1390_v30, 2  ;;  %vm1437_vm15 = vcmp.gt.f32.partialorder %v3169_v61, %v2939_v44  ;;  %v1425_v6 = vsel %vm1423_vm14, 1.0, %v3080_v11  ;;  %vm1438_vm0 = vcmp.lt.f32.partialorder %v3163_v32, %v2942_v29  ;;  %v1395_v44 = vld [vmem:[%s3381_s25 + $0x31] sm:$0x1] }
 0x124   : > { %v1374_v3 = vrot.slane %v1373_v46, 1  ;;  %v1409_v25 = vrot.slane %v1408_v37, 4  ;;  %v1358_v60 = vadd.f32 %v1357_v63, %v1356_v47  ;;  %v1426_v22 = vadd.f32 %v1425_v6, %v1424_v4  ;;  %vm1440_vm7 = vmand %vm1436_vm13, %vm1438_vm0 }
 0x125   : > { %v1392_v18 = vadd.f32 %v1391_v36, %v1390_v30  ;;  %vm1439_vm3 = vcmp.lt.f32.partialorder %v3169_v61, %v2942_v29  ;;  %v1442_v43 = vsel %vm1440_vm7, 1.0, %v3080_v11  ;;  %vm1454_vm4 = vcmp.gt.f32.partialorder %v3163_v32, %v2942_v29 }
 0x126   : > { %v1375_v52 = vadd.f32 %v1374_v3, %v1373_v46  ;;  %v1410_v53 = vadd.f32 %v1409_v25, %v1408_v37  ;;  %vm1441_vm8 = vmand %vm1437_vm15, %vm1439_vm3  ;;  %1359 = vst [vmem:[%s3381_s25 + $0x2f] sm:$0x1] %v1358_v60  ;;  %v1427_v19 = vrot.slane %v1426_v22, 4  ;;  %vm1455_vm10 = vcmp.gt.f32.partialorder %v3169_v61, %v2942_v29  ;;  %v1469_v60 = vld [vmem:[%s3381_s25 + $0x35] sm:$0x1] }
 0x127   : > { %v1393_v54 = vrot.slane %v1392_v18, 1  ;;  %v1443_v56 = vsel %vm1441_vm8, 1.0, %v3080_v11  ;;  %vm1456_vm9 = vcmp.lt.f32.partialorder %v3163_v32, %v2944_v50  ;;  %vm1457_vm2 = vcmp.lt.f32.partialorder %v3169_v61, %v2944_v50 }
 0x128   : > { %v1377_v31 = vadd.f32 %v1376_v39, %v1375_v52  ;;  %v1411_v5 = vrot.slane %v1410_v53, 2  ;;  %v1444_v35 = vadd.f32 %v1443_v56, %v1442_v43  ;;  %v1428_v0 = vadd.f32 %v1427_v19, %v1426_v22  ;;  %vm1458_vm6 = vmand %vm1454_vm4, %vm1456_vm9  ;;  %v1487_v56 = vld [vmem:[%s3381_s25 + $0x36] sm:$0x1] }
 0x129   : > { %v1394_v12 = vadd.f32 %v1393_v54, %v1392_v18  ;;  %vm1472_vm11 = vcmp.gt.f32.partialorder %v3163_v32, %v2944_v50  ;;  %vm1459_vm1 = vmand %vm1455_vm10, %vm1457_vm2  ;;  %v1460_v8 = vsel %vm1458_vm6, 1.0, %v3080_v11  ;;  %vm1473_vm5 = vcmp.gt.f32.partialorder %v3169_v61, %v2944_v50 }
 0x12a   : > { %1378 = vst [vmem:[%s3381_s25 + $0x30] sm:$0x1] %v1377_v31  ;;  %v1412_v29 = vadd.f32 %v1411_v5, %v1410_v53  ;;  %v1445_v21 = vrot.slane %v1444_v35, 4  ;;  %v1429_v41 = vrot.slane %v1428_v0, 2  ;;  %v1461_v24 = vsel %vm1459_vm1, 1.0, %v3080_v11 }
 0x12b   : > { %v1396_v23 = vadd.f32 %v1395_v44, %v1394_v12  ;;  %vm1474_vm12 = vcmp.lt.f32.partialorder %v3163_v32, %v3017_v40  ;;  %v1462_v20 = vadd.f32 %v1461_v24, %v1460_v8  ;;  %vm1475_vm13 = vcmp.lt.f32.partialorder %v3169_v61, %v3017_v40 }
 0x12c   : > { %v1413_v28 = vrot.slane %v1412_v29, 1  ;;  %v1446_v9 = vadd.f32 %v1445_v21, %v1444_v35  ;;  %vm1476_vm14 = vmand %vm1472_vm11, %vm1474_vm12  ;;  %v1430_v58 = vadd.f32 %v1429_v41, %v1428_v0  ;;  %vm1490_vm0 = vcmp.gt.f32.partialorder %v3163_v32, %v3017_v40  ;;  %v1505_v41 = vld [vmem:[%s3381_s25 + $0x37] sm:$0x1] }
 0x12d   : > { %1397 = vst [vmem:[%s3381_s25 + $0x31] sm:$0x1] %v1396_v23  ;;  %vm1477_vm15 = vmand %vm1473_vm5, %vm1475_vm13  ;;  %v1478_v45 = vsel %vm1476_vm14, 1.0, %v3080_v11  ;;  %vm1491_vm3 = vcmp.gt.f32.partialorder %v3169_v61, %v3017_v40  ;;  %v1463_v10 = vrot.slane %v1462_v20, 4  ;;  %vm1492_vm7 = vcmp.lt.f32.partialorder %v3163_v32, %v3044_v57 }
 0x12e   : > { %v1414_v33 = vadd.f32 %v1413_v28, %v1412_v29  ;;  %v1447_v26 = vrot.slane %v1446_v9, 2  ;;  %v1479_v1 = vsel %vm1477_vm15, 1.0, %v3080_v11  ;;  %v1431_v50 = vrot.slane %v1430_v58, 1  ;;  %vm1494_vm4 = vmand %vm1490_vm0, %vm1492_vm7 }
 0x12f   : > { %v1480_v2 = vadd.f32 %v1479_v1, %v1478_v45  ;;  %vm1493_vm8 = vcmp.lt.f32.partialorder %v3169_v61, %v3044_v57  ;;  %v1464_v16 = vadd.f32 %v1463_v10, %v1462_v20  ;;  %vm1508_vm10 = vcmp.gt.f32.partialorder %v3163_v32, %v3044_v57 }
 0x130   : > { %v1416_v51 = vadd.f32 %v1415_v55, %v1414_v33  ;;  %v1448_v34 = vadd.f32 %v1447_v26, %v1446_v9  ;;  %v1432_v38 = vadd.f32 %v1431_v50, %v1430_v58  ;;  %vm1495_vm9 = vmand %vm1491_vm3, %vm1493_vm8  ;;  %v1496_v49 = vsel %vm1494_vm4, 1.0, %v3080_v11  ;;  %v1523_v33 = vld [vmem:[%s3381_s25 + $0x38] sm:$0x1] }
 0x131   : > { %v1481_v13 = vrot.slane %v1480_v2, 4  ;;  %vm1509_vm2 = vcmp.gt.f32.partialorder %v3169_v61, %v3044_v57  ;;  %v1465_v14 = vrot.slane %v1464_v16, 2  ;;  %v1497_v15 = vsel %vm1495_vm9, 1.0, %v3080_v11 }
 0x132   : > { %1417 = vst [vmem:[%s3381_s25 + $0x32] sm:$0x1] %v1416_v51  ;;  %v1449_v7 = vrot.slane %v1448_v34, 1  ;;  %vm1510_vm6 = vcmp.lt.f32.partialorder %v3163_v32, %v3046_v27  ;;  %v1434_v30 = vadd.f32 %v1433_v59, %v1432_v38  ;;  %v1498_v46 = vadd.f32 %v1497_v15, %v1496_v49  ;;  %v1541_v59 = vld [vmem:[%s3381_s25 + $0x39] sm:$0x1] }
 0x133   : > { %v1482_v63 = vadd.f32 %v1481_v13, %v1480_v2  ;;  %vm1511_vm11 = vcmp.lt.f32.partialorder %v3169_v61, %v3046_v27  ;;  %vm1512_vm1 = vmand %vm1508_vm10, %vm1510_vm6  ;;  %v1466_v37 = vadd.f32 %v1465_v14, %v1464_v16  ;;  %vm1526_vm12 = vcmp.gt.f32.partialorder %v3163_v32, %v3046_v27 }
 0x134   : > { %v1450_v40 = vadd.f32 %v1449_v7, %v1448_v34  ;;  %vm1513_vm5 = vmand %vm1509_vm2, %vm1511_vm11  ;;  %v1514_v47 = vsel %vm1512_vm1, 1.0, %v3080_v11  ;;  %1435 = vst [vmem:[%s3381_s25 + $0x33] sm:$0x1] %v1434_v30  ;;  %v1499_v4 = vrot.slane %v1498_v46, 4  ;;  %vm1527_vm13 = vcmp.gt.f32.partialorder %v3169_v61, %v3046_v27  ;;  %v1559_v7 = vld [vmem:[%s3381_s25 + $0x3a] sm:$0x1] }
 0x135   : > { %v1483_v36 = vrot.slane %v1482_v63, 2  ;;  %v1515_v3 = vsel %vm1513_vm5, 1.0, %v3080_v11  ;;  %v1467_v25 = vrot.slane %v1466_v37, 1  ;;  %vm1528_vm14 = vcmp.lt.f32.partialorder %v3163_v32, %v3105_v42 }
 0x136   : > { %v1452_v57 = vadd.f32 %v1451_v17, %v1450_v40  ;;  %v1516_v6 = vadd.f32 %v1515_v3, %v1514_v47  ;;  %v1500_v18 = vadd.f32 %v1499_v4, %v1498_v46  ;;  %vm1529_vm15 = vcmp.lt.f32.partialorder %v3169_v61, %v3105_v42  ;;  %vm1530_vm0 = vmand %vm1526_vm12, %vm1528_vm14 }
 0x137   : > { %v1484_v39 = vadd.f32 %v1483_v36, %v1482_v63  ;;  %vm1544_vm3 = vcmp.gt.f32.partialorder %v3163_v32, %v3105_v42  ;;  %v1468_v22 = vadd.f32 %v1467_v25, %v1466_v37  ;;  %vm1531_vm7 = vmand %vm1527_vm13, %vm1529_vm15  ;;  %v1532_v52 = vsel %vm1530_vm0, 1.0, %v3080_v11  ;;  %v1577_v63 = vld [vmem:[%s3381_s25 + $0x3b] sm:$0x1] }
 0x138   : > { %1453 = vst [vmem:[%s3381_s25 + $0x34] sm:$0x1] %v1452_v57  ;;  %v1517_v27 = vrot.slane %v1516_v6, 4  ;;  %vm1545_vm8 = vcmp.gt.f32.partialorder %v3169_v61, %v3105_v42  ;;  %v1501_v43 = vrot.slane %v1500_v18, 2  ;;  %v1533_v54 = vsel %vm1531_vm7, 1.0, %v3080_v11 }
 0x139   : > { %v1485_v53 = vrot.slane %v1484_v39, 1  ;;  %vm1546_vm4 = vcmp.lt.f32.partialorder %v3163_v32, %v3123_v62  ;;  %v1470_v19 = vadd.f32 %v1469_v60, %v1468_v22  ;;  %v1534_v44 = vadd.f32 %v1533_v54, %v1532_v52 }
 0x13a   : > { %v1518_v31 = vadd.f32 %v1517_v27, %v1516_v6  ;;  %vm1547_vm10 = vcmp.lt.f32.partialorder %v3169_v61, %v3123_v62  ;;  %vm1548_vm9 = vmand %vm1544_vm3, %vm1546_vm4  ;;  %v1502_v35 = vadd.f32 %v1501_v43, %v1500_v18  ;;  %vm1562_vm6 = vcmp.gt.f32.partialorder %v3163_v32, %v3123_v62 }
 0x13b   : > { %v1486_v5 = vadd.f32 %v1485_v53, %v1484_v39  ;;  %vm1549_vm2 = vmand %vm1545_vm8, %vm1547_vm10  ;;  %v1550_v12 = vsel %vm1548_vm9, 1.0, %v3080_v11  ;;  %1471 = vst [vmem:[%s3381_s25 + $0x35] sm:$0x1] %v1470_v19  ;;  %v1535_v29 = vrot.slane %v1534_v44, 4  ;;  %vm1563_vm11 = vcmp.gt.f32.partialorder %v3169_v61, %v3123_v62 }
 0x13c   : > { %v1519_v0 = vrot.slane %v1518_v31, 2  ;;  %v1551_v21 = vsel %vm1549_vm2, 1.0, %v3080_v11  ;;  %v1503_v8 = vrot.slane %v1502_v35, 1  ;;  %vm1564_vm1 = vcmp.lt.f32.partialorder %v3163_v32, %v3125_v48 }
 0x13d   : > { %v1488_v42 = vadd.f32 %v1487_v56, %v1486_v5  ;;  %v1552_v23 = vadd.f32 %v1551_v21, %v1550_v12  ;;  %v1536_v28 = vadd.f32 %v1535_v29, %v1534_v44  ;;  %vm1565_vm5 = vcmp.lt.f32.partialorder %v3169_v61, %v3125_v48  ;;  %vm1566_vm12 = vmand %vm1562_vm6, %vm1564_vm1 }
 0x13e   : > { %v1520_v24 = vadd.f32 %v1519_v0, %v1518_v31  ;;  %v1504_v9 = vadd.f32 %v1503_v8, %v1502_v35  ;;  %vm1567_vm13 = vmand %vm1563_vm11, %vm1565_vm5  ;;  %v1568_v62 = vsel %vm1566_vm12, 1.0, %v3080_v11 }
 0x13f   : > { %1489 = vst [vmem:[%s3381_s25 + $0x36] sm:$0x1] %v1488_v42  ;;  %v1553_v20 = vrot.slane %v1552_v23, 4  ;;  %v1537_v58 = vrot.slane %v1536_v28, 2  ;;  %v1569_v32 = vsel %vm1567_vm13, 1.0, %v3080_v11 }
 0x140   : > { %v1521_v55 = vrot.slane %v1520_v24, 1  ;;  %v1506_v45 = vadd.f32 %v1505_v41, %v1504_v9  ;;  %v1570_v10 = vadd.f32 %v1569_v32, %v1568_v62 }
 0x141   : > { %v1554_v26 = vadd.f32 %v1553_v20, %v1552_v23  ;;  %v1538_v61 = vadd.f32 %v1537_v58, %v1536_v28 }
 0x142   : > { %v1522_v48 = vadd.f32 %v1521_v55, %v1520_v24  ;;  %1507 = vst [vmem:[%s3381_s25 + $0x37] sm:$0x1] %v1506_v45  ;;  %v1571_v50 = vrot.slane %v1570_v10, 4 }
 0x143   : > { %v1555_v1 = vrot.slane %v1554_v26, 2  ;;  %v1539_v51 = vrot.slane %v1538_v61, 1 }
 0x144   : > { %v1524_v2 = vadd.f32 %v1523_v33, %v1522_v48  ;;  %v1572_v16 = vadd.f32 %v1571_v50, %v1570_v10 }
 0x145   : > { %v1556_v34 = vadd.f32 %v1555_v1, %v1554_v26  ;;  %v1540_v11 = vadd.f32 %v1539_v51, %v1538_v61 }
 0x146   : > { %1525 = vst [vmem:[%s3381_s25 + $0x38] sm:$0x1] %v1524_v2  ;;  %v1573_v13 = vrot.slane %v1572_v16, 2 }
 0x147   : > { %v1557_v38 = vrot.slane %v1556_v34, 1  ;;  %v1542_v49 = vadd.f32 %v1541_v59, %v1540_v11 }
 0x148   : > { %v1574_v15 = vadd.f32 %v1573_v13, %v1572_v16 }
 0x149   : > { %v1558_v14 = vadd.f32 %v1557_v38, %v1556_v34  ;;  %1543 = vst [vmem:[%s3381_s25 + $0x39] sm:$0x1] %v1542_v49 }
 0x14a   : > { %v1575_v17 = vrot.slane %v1574_v15, 1 }
 0x14b   : > { %v1560_v30 = vadd.f32 %v1559_v7, %v1558_v14 }
 0x14c   : > { %v1576_v46 = vadd.f32 %v1575_v17, %v1574_v15 }
 0x14d   : > { %1561 = vst [vmem:[%s3381_s25 + $0x3a] sm:$0x1] %v1560_v30 }
 0x14e   : > { %v1578_v40 = vadd.f32 %v1577_v63, %v1576_v46 }
 0x150   : > { %1579 = vst [vmem:[%s3381_s25 + $0x3b] sm:$0x1] %v1578_v40 }
 0x151 PF: > { %s3422_s14 = sld [smem:[#allocation6_spill]] }
 0x152   : > { %s3423_s12 = sld [smem:[#allocation5_spill]] }
 0x153   : > { %s3424_s13 = sld [smem:[#allocation7_spill]] }
 0x157   : > { %s14_s14 = sadd.s32 1, %s3422_s14  }
 0x158   : > { %p11_p2 = scmp.ge.s32.totalorder %s14_s14, 4  }
 0x15a   :  { %13 = sbr.rel (!%p11_p2) target bundleno = 7 (0x7), region = 76 }
 0x15f   :  { %1601 = vsyncpa [#allocation3], 1 }
 0x160   :  { %1603 = vsyncpa [#allocation3 + $0x1], 1 }

</bundles_post_ra>
